<compile_context>
chip_gen: v7x
topology: tpu7x:2x2x1
jax: 0.10.0
libtpu: 0.0.40
codegen_flags: <defaults>
</compile_context>

<pallas_src>
import math

import jax
import jax.numpy as jnp
import numpy as np
from jax.experimental import pallas as pl
from jax.experimental.pallas import tpu as pltpu


def _batch_fold(batch):
    """Batch elements per grid step.

    Fold the whole batch into one grid step on single-TC chips (v5e/v6e);
    keep one element per step on v7x so both TensorCores get work.  Folding
    is always correct, so any failure to identify the chip falls back to it.
    """
    try:
        kind = jax.devices()[0].device_kind.lower()
    except Exception:
        kind = ""
    two_tensorcores = ("v7" in kind) or ("7x" in kind)
    return 1 if (two_tensorcores and batch > 1) else batch


# ---------------------------------------------------------------------------
# Fused Pallas forward
# ---------------------------------------------------------------------------
def attention_grade_forward(q, k, v, i, params, num_heads):
    """Fused Pallas forward for Attention_Grade.

    q: (B, Nq, E); k, v: (B, Nk, E).
    i: static Python int selecting proj_0 / proj_1 for the value projection.
    params: dict name -> (weight (in, out), bias (1, out)); weights are the
            transpose of the torch nn.Linear weight so the kernel does x @ W + b.
    """
    wq, bq = params["q_proj"]
    wk, bk = params["k_proj"]
    wv, bv = params["proj_0"] if i == 0 else params["proj_1"]  # static selection
    wo, bo = params["out_proj"]

    B, Nq, E = q.shape
    _, Nk, _ = k.shape
    I = wq.shape[1]
    assert I % num_heads == 0, "num_heads must divide internal_dim"
    Ch = I // num_heads
    scale = 1.0 / math.sqrt(Ch)

    BB = _batch_fold(B)            # batch elements per grid step
    assert B % BB == 0
    Mq, Mk = BB * Nq, BB * Nk      # rows per grid step after folding

    # 2-D views: batch folded into rows so each projection is one MXU pass.
    q2 = q.reshape(B * Nq, E)
    k2 = k.reshape(B * Nk, E)
    v2 = v.reshape(B * Nk, E)

    def kernel(q_ref, k_ref, v_ref, wq_ref, bq_ref, wk_ref, bk_ref,
               wv_ref, bv_ref, wo_ref, bo_ref, out_ref, hbuf_ref):
        # --- q/k/v projections: one MXU matmul each over all BB*N rows ------
        qp = jnp.dot(q_ref[...], wq_ref[...],
                     preferred_element_type=jnp.float32) + bq_ref[...]
        kp = jnp.dot(k_ref[...], wk_ref[...],
                     preferred_element_type=jnp.float32) + bk_ref[...]
        vp = jnp.dot(v_ref[...], wv_ref[...],
                     preferred_element_type=jnp.float32) + bv_ref[...]

        # Fold 1/sqrt(Ch) into qp once (single (Mq, I) VALU scale).
        qp = qp * scale

        # --- attention per (batch element, head); static, fully unrolled ----
        for bi in range(BB):
            rq = slice(bi * Nq, (bi + 1) * Nq)
            rk = slice(bi * Nk, (bi + 1) * Nk)
            qb = qp[rq, :]              # (Nq, I)
            vb = vp[rk, :]              # (Nk, I)
            kbT = kp[rk, :].T           # (I, Nk): one XLU transpose / element

            for h in range(num_heads):
                hs = slice(h * Ch, (h + 1) * Ch)
                # scores = (q / sqrt(Ch)) @ k^T : plain (Nq,Ch)@(Ch,Nk) matmul
                s = jnp.dot(qb[:, hs], kbT[hs, :],
                            preferred_element_type=jnp.float32)      # (Nq,Nk)
                m = jnp.max(s, axis=-1, keepdims=True)
                p = jnp.exp(s - m)
                # Deferred normalization: EUP approx reciprocal, applied to
                # the (Nq, Ch) head output instead of the (Nq, Nk) probs.
                inv = pl.reciprocal(jnp.sum(p, axis=-1, keepdims=True),
                                    approx=True)
                oh = jnp.dot(p, vb[:, hs],
                             preferred_element_type=jnp.float32)     # (Nq,Ch)
                hbuf_ref[rq, hs] = oh * inv

        # --- out projection: ONE K=I matmul over all rows + one bias add ----
        out_ref[...] = (jnp.dot(hbuf_ref[...], wo_ref[...],
                                preferred_element_type=jnp.float32)
                        + bo_ref[...]).astype(out_ref.dtype)
        # TODO(synk): for image-token attention (Nq/Nk ~ 4096) the dense
        # (Nq, Nk) score block no longer fits v7x's 64 MiB VMEM — switch to a
        # KV-tiled online-softmax (flash) variant before scaling these shapes.

    rep = lambda b: (0, 0)   # weights / biases: same block every grid step
    out2 = pl.pallas_call(
        kernel,
        out_shape=jax.ShapeDtypeStruct((B * Nq, E), jnp.float32),
        grid_spec=pltpu.PrefetchScalarGridSpec(
            num_scalar_prefetch=0,
            grid=(B // BB,),
            in_specs=[
                pl.BlockSpec((Mq, E), lambda b: (b, 0)),               # q
                pl.BlockSpec((Mk, E), lambda b: (b, 0)),               # k
                pl.BlockSpec((Mk, E), lambda b: (b, 0)),               # v
                pl.BlockSpec((E, I), rep), pl.BlockSpec((1, I), rep),  # q_proj
                pl.BlockSpec((E, I), rep), pl.BlockSpec((1, I), rep),  # k_proj
                pl.BlockSpec((E, I), rep), pl.BlockSpec((1, I), rep),  # proj_i
                pl.BlockSpec((I, E), rep), pl.BlockSpec((1, E), rep),  # out_proj
            ],
            out_specs=pl.BlockSpec((Mq, E), lambda b: (b, 0)),
            scratch_shapes=[pltpu.VMEM((Mq, I), jnp.float32)],
        ),
        compiler_params=pltpu.CompilerParams(
            dimension_semantics=("parallel",)),
    )(q2, k2, v2, wq, bq, wk, bk, wv, bv, wo, bo)
    return out2.reshape(B, Nq, E)


# ---------------------------------------------------------------------------
# Pure-JAX reference (mirrors the PyTorch module line-for-line)
# ---------------------------------------------------------------------------
def attention_grade_reference(q, k, v, i, params, num_heads):
    hp = jax.lax.Precision.HIGHEST
    lin = lambda x, wb: jnp.dot(x, wb[0], precision=hp) + wb[1]

    kp = lin(k, params["k_proj"])
    qp = lin(q, params["q_proj"])

    def sep(x):
        b, n, c = x.shape
        return x.reshape(b, n, num_heads, c // num_heads).transpose(0, 2, 1, 3)

    qh, kh = sep(qp), sep(kp)
    cph = qh.shape[-1]
    attn = jnp.einsum("bhqc,bhkc->bhqk", qh, kh, precision=hp) / math.sqrt(cph)
    attn = jax.nn.softmax(attn, axis=-1)

    vp = lin(v, params["proj_0"] if i == 0 else params["proj_1"])
    vh = sep(vp)
    out = jnp.einsum("bhqk,bhkc->bhqc", attn, vh, precision=hp)
    b, hds, n, c = out.shape
    out = out.transpose(0, 2, 1, 3).reshape(b, n, hds * c)
    return jnp.dot(out, params["out_proj"][0], precision=hp) + params["out_proj"][1]


# ---------------------------------------------------------------------------
if __name__ == "__main__":
    B, NQ, NK = 2, 64, 64
    EMB, HEADS, DOWNSAMPLE = 128, 4, 1
    INTERNAL = EMB // DOWNSAMPLE

    key = jax.random.PRNGKey(0)
    ks = jax.random.split(key, 13)

    def init_linear(kw, kb, fan_in, fan_out):
        bound = 1.0 / math.sqrt(fan_in)
        w = jax.random.uniform(kw, (fan_in, fan_out), dtype=jnp.float32,
                               minval=-bound, maxval=bound)
        b = jax.random.uniform(kb, (1, fan_out), dtype=jnp.float32,
                               minval=-bound, maxval=bound)
        return w, b

    params = {
        "q_proj":   init_linear(ks[0], ks[1], EMB, INTERNAL),
        "k_proj":   init_linear(ks[2], ks[3], EMB, INTERNAL),
        "proj_0":   init_linear(ks[4], ks[5], EMB, INTERNAL),
        "proj_1":   init_linear(ks[6], ks[7], EMB, INTERNAL),
        "out_proj": init_linear(ks[8], ks[9], INTERNAL, EMB),
    }

    q = jax.random.normal(ks[10], (B, NQ, EMB), dtype=jnp.float32)
    k = jax.random.normal(ks[11], (B, NK, EMB), dtype=jnp.float32)
    v = jax.random.normal(ks[12], (B, NK, EMB), dtype=jnp.float32)

    i = 1  # static index, mirrors torch's counter[i] picking proj_1

    out = attention_grade_forward(q, k, v, i, params, HEADS)
    out = jax.block_until_ready(out)

    ref = attention_grade_reference(q, k, v, i, params, HEADS)
    ref = jax.block_until_ready(ref)

    assert out.shape == (B, NQ, EMB), out.shape
    assert jnp.all(jnp.isfinite(out))
    np.testing.assert_allclose(np.asarray(out), np.asarray(ref),
                               rtol=2e-3, atol=2e-3)
    print("KERNEL_OK")
</pallas_src>

<mosaic_0001>
module attributes {stable_mosaic.version = 11 : i64} {
  func.func @kernel(%arg0: i32, %arg1: memref<128x128xf32, #tpu.memory_space<vmem>>, %arg2: memref<128x128xf32, #tpu.memory_space<vmem>>, %arg3: memref<128x128xf32, #tpu.memory_space<vmem>>, %arg4: memref<128x128xf32, #tpu.memory_space<vmem>>, %arg5: memref<1x128xf32, #tpu.memory_space<vmem>>, %arg6: memref<128x128xf32, #tpu.memory_space<vmem>>, %arg7: memref<1x128xf32, #tpu.memory_space<vmem>>, %arg8: memref<128x128xf32, #tpu.memory_space<vmem>>, %arg9: memref<1x128xf32, #tpu.memory_space<vmem>>, %arg10: memref<128x128xf32, #tpu.memory_space<vmem>>, %arg11: memref<1x128xf32, #tpu.memory_space<vmem>>, %arg12: memref<128x128xf32, #tpu.memory_space<vmem>>, %arg13: memref<128x128xf32, #tpu.memory_space<vmem>>) attributes {dimension_semantics = [#tpu.dimension_semantics<parallel>], iteration_bounds = array<i64: 1>, scalar_prefetch = 0 : i64, scratch_operands = 1 : i64, tpu.core_type = #tpu.core_type<tc>, window_params = [{transform_indices = @transform_0, window_bounds = array<i64: 128, 128>}, {transform_indices = @transform_1, window_bounds = array<i64: 128, 128>}, {transform_indices = @transform_2, window_bounds = array<i64: 128, 128>}, {pipeline_mode = #tpu.pipeline_mode<synchronous>, transform_indices = @transform_3, window_bounds = array<i64: 128, 128>}, {pipeline_mode = #tpu.pipeline_mode<synchronous>, transform_indices = @transform_4, window_bounds = array<i64: 1, 128>}, {pipeline_mode = #tpu.pipeline_mode<synchronous>, transform_indices = @transform_5, window_bounds = array<i64: 128, 128>}, {pipeline_mode = #tpu.pipeline_mode<synchronous>, transform_indices = @transform_6, window_bounds = array<i64: 1, 128>}, {pipeline_mode = #tpu.pipeline_mode<synchronous>, transform_indices = @transform_7, window_bounds = array<i64: 128, 128>}, {pipeline_mode = #tpu.pipeline_mode<synchronous>, transform_indices = @transform_8, window_bounds = array<i64: 1, 128>}, {pipeline_mode = #tpu.pipeline_mode<synchronous>, transform_indices = @transform_9, window_bounds = array<i64: 128, 128>}, {pipeline_mode = #tpu.pipeline_mode<synchronous>, transform_indices = @transform_10, window_bounds = array<i64: 1, 128>}, {transform_indices = @transform_11, window_bounds = array<i64: 128, 128>}]} {
    %c0 = arith.constant 0 : index
    %c0_0 = arith.constant 0 : index
    %0 = vector.load %arg1[%c0, %c0_0] : memref<128x128xf32, #tpu.memory_space<vmem>>, vector<128x128xf32>
    %c0_1 = arith.constant 0 : index
    %c0_2 = arith.constant 0 : index
    %1 = vector.load %arg4[%c0_1, %c0_2] : memref<128x128xf32, #tpu.memory_space<vmem>>, vector<128x128xf32>
    %cst = arith.constant dense<0.000000e+00> : vector<128x128xf32>
    %2 = tpu.matmul %0, %1, %cst {dimension_numbers = #tpu.dot_dimension_numbers<[1], [0], [0], [1], [0, 0, 1, 1], [], []>} : vector<128x128xf32>, vector<128x128xf32>, vector<128x128xf32> -> vector<128x128xf32>
    %c0_3 = arith.constant 0 : index
    %c0_4 = arith.constant 0 : index
    %3 = vector.load %arg5[%c0_3, %c0_4] : memref<1x128xf32, #tpu.memory_space<vmem>>, vector<1x128xf32>
    %4 = vector.broadcast %3 : vector<1x128xf32> to vector<128x128xf32>
    %5 = arith.addf %2, %4 : vector<128x128xf32>
    %c0_5 = arith.constant 0 : index
    %c0_6 = arith.constant 0 : index
    %6 = vector.load %arg2[%c0_5, %c0_6] : memref<128x128xf32, #tpu.memory_space<vmem>>, vector<128x128xf32>
    %c0_7 = arith.constant 0 : index
    %c0_8 = arith.constant 0 : index
    %7 = vector.load %arg6[%c0_7, %c0_8] : memref<128x128xf32, #tpu.memory_space<vmem>>, vector<128x128xf32>
    %cst_9 = arith.constant dense<0.000000e+00> : vector<128x128xf32>
    %8 = tpu.matmul %6, %7, %cst_9 {dimension_numbers = #tpu.dot_dimension_numbers<[1], [0], [0], [1], [0, 0, 1, 1], [], []>} : vector<128x128xf32>, vector<128x128xf32>, vector<128x128xf32> -> vector<128x128xf32>
    %c0_10 = arith.constant 0 : index
    %c0_11 = arith.constant 0 : index
    %9 = vector.load %arg7[%c0_10, %c0_11] : memref<1x128xf32, #tpu.memory_space<vmem>>, vector<1x128xf32>
    %10 = vector.broadcast %9 : vector<1x128xf32> to vector<128x128xf32>
    %11 = arith.addf %8, %10 : vector<128x128xf32>
    %c0_12 = arith.constant 0 : index
    %c0_13 = arith.constant 0 : index
    %12 = vector.load %arg3[%c0_12, %c0_13] : memref<128x128xf32, #tpu.memory_space<vmem>>, vector<128x128xf32>
    %c0_14 = arith.constant 0 : index
    %c0_15 = arith.constant 0 : index
    %13 = vector.load %arg8[%c0_14, %c0_15] : memref<128x128xf32, #tpu.memory_space<vmem>>, vector<128x128xf32>
    %cst_16 = arith.constant dense<0.000000e+00> : vector<128x128xf32>
    %14 = tpu.matmul %12, %13, %cst_16 {dimension_numbers = #tpu.dot_dimension_numbers<[1], [0], [0], [1], [0, 0, 1, 1], [], []>} : vector<128x128xf32>, vector<128x128xf32>, vector<128x128xf32> -> vector<128x128xf32>
    %c0_17 = arith.constant 0 : index
    %c0_18 = arith.constant 0 : index
    %15 = vector.load %arg9[%c0_17, %c0_18] : memref<1x128xf32, #tpu.memory_space<vmem>>, vector<1x128xf32>
    %16 = vector.broadcast %15 : vector<1x128xf32> to vector<128x128xf32>
    %17 = arith.addf %14, %16 : vector<128x128xf32>
    %cst_19 = arith.constant 0.176776692 : f32
    %18 = vector.broadcast %cst_19 : f32 to vector<128x128xf32>
    %19 = arith.mulf %5, %18 : vector<128x128xf32>
    %20 = vector.extract_strided_slice %19 {offsets = [0, 0], sizes = [64, 128], strides = [1, 1]} : vector<128x128xf32> to vector<64x128xf32>
    %21 = vector.extract_strided_slice %17 {offsets = [0, 0], sizes = [64, 128], strides = [1, 1]} : vector<128x128xf32> to vector<64x128xf32>
    %22 = vector.extract_strided_slice %11 {offsets = [0, 0], sizes = [64, 128], strides = [1, 1]} : vector<128x128xf32> to vector<64x128xf32>
    %23 = tpu.transpose %22, [1, 0] : vector<64x128xf32> -> vector<128x64xf32>
    %24 = vector.extract_strided_slice %20 {offsets = [0, 0], sizes = [64, 32], strides = [1, 1]} : vector<64x128xf32> to vector<64x32xf32>
    %25 = vector.extract_strided_slice %23 {offsets = [0, 0], sizes = [32, 64], strides = [1, 1]} : vector<128x64xf32> to vector<32x64xf32>
    %cst_20 = arith.constant dense<0.000000e+00> : vector<64x64xf32>
    %26 = tpu.matmul %24, %25, %cst_20 {dimension_numbers = #tpu.dot_dimension_numbers<[1], [0], [0], [1], [0, 0, 1, 1], [], []>} : vector<64x32xf32>, vector<32x64xf32>, vector<64x64xf32> -> vector<64x64xf32>
    %cst_21 = arith.constant dense<0xFF800000> : vector<64xf32>
    %27 = vector.multi_reduction <maximumf>, %26, %cst_21 [1] : vector<64x64xf32> to vector<64xf32>
    %28 = vector.shape_cast %27 : vector<64xf32> to vector<64x1xf32>
    %29 = vector.broadcast %28 : vector<64x1xf32> to vector<64x64xf32>
    %30 = arith.subf %26, %29 : vector<64x64xf32>
    %31 = math.exp %30 : vector<64x64xf32>
    %cst_22 = arith.constant dense<0.000000e+00> : vector<64xf32>
    %32 = vector.multi_reduction <add>, %31, %cst_22 [1] : vector<64x64xf32> to vector<64xf32>
    %33 = vector.shape_cast %32 : vector<64xf32> to vector<64x1xf32>
    %34 = tpu.reciprocal %33 {approx = true} : vector<64x1xf32> -> vector<64x1xf32>
    %35 = vector.extract_strided_slice %21 {offsets = [0, 0], sizes = [64, 32], strides = [1, 1]} : vector<64x128xf32> to vector<64x32xf32>
    %cst_23 = arith.constant dense<0.000000e+00> : vector<64x32xf32>
    %36 = tpu.matmul %31, %35, %cst_23 {dimension_numbers = #tpu.dot_dimension_numbers<[1], [0], [0], [1], [0, 0, 1, 1], [], []>} : vector<64x64xf32>, vector<64x32xf32>, vector<64x32xf32> -> vector<64x32xf32>
    %37 = vector.broadcast %34 : vector<64x1xf32> to vector<64x32xf32>
    %38 = arith.mulf %36, %37 : vector<64x32xf32>
    %c0_24 = arith.constant 0 : index
    %c0_25 = arith.constant 0 : index
    %39 = vector.load %arg13[%c0_24, %c0_25] : memref<128x128xf32, #tpu.memory_space<vmem>>, vector<64x32xf32>
    tpu.vector_store %arg13[%c0_24, %c0_25], %38 {strides = array<i32>} : memref<128x128xf32, #tpu.memory_space<vmem>>, vector<64x32xf32>,
    %40 = vector.extract_strided_slice %20 {offsets = [0, 32], sizes = [64, 32], strides = [1, 1]} : vector<64x128xf32> to vector<64x32xf32>
    %41 = vector.extract_strided_slice %23 {offsets = [32, 0], sizes = [32, 64], strides = [1, 1]} : vector<128x64xf32> to vector<32x64xf32>
    %cst_26 = arith.constant dense<0.000000e+00> : vector<64x64xf32>
    %42 = tpu.matmul %40, %41, %cst_26 {dimension_numbers = #tpu.dot_dimension_numbers<[1], [0], [0], [1], [0, 0, 1, 1], [], []>} : vector<64x32xf32>, vector<32x64xf32>, vector<64x64xf32> -> vector<64x64xf32>
    %cst_27 = arith.constant dense<0xFF800000> : vector<64xf32>
    %43 = vector.multi_reduction <maximumf>, %42, %cst_27 [1] : vector<64x64xf32> to vector<64xf32>
    %44 = vector.shape_cast %43 : vector<64xf32> to vector<64x1xf32>
    %45 = vector.broadcast %44 : vector<64x1xf32> to vector<64x64xf32>
    %46 = arith.subf %42, %45 : vector<64x64xf32>
    %47 = math.exp %46 : vector<64x64xf32>
    %cst_28 = arith.constant dense<0.000000e+00> : vector<64xf32>
    %48 = vector.multi_reduction <add>, %47, %cst_28 [1] : vector<64x64xf32> to vector<64xf32>
    %49 = vector.shape_cast %48 : vector<64xf32> to vector<64x1xf32>
    %50 = tpu.reciprocal %49 {approx = true} : vector<64x1xf32> -> vector<64x1xf32>
    %51 = vector.extract_strided_slice %21 {offsets = [0, 32], sizes = [64, 32], strides = [1, 1]} : vector<64x128xf32> to vector<64x32xf32>
    %cst_29 = arith.constant dense<0.000000e+00> : vector<64x32xf32>
    %52 = tpu.matmul %47, %51, %cst_29 {dimension_numbers = #tpu.dot_dimension_numbers<[1], [0], [0], [1], [0, 0, 1, 1], [], []>} : vector<64x64xf32>, vector<64x32xf32>, vector<64x32xf32> -> vector<64x32xf32>
    %53 = vector.broadcast %50 : vector<64x1xf32> to vector<64x32xf32>
    %54 = arith.mulf %52, %53 : vector<64x32xf32>
    %c0_30 = arith.constant 0 : index
    %c32 = arith.constant 32 : index
    %55 = vector.load %arg13[%c0_30, %c32] : memref<128x128xf32, #tpu.memory_space<vmem>>, vector<64x32xf32>
    tpu.vector_store %arg13[%c0_30, %c32], %54 {strides = array<i32>} : memref<128x128xf32, #tpu.memory_space<vmem>>, vector<64x32xf32>,
    %56 = vector.extract_strided_slice %20 {offsets = [0, 64], sizes = [64, 32], strides = [1, 1]} : vector<64x128xf32> to vector<64x32xf32>
    %57 = vector.extract_strided_slice %23 {offsets = [64, 0], sizes = [32, 64], strides = [1, 1]} : vector<128x64xf32> to vector<32x64xf32>
    %cst_31 = arith.constant dense<0.000000e+00> : vector<64x64xf32>
    %58 = tpu.matmul %56, %57, %cst_31 {dimension_numbers = #tpu.dot_dimension_numbers<[1], [0], [0], [1], [0, 0, 1, 1], [], []>} : vector<64x32xf32>, vector<32x64xf32>, vector<64x64xf32> -> vector<64x64xf32>
    %cst_32 = arith.constant dense<0xFF800000> : vector<64xf32>
    %59 = vector.multi_reduction <maximumf>, %58, %cst_32 [1] : vector<64x64xf32> to vector<64xf32>
    %60 = vector.shape_cast %59 : vector<64xf32> to vector<64x1xf32>
    %61 = vector.broadcast %60 : vector<64x1xf32> to vector<64x64xf32>
    %62 = arith.subf %58, %61 : vector<64x64xf32>
    %63 = math.exp %62 : vector<64x64xf32>
    %cst_33 = arith.constant dense<0.000000e+00> : vector<64xf32>
    %64 = vector.multi_reduction <add>, %63, %cst_33 [1] : vector<64x64xf32> to vector<64xf32>
    %65 = vector.shape_cast %64 : vector<64xf32> to vector<64x1xf32>
    %66 = tpu.reciprocal %65 {approx = true} : vector<64x1xf32> -> vector<64x1xf32>
    %67 = vector.extract_strided_slice %21 {offsets = [0, 64], sizes = [64, 32], strides = [1, 1]} : vector<64x128xf32> to vector<64x32xf32>
    %cst_34 = arith.constant dense<0.000000e+00> : vector<64x32xf32>
    %68 = tpu.matmul %63, %67, %cst_34 {dimension_numbers = #tpu.dot_dimension_numbers<[1], [0], [0], [1], [0, 0, 1, 1], [], []>} : vector<64x64xf32>, vector<64x32xf32>, vector<64x32xf32> -> vector<64x32xf32>
    %69 = vector.broadcast %66 : vector<64x1xf32> to vector<64x32xf32>
    %70 = arith.mulf %68, %69 : vector<64x32xf32>
    %c0_35 = arith.constant 0 : index
    %c64 = arith.constant 64 : index
    %71 = vector.load %arg13[%c0_35, %c64] : memref<128x128xf32, #tpu.memory_space<vmem>>, vector<64x32xf32>
    tpu.vector_store %arg13[%c0_35, %c64], %70 {strides = array<i32>} : memref<128x128xf32, #tpu.memory_space<vmem>>, vector<64x32xf32>,
    %72 = vector.extract_strided_slice %20 {offsets = [0, 96], sizes = [64, 32], strides = [1, 1]} : vector<64x128xf32> to vector<64x32xf32>
    %73 = vector.extract_strided_slice %23 {offsets = [96, 0], sizes = [32, 64], strides = [1, 1]} : vector<128x64xf32> to vector<32x64xf32>
    %cst_36 = arith.constant dense<0.000000e+00> : vector<64x64xf32>
    %74 = tpu.matmul %72, %73, %cst_36 {dimension_numbers = #tpu.dot_dimension_numbers<[1], [0], [0], [1], [0, 0, 1, 1], [], []>} : vector<64x32xf32>, vector<32x64xf32>, vector<64x64xf32> -> vector<64x64xf32>
    %cst_37 = arith.constant dense<0xFF800000> : vector<64xf32>
    %75 = vector.multi_reduction <maximumf>, %74, %cst_37 [1] : vector<64x64xf32> to vector<64xf32>
    %76 = vector.shape_cast %75 : vector<64xf32> to vector<64x1xf32>
    %77 = vector.broadcast %76 : vector<64x1xf32> to vector<64x64xf32>
    %78 = arith.subf %74, %77 : vector<64x64xf32>
    %79 = math.exp %78 : vector<64x64xf32>
    %cst_38 = arith.constant dense<0.000000e+00> : vector<64xf32>
    %80 = vector.multi_reduction <add>, %79, %cst_38 [1] : vector<64x64xf32> to vector<64xf32>
    %81 = vector.shape_cast %80 : vector<64xf32> to vector<64x1xf32>
    %82 = tpu.reciprocal %81 {approx = true} : vector<64x1xf32> -> vector<64x1xf32>
    %83 = vector.extract_strided_slice %21 {offsets = [0, 96], sizes = [64, 32], strides = [1, 1]} : vector<64x128xf32> to vector<64x32xf32>
    %cst_39 = arith.constant dense<0.000000e+00> : vector<64x32xf32>
    %84 = tpu.matmul %79, %83, %cst_39 {dimension_numbers = #tpu.dot_dimension_numbers<[1], [0], [0], [1], [0, 0, 1, 1], [], []>} : vector<64x64xf32>, vector<64x32xf32>, vector<64x32xf32> -> vector<64x32xf32>
    %85 = vector.broadcast %82 : vector<64x1xf32> to vector<64x32xf32>
    %86 = arith.mulf %84, %85 : vector<64x32xf32>
    %c0_40 = arith.constant 0 : index
    %c96 = arith.constant 96 : index
    %87 = vector.load %arg13[%c0_40, %c96] : memref<128x128xf32, #tpu.memory_space<vmem>>, vector<64x32xf32>
    tpu.vector_store %arg13[%c0_40, %c96], %86 {strides = array<i32>} : memref<128x128xf32, #tpu.memory_space<vmem>>, vector<64x32xf32>,
    %88 = vector.extract_strided_slice %19 {offsets = [64, 0], sizes = [64, 128], strides = [1, 1]} : vector<128x128xf32> to vector<64x128xf32>
    %89 = vector.extract_strided_slice %17 {offsets = [64, 0], sizes = [64, 128], strides = [1, 1]} : vector<128x128xf32> to vector<64x128xf32>
    %90 = vector.extract_strided_slice %11 {offsets = [64, 0], sizes = [64, 128], strides = [1, 1]} : vector<128x128xf32> to vector<64x128xf32>
    %91 = tpu.transpose %90, [1, 0] : vector<64x128xf32> -> vector<128x64xf32>
    %92 = vector.extract_strided_slice %88 {offsets = [0, 0], sizes = [64, 32], strides = [1, 1]} : vector<64x128xf32> to vector<64x32xf32>
    %93 = vector.extract_strided_slice %91 {offsets = [0, 0], sizes = [32, 64], strides = [1, 1]} : vector<128x64xf32> to vector<32x64xf32>
    %cst_41 = arith.constant dense<0.000000e+00> : vector<64x64xf32>
    %94 = tpu.matmul %92, %93, %cst_41 {dimension_numbers = #tpu.dot_dimension_numbers<[1], [0], [0], [1], [0, 0, 1, 1], [], []>} : vector<64x32xf32>, vector<32x64xf32>, vector<64x64xf32> -> vector<64x64xf32>
    %cst_42 = arith.constant dense<0xFF800000> : vector<64xf32>
    %95 = vector.multi_reduction <maximumf>, %94, %cst_42 [1] : vector<64x64xf32> to vector<64xf32>
    %96 = vector.shape_cast %95 : vector<64xf32> to vector<64x1xf32>
    %97 = vector.broadcast %96 : vector<64x1xf32> to vector<64x64xf32>
    %98 = arith.subf %94, %97 : vector<64x64xf32>
    %99 = math.exp %98 : vector<64x64xf32>
    %cst_43 = arith.constant dense<0.000000e+00> : vector<64xf32>
    %100 = vector.multi_reduction <add>, %99, %cst_43 [1] : vector<64x64xf32> to vector<64xf32>
    %101 = vector.shape_cast %100 : vector<64xf32> to vector<64x1xf32>
    %102 = tpu.reciprocal %101 {approx = true} : vector<64x1xf32> -> vector<64x1xf32>
    %103 = vector.extract_strided_slice %89 {offsets = [0, 0], sizes = [64, 32], strides = [1, 1]} : vector<64x128xf32> to vector<64x32xf32>
    %cst_44 = arith.constant dense<0.000000e+00> : vector<64x32xf32>
    %104 = tpu.matmul %99, %103, %cst_44 {dimension_numbers = #tpu.dot_dimension_numbers<[1], [0], [0], [1], [0, 0, 1, 1], [], []>} : vector<64x64xf32>, vector<64x32xf32>, vector<64x32xf32> -> vector<64x32xf32>
    %105 = vector.broadcast %102 : vector<64x1xf32> to vector<64x32xf32>
    %106 = arith.mulf %104, %105 : vector<64x32xf32>
    %c64_45 = arith.constant 64 : index
    %c0_46 = arith.constant 0 : index
    %107 = vector.load %arg13[%c64_45, %c0_46] : memref<128x128xf32, #tpu.memory_space<vmem>>, vector<64x32xf32>
    tpu.vector_store %arg13[%c64_45, %c0_46], %106 {strides = array<i32>} : memref<128x128xf32, #tpu.memory_space<vmem>>, vector<64x32xf32>,
    %108 = vector.extract_strided_slice %88 {offsets = [0, 32], sizes = [64, 32], strides = [1, 1]} : vector<64x128xf32> to vector<64x32xf32>
    %109 = vector.extract_strided_slice %91 {offsets = [32, 0], sizes = [32, 64], strides = [1, 1]} : vector<128x64xf32> to vector<32x64xf32>
    %cst_47 = arith.constant dense<0.000000e+00> : vector<64x64xf32>
    %110 = tpu.matmul %108, %109, %cst_47 {dimension_numbers = #tpu.dot_dimension_numbers<[1], [0], [0], [1], [0, 0, 1, 1], [], []>} : vector<64x32xf32>, vector<32x64xf32>, vector<64x64xf32> -> vector<64x64xf32>
    %cst_48 = arith.constant dense<0xFF800000> : vector<64xf32>
    %111 = vector.multi_reduction <maximumf>, %110, %cst_48 [1] : vector<64x64xf32> to vector<64xf32>
    %112 = vector.shape_cast %111 : vector<64xf32> to vector<64x1xf32>
    %113 = vector.broadcast %112 : vector<64x1xf32> to vector<64x64xf32>
    %114 = arith.subf %110, %113 : vector<64x64xf32>
    %115 = math.exp %114 : vector<64x64xf32>
    %cst_49 = arith.constant dense<0.000000e+00> : vector<64xf32>
    %116 = vector.multi_reduction <add>, %115, %cst_49 [1] : vector<64x64xf32> to vector<64xf32>
    %117 = vector.shape_cast %116 : vector<64xf32> to vector<64x1xf32>
    %118 = tpu.reciprocal %117 {approx = true} : vector<64x1xf32> -> vector<64x1xf32>
    %119 = vector.extract_strided_slice %89 {offsets = [0, 32], sizes = [64, 32], strides = [1, 1]} : vector<64x128xf32> to vector<64x32xf32>
    %cst_50 = arith.constant dense<0.000000e+00> : vector<64x32xf32>
    %120 = tpu.matmul %115, %119, %cst_50 {dimension_numbers = #tpu.dot_dimension_numbers<[1], [0], [0], [1], [0, 0, 1, 1], [], []>} : vector<64x64xf32>, vector<64x32xf32>, vector<64x32xf32> -> vector<64x32xf32>
    %121 = vector.broadcast %118 : vector<64x1xf32> to vector<64x32xf32>
    %122 = arith.mulf %120, %121 : vector<64x32xf32>
    %c64_51 = arith.constant 64 : index
    %c32_52 = arith.constant 32 : index
    %123 = vector.load %arg13[%c64_51, %c32_52] : memref<128x128xf32, #tpu.memory_space<vmem>>, vector<64x32xf32>
    tpu.vector_store %arg13[%c64_51, %c32_52], %122 {strides = array<i32>} : memref<128x128xf32, #tpu.memory_space<vmem>>, vector<64x32xf32>,
    %124 = vector.extract_strided_slice %88 {offsets = [0, 64], sizes = [64, 32], strides = [1, 1]} : vector<64x128xf32> to vector<64x32xf32>
    %125 = vector.extract_strided_slice %91 {offsets = [64, 0], sizes = [32, 64], strides = [1, 1]} : vector<128x64xf32> to vector<32x64xf32>
    %cst_53 = arith.constant dense<0.000000e+00> : vector<64x64xf32>
    %126 = tpu.matmul %124, %125, %cst_53 {dimension_numbers = #tpu.dot_dimension_numbers<[1], [0], [0], [1], [0, 0, 1, 1], [], []>} : vector<64x32xf32>, vector<32x64xf32>, vector<64x64xf32> -> vector<64x64xf32>
    %cst_54 = arith.constant dense<0xFF800000> : vector<64xf32>
    %127 = vector.multi_reduction <maximumf>, %126, %cst_54 [1] : vector<64x64xf32> to vector<64xf32>
    %128 = vector.shape_cast %127 : vector<64xf32> to vector<64x1xf32>
    %129 = vector.broadcast %128 : vector<64x1xf32> to vector<64x64xf32>
    %130 = arith.subf %126, %129 : vector<64x64xf32>
    %131 = math.exp %130 : vector<64x64xf32>
    %cst_55 = arith.constant dense<0.000000e+00> : vector<64xf32>
    %132 = vector.multi_reduction <add>, %131, %cst_55 [1] : vector<64x64xf32> to vector<64xf32>
    %133 = vector.shape_cast %132 : vector<64xf32> to vector<64x1xf32>
    %134 = tpu.reciprocal %133 {approx = true} : vector<64x1xf32> -> vector<64x1xf32>
    %135 = vector.extract_strided_slice %89 {offsets = [0, 64], sizes = [64, 32], strides = [1, 1]} : vector<64x128xf32> to vector<64x32xf32>
    %cst_56 = arith.constant dense<0.000000e+00> : vector<64x32xf32>
    %136 = tpu.matmul %131, %135, %cst_56 {dimension_numbers = #tpu.dot_dimension_numbers<[1], [0], [0], [1], [0, 0, 1, 1], [], []>} : vector<64x64xf32>, vector<64x32xf32>, vector<64x32xf32> -> vector<64x32xf32>
    %137 = vector.broadcast %134 : vector<64x1xf32> to vector<64x32xf32>
    %138 = arith.mulf %136, %137 : vector<64x32xf32>
    %c64_57 = arith.constant 64 : index
    %c64_58 = arith.constant 64 : index
    %139 = vector.load %arg13[%c64_57, %c64_58] : memref<128x128xf32, #tpu.memory_space<vmem>>, vector<64x32xf32>
    tpu.vector_store %arg13[%c64_57, %c64_58], %138 {strides = array<i32>} : memref<128x128xf32, #tpu.memory_space<vmem>>, vector<64x32xf32>,
    %140 = vector.extract_strided_slice %88 {offsets = [0, 96], sizes = [64, 32], strides = [1, 1]} : vector<64x128xf32> to vector<64x32xf32>
    %141 = vector.extract_strided_slice %91 {offsets = [96, 0], sizes = [32, 64], strides = [1, 1]} : vector<128x64xf32> to vector<32x64xf32>
    %cst_59 = arith.constant dense<0.000000e+00> : vector<64x64xf32>
    %142 = tpu.matmul %140, %141, %cst_59 {dimension_numbers = #tpu.dot_dimension_numbers<[1], [0], [0], [1], [0, 0, 1, 1], [], []>} : vector<64x32xf32>, vector<32x64xf32>, vector<64x64xf32> -> vector<64x64xf32>
    %cst_60 = arith.constant dense<0xFF800000> : vector<64xf32>
    %143 = vector.multi_reduction <maximumf>, %142, %cst_60 [1] : vector<64x64xf32> to vector<64xf32>
    %144 = vector.shape_cast %143 : vector<64xf32> to vector<64x1xf32>
    %145 = vector.broadcast %144 : vector<64x1xf32> to vector<64x64xf32>
    %146 = arith.subf %142, %145 : vector<64x64xf32>
    %147 = math.exp %146 : vector<64x64xf32>
    %cst_61 = arith.constant dense<0.000000e+00> : vector<64xf32>
    %148 = vector.multi_reduction <add>, %147, %cst_61 [1] : vector<64x64xf32> to vector<64xf32>
    %149 = vector.shape_cast %148 : vector<64xf32> to vector<64x1xf32>
    %150 = tpu.reciprocal %149 {approx = true} : vector<64x1xf32> -> vector<64x1xf32>
    %151 = vector.extract_strided_slice %89 {offsets = [0, 96], sizes = [64, 32], strides = [1, 1]} : vector<64x128xf32> to vector<64x32xf32>
    %cst_62 = arith.constant dense<0.000000e+00> : vector<64x32xf32>
    %152 = tpu.matmul %147, %151, %cst_62 {dimension_numbers = #tpu.dot_dimension_numbers<[1], [0], [0], [1], [0, 0, 1, 1], [], []>} : vector<64x64xf32>, vector<64x32xf32>, vector<64x32xf32> -> vector<64x32xf32>
    %153 = vector.broadcast %150 : vector<64x1xf32> to vector<64x32xf32>
    %154 = arith.mulf %152, %153 : vector<64x32xf32>
    %c64_63 = arith.constant 64 : index
    %c96_64 = arith.constant 96 : index
    %155 = vector.load %arg13[%c64_63, %c96_64] : memref<128x128xf32, #tpu.memory_space<vmem>>, vector<64x32xf32>
    tpu.vector_store %arg13[%c64_63, %c96_64], %154 {strides = array<i32>} : memref<128x128xf32, #tpu.memory_space<vmem>>, vector<64x32xf32>,
    %c0_65 = arith.constant 0 : index
    %c0_66 = arith.constant 0 : index
    %156 = vector.load %arg13[%c0_65, %c0_66] : memref<128x128xf32, #tpu.memory_space<vmem>>, vector<128x128xf32>
    %c0_67 = arith.constant 0 : index
    %c0_68 = arith.constant 0 : index
    %157 = vector.load %arg10[%c0_67, %c0_68] : memref<128x128xf32, #tpu.memory_space<vmem>>, vector<128x128xf32>
    %cst_69 = arith.constant dense<0.000000e+00> : vector<128x128xf32>
    %158 = tpu.matmul %156, %157, %cst_69 {dimension_numbers = #tpu.dot_dimension_numbers<[1], [0], [0], [1], [0, 0, 1, 1], [], []>} : vector<128x128xf32>, vector<128x128xf32>, vector<128x128xf32> -> vector<128x128xf32>
    %c0_70 = arith.constant 0 : index
    %c0_71 = arith.constant 0 : index
    %159 = vector.load %arg11[%c0_70, %c0_71] : memref<1x128xf32, #tpu.memory_space<vmem>>, vector<1x128xf32>
    %160 = vector.broadcast %159 : vector<1x128xf32> to vector<128x128xf32>
    %161 = arith.addf %158, %160 : vector<128x128xf32>
    %c0_72 = arith.constant 0 : index
    %c0_73 = arith.constant 0 : index
    %162 = vector.load %arg12[%c0_72, %c0_73] : memref<128x128xf32, #tpu.memory_space<vmem>>, vector<128x128xf32>
    tpu.vector_store %arg12[%c0_72, %c0_73], %161 {strides = array<i32>} : memref<128x128xf32, #tpu.memory_space<vmem>>, vector<128x128xf32>,
    return
  }
  func.func @transform_0(%arg0: i32) -> (i32, i32) {
    %c0_i32 = arith.constant 0 : i32
    %c0_i32_0 = arith.constant 0 : i32
    return %arg0, %c0_i32 : i32, i32
  }
  func.func @transform_1(%arg0: i32) -> (i32, i32) {
    %c0_i32 = arith.constant 0 : i32
    %c0_i32_0 = arith.constant 0 : i32
    return %arg0, %c0_i32 : i32, i32
  }
  func.func @transform_2(%arg0: i32) -> (i32, i32) {
    %c0_i32 = arith.constant 0 : i32
    %c0_i32_0 = arith.constant 0 : i32
    return %arg0, %c0_i32 : i32, i32
  }
  func.func @transform_3(%arg0: i32) -> (i32, i32) {
    %c0_i32 = arith.constant 0 : i32
    %c0_i32_0 = arith.constant 0 : i32
    %c0_i32_1 = arith.constant 0 : i32
    return %c0_i32, %c0_i32_0 : i32, i32
  }
  func.func @transform_4(%arg0: i32) -> (i32, i32) {
    %c0_i32 = arith.constant 0 : i32
    %c0_i32_0 = arith.constant 0 : i32
    %c0_i32_1 = arith.constant 0 : i32
    return %c0_i32, %c0_i32_0 : i32, i32
  }
  func.func @transform_5(%arg0: i32) -> (i32, i32) {
    %c0_i32 = arith.constant 0 : i32
    %c0_i32_0 = arith.constant 0 : i32
    %c0_i32_1 = arith.constant 0 : i32
    return %c0_i32, %c0_i32_0 : i32, i32
  }
  func.func @transform_6(%arg0: i32) -> (i32, i32) {
    %c0_i32 = arith.constant 0 : i32
    %c0_i32_0 = arith.constant 0 : i32
    %c0_i32_1 = arith.constant 0 : i32
    return %c0_i32, %c0_i32_0 : i32, i32
  }
  func.func @transform_7(%arg0: i32) -> (i32, i32) {
    %c0_i32 = arith.constant 0 : i32
    %c0_i32_0 = arith.constant 0 : i32
    %c0_i32_1 = arith.constant 0 : i32
    return %c0_i32, %c0_i32_0 : i32, i32
  }
  func.func @transform_8(%arg0: i32) -> (i32, i32) {
    %c0_i32 = arith.constant 0 : i32
    %c0_i32_0 = arith.constant 0 : i32
    %c0_i32_1 = arith.constant 0 : i32
    return %c0_i32, %c0_i32_0 : i32, i32
  }
  func.func @transform_9(%arg0: i32) -> (i32, i32) {
    %c0_i32 = arith.constant 0 : i32
    %c0_i32_0 = arith.constant 0 : i32
    %c0_i32_1 = arith.constant 0 : i32
    return %c0_i32, %c0_i32_0 : i32, i32
  }
  func.func @transform_10(%arg0: i32) -> (i32, i32) {
    %c0_i32 = arith.constant 0 : i32
    %c0_i32_0 = arith.constant 0 : i32
    %c0_i32_1 = arith.constant 0 : i32
    return %c0_i32, %c0_i32_0 : i32, i32
  }
  func.func @transform_11(%arg0: i32) -> (i32, i32) {
    %c0_i32 = arith.constant 0 : i32
    %c0_i32_0 = arith.constant 0 : i32
    return %arg0, %c0_i32 : i32, i32
  }
}

</mosaic_0001>

<bundles_post_ra>
// kernel: tpu_custom_call.1
= control target key start
LH: loop header
LB: loop body
LE: loop exit
PB: predicated region body
PF: predicated region fallthrough
CT: control target
= control target key end

     0   :  { %16 = vsyncpa [#allocation4], 0  ;;  %s8678_s0 = inlined_call_operand.hbm [shape: f32[128,128], index: 0, kind: input, shape index: {}]   ;;  %s8679_s1 = inlined_call_operand.hbm [shape: f32[128,128], index: 1, kind: input, shape index: {}]   ;;  %s8680_s2 = inlined_call_operand.hbm [shape: f32[128,128], index: 2, kind: input, shape index: {}]   ;;  %s8681_s3 = inlined_call_operand.hbm [shape: f32[128,128], index: 3, kind: input, shape index: {}]   ;;  %s8682_s4 = inlined_call_operand.vmem [shape: f32[1,128], index: 4, kind: input, shape index: {}]   ;;  %s8683_s5 = inlined_call_operand.hbm [shape: f32[128,128], index: 5, kind: input, shape index: {}]   ;;  %s8684_s6 = inlined_call_operand.vmem [shape: f32[1,128], index: 6, kind: input, shape index: {}]   ;;  %s8685_s7 = inlined_call_operand.hbm [shape: f32[128,128], index: 7, kind: input, shape index: {}]   ;;  %s8686_s8 = inlined_call_operand.vmem [shape: f32[1,128], index: 8, kind: input, shape index: {}]   ;;  %s8687_s9 = inlined_call_operand.hbm [shape: f32[128,128], index: 9, kind: input, shape index: {}]   ;;  %s8688_s10 = inlined_call_operand.vmem [shape: f32[1,128], index: 10, kind: input, shape index: {}]   ;;  %s8689_s11 = inlined_call_operand.hbm [shape: f32[128,128], index: 11, kind: output, shape index: {}]  }
   0x1   :  { %17 = vsyncpa [#allocation7], 0 }
   0x2   :  { %18 = vsyncpa [#allocation10], 0 }
   0x3   :  { %19 = vsyncpa [#allocation13], 0 }
   0x4   :  { %20 = vsyncpa [#allocation5], 0  ;;  %s6794_s17 = smov [#allocation6]   ;;  %s6795_s19 = smov [#allocation9]  }
   0x5   :  { %s38_s18 = sshll.u32 %s6794_s17, 4  ;;  %s62_s20 = sshll.u32 %s6795_s19, 4  ;;  %s39_s18 = int_to_ptr.vmem [resolvable:$true] %s38_s18  ;;  %s6867_s20 = int_to_ptr.vmem [resolvable:$true] %s62_s20 }
   0x6   :  { %s6608_s23 = scalar_lea.hbm %s8679_s1, 2048 }
   0x7   :  { %p6609_p0 = scmp.ne.s32.totalorder %s8679_s1, %s6608_s23  ;;  %p6612_p1 = scmp.lt.u32.totalorder %s6608_s23, %s8679_s1 }
   0x9   :  { %p6614_p2 = pnand %p6612_p1, %p6609_p0 }
   0xb   :  { %6617 = shalt.err (!%p6614_p2)
}
   0xc   :  { %s6618_s28 = scalar_lea.vmem %s39_s18, 2048  ;;  %p6623_p4 = scmp.lt.s32.totalorder %s39_s18, %s39_s18 }
   0xd   :  { %p6619_p3 = scmp.ne.s32.totalorder %s39_s18, %s6618_s28  ;;  %p6624_p5 = scmp.lt.s32.totalorder %s6618_s28, %s6618_s28 }
   0xf   :  { %p6625_p6 = por %p6624_p5, %p6623_p4 }
  0x11   :  { %p6626_p7 = pnand %p6625_p6, %p6619_p3 }
  0x13   :  { %6629 = shalt.err (!%p6626_p7)
}
  0x14   :  { %s6796_s29 = smov 128   ;;  %s6797_s30 = smov 8  }
  0x15   :  { %44 = dma.hbm_to_vmem [thread:$0]  %s8679_s1, 2048, %s39_s18, [#allocation7], %s6796_s29, %s6796_s29, %s6797_s30  }
  0x16   :  { %s6630_s16 = scalar_lea.hbm %s8681_s3, 2048 }
  0x17   :  { %p6631_p8 = scmp.ne.s32.totalorder %s8681_s3, %s6630_s16  ;;  %p6634_p9 = scmp.lt.u32.totalorder %s6630_s16, %s8681_s3 }
  0x19   :  { %p6636_p10 = pnand %p6634_p9, %p6631_p8 }
  0x1b   :  { %6639 = shalt.err (!%p6636_p10)
}
  0x1c   :  { %s6640_s23 = scalar_lea.vmem %s6867_s20, 2048  ;;  %p6645_p12 = scmp.lt.s32.totalorder %s6867_s20, %s6867_s20 }
  0x1d   :  { %p6641_p11 = scmp.ne.s32.totalorder %s6867_s20, %s6640_s23  ;;  %p6646_p13 = scmp.lt.s32.totalorder %s6640_s23, %s6640_s23 }
  0x1f   :  { %p6647_p0 = por %p6646_p13, %p6645_p12 }
  0x21   :  { %p6648_p1 = pnand %p6647_p0, %p6641_p11 }
  0x23   :  { %6651 = shalt.err (!%p6648_p1)
}
  0x24   :  { %68 = dma.hbm_to_vmem [thread:$0]  %s8681_s3, 2048, %s6867_s20, [#allocation10], %s6796_s29, %s6796_s29, %s6797_s30  }
  0x25   :  { %s6798_s24 = smov [#allocation12]   ;;  %s6799_s26 = smov [#allocation3]  }
  0x26   :  { %s90_s25 = sshll.u32 %s6798_s24, 4  ;;  %s26_s27 = sshll.u32 %s6799_s26, 4  ;;  %s91_s25 = int_to_ptr.vmem [resolvable:$true] %s90_s25  ;;  %s6904_s27 = int_to_ptr.vmem [resolvable:$true] %s26_s27 }
  0x27   :  { %s6652_s13 = scalar_lea.hbm %s8685_s7, 2048 }
  0x28   :  { %p6653_p2 = scmp.ne.s32.totalorder %s8685_s7, %s6652_s13  ;;  %p6656_p3 = scmp.lt.u32.totalorder %s6652_s13, %s8685_s7 }
  0x2a   :  { %p6658_p4 = pnand %p6656_p3, %p6653_p2 }
  0x2c   :  { %6661 = shalt.err (!%p6658_p4)
}
  0x2d   :  { %s6662_s3 = scalar_lea.vmem %s91_s25, 2048  ;;  %p6667_p6 = scmp.lt.s32.totalorder %s91_s25, %s91_s25 }
  0x2e   :  { %p6663_p5 = scmp.ne.s32.totalorder %s91_s25, %s6662_s3  ;;  %p6668_p7 = scmp.lt.s32.totalorder %s6662_s3, %s6662_s3 }
  0x30   :  { %p6669_p8 = por %p6668_p7, %p6667_p6 }
  0x32   :  { %p6670_p9 = pnand %p6669_p8, %p6663_p5 }
  0x34   :  { %6673 = shalt.err (!%p6670_p9)
}
  0x35   :  { %96 = dma.hbm_to_vmem [thread:$0]  %s8685_s7, 2048, %s91_s25, [#allocation13], %s6796_s29, %s6796_s29, %s6797_s30  }
  0x36   :  { %s6674_s23 = scalar_lea.hbm %s8678_s0, 2048 }
  0x37   :  { %p6675_p10 = scmp.ne.s32.totalorder %s8678_s0, %s6674_s23  ;;  %p6678_p11 = scmp.lt.u32.totalorder %s6674_s23, %s8678_s0 }
  0x39   :  { %p6680_p12 = pnand %p6678_p11, %p6675_p10 }
  0x3b   :  { %6683 = shalt.err (!%p6680_p12)
}
  0x3c   :  { %s6684_s28 = scalar_lea.vmem %s6904_s27, 2048  ;;  %p6689_p0 = scmp.lt.s32.totalorder %s6904_s27, %s6904_s27 }
  0x3d   :  { %p6685_p13 = scmp.ne.s32.totalorder %s6904_s27, %s6684_s28  ;;  %p6690_p1 = scmp.lt.s32.totalorder %s6684_s28, %s6684_s28 }
  0x3f   :  { %p6691_p2 = por %p6690_p1, %p6689_p0 }
  0x41   :  { %p6692_p3 = pnand %p6691_p2, %p6685_p13 }
  0x43   :  { %6695 = shalt.err (!%p6692_p3)
}
  0x44   :  { %32 = dma.hbm_to_vmem [thread:$0]  %s8678_s0, 2048, %s6904_s27, [#allocation4], %s6796_s29, %s6796_s29, %s6797_s30  }
  0x45   :  { %s6800_s12 = smov [#allocation8]   ;;  %s6801_s14 = smov [#allocation11]  }
  0x46   :  { %s50_s13 = sshll.u32 %s6800_s12, 4  ;;  %s76_s15 = sshll.u32 %s6801_s14, 4  ;;  %s51_s13 = int_to_ptr.vmem [resolvable:$true] %s50_s13  ;;  %s6941_s15 = int_to_ptr.vmem [resolvable:$true] %s76_s15 }
  0x47   :  { %s6696_s3 = scalar_lea.hbm %s8680_s2, 2048 }
  0x48   :  { %p6697_p4 = scmp.ne.s32.totalorder %s8680_s2, %s6696_s3  ;;  %p6700_p5 = scmp.lt.u32.totalorder %s6696_s3, %s8680_s2 }
  0x4a   :  { %p6702_p6 = pnand %p6700_p5, %p6697_p4 }
  0x4c   :  { %6705 = shalt.err (!%p6702_p6)
}
  0x4d   :  { %s6706_s0 = scalar_lea.vmem %s51_s13, 2048  ;;  %p6711_p8 = scmp.lt.s32.totalorder %s51_s13, %s51_s13 }
  0x4e   :  { %p6707_p7 = scmp.ne.s32.totalorder %s51_s13, %s6706_s0  ;;  %p6712_p9 = scmp.lt.s32.totalorder %s6706_s0, %s6706_s0 }
  0x50   :  { %p6713_p10 = por %p6712_p9, %p6711_p8 }
  0x52   :  { %p6714_p11 = pnand %p6713_p10, %p6707_p7 }
  0x54   :  { %6717 = shalt.err (!%p6714_p11)
}
  0x55   :  { %56 = dma.hbm_to_vmem [thread:$0]  %s8680_s2, 2048, %s51_s13, [#allocation7], %s6796_s29, %s6796_s29, %s6797_s30  }
  0x56   :  { %s6718_s24 = scalar_lea.hbm %s8683_s5, 2048 }
  0x57   :  { %p6719_p12 = scmp.ne.s32.totalorder %s8683_s5, %s6718_s24  ;;  %p6722_p13 = scmp.lt.u32.totalorder %s6718_s24, %s8683_s5 }
  0x59   :  { %p6724_p0 = pnand %p6722_p13, %p6719_p12 }
  0x5b   :  { %6727 = shalt.err (!%p6724_p0)
}
  0x5c   :  { %s6728_s12 = scalar_lea.vmem %s6941_s15, 2048  ;;  %p6733_p2 = scmp.lt.s32.totalorder %s6941_s15, %s6941_s15 }
  0x5d   :  { %p6729_p1 = scmp.ne.s32.totalorder %s6941_s15, %s6728_s12  ;;  %p6734_p3 = scmp.lt.s32.totalorder %s6728_s12, %s6728_s12 }
  0x5f   :  { %p6735_p4 = por %p6734_p3, %p6733_p2 }
  0x61   :  { %p6736_p5 = pnand %p6735_p4, %p6729_p1 }
  0x63   :  { %6739 = shalt.err (!%p6736_p5)
}
  0x64   :  { %82 = dma.hbm_to_vmem [thread:$0]  %s8683_s5, 2048, %s6941_s15, [#allocation10], %s6796_s29, %s6796_s29, %s6797_s30  }
  0x65   :  { %s6802_s14 = smov [#allocation14]   ;;  %s6740_s20 = scalar_lea.hbm %s8687_s9, 2048 }
  0x66   :  { %s104_s16 = sshll.u32 %s6802_s14, 4  ;;  %p6741_p6 = scmp.ne.s32.totalorder %s8687_s9, %s6740_s20  ;;  %s105_s16 = int_to_ptr.vmem [resolvable:$true] %s104_s16 }
  0x67   :  { %p6744_p7 = scmp.lt.u32.totalorder %s6740_s20, %s8687_s9 }
  0x69   :  { %p6746_p8 = pnand %p6744_p7, %p6741_p6 }
  0x6b   :  { %6749 = shalt.err (!%p6746_p8)
}
  0x6c   :  { %s6750_s27 = scalar_lea.vmem %s105_s16, 2048  ;;  %p6755_p10 = scmp.lt.s32.totalorder %s105_s16, %s105_s16 }
  0x6d   :  { %p6751_p9 = scmp.ne.s32.totalorder %s105_s16, %s6750_s27  ;;  %p6756_p11 = scmp.lt.s32.totalorder %s6750_s27, %s6750_s27 }
  0x6f   :  { %p6757_p12 = por %p6756_p11, %p6755_p10 }
  0x71   :  { %p6758_p13 = pnand %p6757_p12, %p6751_p9 }
  0x73   :  { %6761 = shalt.err (!%p6758_p13)
}
  0x74   :  { %110 = dma.hbm_to_vmem [thread:$0]  %s8687_s9, 2048, %s105_s16, [#allocation13], %s6796_s29, %s6796_s29, %s6797_s30  }
  0x75   :  { %6784 = dma.done.wait [#allocation4], 2048  }
  0x76   :  { %6785 = vsyncadd [#allocation4], 4294965248 }
  0x77   :  { %6786 = dma.done.wait [#allocation7], 4096  }
  0x78   :  { %6787 = vsyncadd [#allocation7], 4294963200 }
  0x79   :  { %6788 = dma.done.wait [#allocation10], 4096  }
  0x7a   :  { %6789 = vsyncadd [#allocation10], 4294963200 }
  0x7b   :  { %6790 = dma.done.wait [#allocation13], 4096  }
  0x7c   :  { %6791 = vsyncadd [#allocation13], 4294963200  ;;  %v150_v0 = vld [vmem:[#allocation9] sm:$0xff]  ;;  %v151_v1 = vld [vmem:[#allocation9 + $0x8] sm:$0xff]  ;;  %vm702_vm0 = vcmask 261120   ;;  %s6804_s18 = smov 64  }
  0x7d   :  { %v152_v2 = vld [vmem:[#allocation9 + $0x10] sm:$0xff]  ;;  %v5651_v3 = vpack.c.bf16 %v151_v1, %v150_v0  ;;  %v153_v4 = vld [vmem:[#allocation9 + $0x18] sm:$0xff]  ;;  %v154_v6 = vld [vmem:[#allocation9 + $0x20] sm:$0xff]  ;;  %vm856_vm2 = vcmask 523264   ;;  %vm1532_vm3 = vcmask 523520   ;;  %vm1983_vm4 = vcmask 785920  }
  0x7e   :  { %v5655_v5 = vpack.c.bf16 %v153_v4, %v152_v2  ;;  %v155_v7 = vld [vmem:[#allocation9 + $0x28] sm:$0xff]  ;;  %v134_v9 = vld [vmem:[#allocation3] sm:$0xff]  ;;  %v156_v10 = vld [vmem:[#allocation9 + $0x30] sm:$0xff]  ;;  %vm2434_vm5 = vcmask 1048320  }
  0x7f   :  { %5652 = vmatprep.subr.bf16.mxu1 %v5651_v3  ;;  %v5659_v8 = vpack.c.bf16 %v155_v7, %v154_v6  ;;  %v157_v11 = vld [vmem:[#allocation9 + $0x38] sm:$0xff]  ;;  %5011 = vmatprep.mubr.f32.mxu1 %v134_v9  ;;  %v158_v13 = vld [vmem:[#allocation9 + $0x40] sm:$0xff]  ;;  %v159_v14 = vld [vmem:[#allocation9 + $0x48] sm:$0xff] }
  0x80   :  { %5654 = vmatpush3.bf16.msra.mxu1 %v5651_v3  ;;  %v5663_v12 = vpack.c.bf16 %v157_v11, %v156_v10  ;;  %v5667_v15 = vpack.c.bf16 %v159_v14, %v158_v13  ;;  %v160_v16 = vld [vmem:[#allocation9 + $0x50] sm:$0xff]  ;;  %v161_v17 = vld [vmem:[#allocation9 + $0x58] sm:$0xff]  ;;  %v162_v19 = vld [vmem:[#allocation9 + $0x60] sm:$0xff] }
  0x81   :  { %5656 = vmatprep.subr.bf16.mxu1 %v5655_v5  ;;  %v5671_v18 = vpack.c.bf16 %v161_v17, %v160_v16  ;;  %v163_v20 = vld [vmem:[#allocation9 + $0x68] sm:$0xff]  ;;  %v518_v21 = vld [vmem:[#allocation12] sm:$0xff]  ;;  %v520_v23 = vld [vmem:[#allocation12 + $0x10] sm:$0xff] }
  0x82   :  { %v519_v22 = vld [vmem:[#allocation12 + $0x8] sm:$0xff]  ;;  %v521_v24 = vld [vmem:[#allocation12 + $0x18] sm:$0xff]  ;;  %v5675_v27 = vpack.c.bf16 %v163_v20, %v162_v19  ;;  %v522_v28 = vld [vmem:[#allocation12 + $0x20] sm:$0xff] }
  0x83   :  { %v5715_v25 = vpack.c.bf16 %v519_v22, %v518_v21  ;;  %v5719_v26 = vpack.c.bf16 %v521_v24, %v520_v23  ;;  %v523_v29 = vld [vmem:[#allocation12 + $0x28] sm:$0xff]  ;;  %v164_v30 = vld [vmem:[#allocation9 + $0x70] sm:$0xff]  ;;  %v165_v31 = vld [vmem:[#allocation9 + $0x78] sm:$0xff] }
  0x84   :  { %5658 = vmatpush3.bf16.msra.mxu1 %v5655_v5  ;;  %v5723_v32 = vpack.c.bf16 %v523_v29, %v522_v28  ;;  %v5679_v33 = vpack.c.bf16 %v165_v31, %v164_v30  ;;  %v524_v34 = vld [vmem:[#allocation12 + $0x30] sm:$0xff]  ;;  %v525_v35 = vld [vmem:[#allocation12 + $0x38] sm:$0xff]  ;;  %v334_v36 = vld [vmem:[#allocation11] sm:$0xff] }
  0x85   :  { %5660 = vmatprep.subr.bf16.mxu1 %v5659_v8  ;;  %5716 = vmatprep.subr.bf16.mxu0 %v5715_v25  ;;  %v335_v37 = vld [vmem:[#allocation11 + $0x8] sm:$0xff]  ;;  %v5727_v38 = vpack.c.bf16 %v525_v35, %v524_v34  ;;  %v336_v40 = vld [vmem:[#allocation11 + $0x10] sm:$0xff]  ;;  %v337_v41 = vld [vmem:[#allocation11 + $0x18] sm:$0xff] }
  0x86   :  { %5718 = vmatpush3.bf16.msra.mxu0 %v5715_v25  ;;  %v5683_v39 = vpack.c.bf16 %v335_v37, %v334_v36  ;;  %v526_v42 = vld [vmem:[#allocation12 + $0x40] sm:$0xff]  ;;  %v527_v43 = vld [vmem:[#allocation12 + $0x48] sm:$0xff]  ;;  %v136_v45 = vld [vmem:[#allocation3 + $0x10] sm:$0xff]  ;;  %v5687_v46 = vpack.c.bf16 %v337_v41, %v336_v40 }
  0x87   :  { %5720 = vmatprep.subr.bf16.mxu0 %v5719_v26  ;;  %v135_v44 = vld [vmem:[#allocation3 + $0x8] sm:$0xff]  ;;  %v338_v47 = vld [vmem:[#allocation11 + $0x20] sm:$0xff]  ;;  %v5731_v48 = vpack.c.bf16 %v527_v43, %v526_v42  ;;  %v528_v50 = vld [vmem:[#allocation12 + $0x50] sm:$0xff] }
  0x88   :  { %5662 = vmatpush3.bf16.msra.mxu1 %v5659_v8  ;;  %v339_v49 = vld [vmem:[#allocation11 + $0x28] sm:$0xff]  ;;  %v529_v51 = vld [vmem:[#allocation12 + $0x58] sm:$0xff]  ;;  %v138_v53 = vld [vmem:[#allocation3 + $0x20] sm:$0xff] }
  0x89   :  { %5664 = vmatprep.subr.bf16.mxu1 %v5663_v12  ;;  %v137_v52 = vld [vmem:[#allocation3 + $0x18] sm:$0xff]  ;;  %v5691_v54 = vpack.c.bf16 %v339_v49, %v338_v47  ;;  %v340_v55 = vld [vmem:[#allocation11 + $0x30] sm:$0xff]  ;;  %v5735_v56 = vpack.c.bf16 %v529_v51, %v528_v50  ;;  %v530_v58 = vld [vmem:[#allocation12 + $0x60] sm:$0xff] }
  0x8a   :  { %5722 = vmatpush3.bf16.msra.mxu0 %v5719_v26  ;;  %v341_v57 = vld [vmem:[#allocation11 + $0x38] sm:$0xff]  ;;  %v531_v59 = vld [vmem:[#allocation12 + $0x68] sm:$0xff]  ;;  %v140_v61 = vld [vmem:[#allocation3 + $0x30] sm:$0xff] }
  0x8b   :  { %5724 = vmatprep.subr.bf16.mxu0 %v5723_v32  ;;  %v139_v60 = vld [vmem:[#allocation3 + $0x28] sm:$0xff]  ;;  %v5695_v62 = vpack.c.bf16 %v341_v57, %v340_v55  ;;  %v5739_v63 = vpack.c.bf16 %v531_v59, %v530_v58  ;;  %v342_v0 = vld [vmem:[#allocation11 + $0x40] sm:$0xff]  ;;  %v141_v2 = vld [vmem:[#allocation3 + $0x38] sm:$0xff] }
  0x8c   :  { %5666 = vmatpush3.bf16.msra.mxu1 %v5663_v12  ;;  %v343_v1 = vld [vmem:[#allocation11 + $0x48] sm:$0xff]  ;;  %v142_v3 = vld [vmem:[#allocation3 + $0x40] sm:$0xff]  ;;  %v344_v5 = vld [vmem:[#allocation11 + $0x50] sm:$0xff] }
  0x8d   :  { %5668 = vmatprep.subr.bf16.mxu1 %v5667_v15  ;;  %v5699_v4 = vpack.c.bf16 %v343_v1, %v342_v0  ;;  %v345_v6 = vld [vmem:[#allocation11 + $0x58] sm:$0xff]  ;;  %v143_v7 = vld [vmem:[#allocation3 + $0x48] sm:$0xff]  ;;  %v144_v8 = vld [vmem:[#allocation3 + $0x50] sm:$0xff] }
  0x8e   :  { %5726 = vmatpush3.bf16.msra.mxu0 %v5723_v32  ;;  %v5703_v9 = vpack.c.bf16 %v345_v6, %v344_v5  ;;  %v346_v10 = vld [vmem:[#allocation11 + $0x60] sm:$0xff]  ;;  %v347_v11 = vld [vmem:[#allocation11 + $0x68] sm:$0xff]  ;;  %v145_v12 = vld [vmem:[#allocation3 + $0x58] sm:$0xff] }
  0x8f   :  { %5728 = vmatprep.subr.bf16.mxu0 %v5727_v38  ;;  %v146_v13 = vld [vmem:[#allocation3 + $0x60] sm:$0xff]  ;;  %v5707_v14 = vpack.c.bf16 %v347_v11, %v346_v10  ;;  %v349_v16 = vld [vmem:[#allocation11 + $0x78] sm:$0xff]  ;;  %v147_v17 = vld [vmem:[#allocation3 + $0x68] sm:$0xff] }
  0x90   :  { %5670 = vmatpush3.bf16.msra.mxu1 %v5667_v15  ;;  %v348_v15 = vld [vmem:[#allocation11 + $0x70] sm:$0xff]  ;;  %v149_v20 = vld [vmem:[#allocation3 + $0x78] sm:$0xff]  ;;  %v318_v21 = vld [vmem:[#allocation6] sm:$0xff] }
  0x91   :  { %5672 = vmatprep.subr.bf16.mxu1 %v5671_v18  ;;  %v5711_v19 = vpack.c.bf16 %v349_v16, %v348_v15  ;;  %v319_v22 = vld [vmem:[#allocation6 + $0x8] sm:$0xff]  ;;  %v320_v23 = vld [vmem:[#allocation6 + $0x10] sm:$0xff]  ;;  %v321_v24 = vld [vmem:[#allocation6 + $0x18] sm:$0xff] }
  0x92   :  { %5730 = vmatpush3.bf16.msra.mxu0 %v5727_v38  ;;  %v322_v25 = vld [vmem:[#allocation6 + $0x20] sm:$0xff]  ;;  %v323_v26 = vld [vmem:[#allocation6 + $0x28] sm:$0xff]  ;;  %v325_v28 = vld [vmem:[#allocation6 + $0x38] sm:$0xff] }
  0x93   :  { %5732 = vmatprep.subr.bf16.mxu0 %v5731_v48  ;;  %v326_v29 = vld [vmem:[#allocation6 + $0x40] sm:$0xff]  ;;  %v327_v30 = vld [vmem:[#allocation6 + $0x48] sm:$0xff]  ;;  %v328_v31 = vld [vmem:[#allocation6 + $0x50] sm:$0xff] }
  0x94   :  { %5674 = vmatpush3.bf16.msra.mxu1 %v5671_v18  ;;  %v148_v18 = vld [vmem:[#allocation3 + $0x70] sm:$0xff]  ;;  %v329_v32 = vld [vmem:[#allocation6 + $0x58] sm:$0xff]  ;;  %v331_v36 = vld [vmem:[#allocation6 + $0x68] sm:$0xff] }
  0x95   :  { %5676 = vmatprep.subr.bf16.mxu1 %v5675_v27  ;;  %v532_v34 = vld [vmem:[#allocation12 + $0x70] sm:$0xff]  ;;  %v533_v35 = vld [vmem:[#allocation12 + $0x78] sm:$0xff]  ;;  %v502_v40 = vld [vmem:[#allocation8] sm:$0xff] }
  0x96   :  { %5734 = vmatpush3.bf16.msra.mxu0 %v5731_v48  ;;  %v5743_v37 = vpack.c.bf16 %v533_v35, %v532_v34  ;;  %v332_v38 = vld [vmem:[#allocation6 + $0x70] sm:$0xff]  ;;  %5123 = vmatprep.mubr.f32.mxu0 %v502_v40  ;;  %v503_v41 = vld [vmem:[#allocation8 + $0x8] sm:$0xff]  ;;  %v505_v43 = vld [vmem:[#allocation8 + $0x18] sm:$0xff] }
  0x97   :  { %5736 = vmatprep.subr.bf16.mxu0 %v5735_v56  ;;  %v504_v42 = vld [vmem:[#allocation8 + $0x10] sm:$0xff]  ;;  %v509_v47 = vld [vmem:[#allocation8 + $0x38] sm:$0xff]  ;;  %v6996_v48 = vld [vmem:[%s8682_s4] ss:$0 sm:$0xff] }
  0x98   :  { %5678 = vmatpush3.bf16.msra.mxu1 %v5675_v27  ;;  %v324_v27 = vld [vmem:[#allocation6 + $0x30] sm:$0xff]  ;;  %v511_v10 = vld [vmem:[#allocation8 + $0x48] sm:$0xff]  ;;  %v7046_v15 = vld [vmem:[%s8684_s6] ss:$0 sm:$0xff]  ;;  %s6803_s6 = smov 96  }
  0x99   :  { %5680 = vmatprep.subr.bf16.mxu1 %v5679_v33  ;;  %v512_v16 = vld [vmem:[#allocation8 + $0x50] sm:$0xff]  ;;  %vm7052_vm1 = vmpackc.low %vm702_vm0, %vm702_vm0 }
  0x9a   :  { %5738 = vmatpush3.bf16.msra.mxu0 %v5735_v56 }
  0x9b   :  { %5740 = vmatprep.subr.bf16.mxu0 %v5739_v63 }
  0x9c   :  { %5682 = vmatpush3.bf16.msra.mxu1 %v5679_v33  ;;  %v330_v33 = vld [vmem:[#allocation6 + $0x60] sm:$0xff] }
  0x9d   :  { %5684 = vmatprep.subr.bf16.mxu1 %v5683_v39 }
  0x9e   :  { %5742 = vmatpush3.bf16.msra.mxu0 %v5739_v63 }
  0x9f   :  { %5012 = vmatmul.mubr.f32.vlgmr.msra.gmra.mrb[0].mxu1 %v135_v44  ;;  %5744 = vmatprep.subr.bf16.mxu0 %v5743_v37  ;;  %v506_v44 = vld [vmem:[#allocation8 + $0x20] sm:$0xff] }
  0xa0   :  { %5686 = vmatpush3.bf16.msra.mxu1 %v5683_v39  ;;  %5014 = vmatprep.mubr.f32.mxu1 %v136_v45  ;;  %v333_v39 = vld [vmem:[#allocation6 + $0x78] sm:$0xff]  ;;  %v507_v45 = vld [vmem:[#allocation8 + $0x28] sm:$0xff] }
  0xa1   :  { %5688 = vmatprep.subr.bf16.mxu1 %v5687_v46 }
  0xa2   :  { %5746 = vmatpush3.bf16.msra.mxu0 %v5743_v37 }
  0xa3   :  { %5015 = vmatmul.mubr.f32.gmra.mrb[2].mxu1 %v137_v52 }
  0xa4   :  { %5690 = vmatpush3.bf16.msra.mxu1 %v5687_v46  ;;  %5017 = vmatprep.mubr.f32.mxu1 %v138_v53  ;;  %v508_v46 = vld [vmem:[#allocation8 + $0x30] sm:$0xff] }
  0xa5   :  { %5692 = vmatprep.subr.bf16.mxu1 %v5691_v54  ;;  %5124 = vmatmul.mubr.f32.vlgmr.msra.gmra.mrb[0].mxu0 %v503_v41 }
  0xa6   :  { %5126 = vmatprep.mubr.f32.mxu0 %v504_v42 }
  0xa7   :  { %5018 = vmatmul.mubr.f32.gmra.mrb[4].mxu1 %v139_v60 }
  0xa8   :  { %5694 = vmatpush3.bf16.msra.mxu1 %v5691_v54  ;;  %5020 = vmatprep.mubr.f32.mxu1 %v140_v61 }
  0xa9   :  { %5696 = vmatprep.subr.bf16.mxu1 %v5695_v62  ;;  %5127 = vmatmul.mubr.f32.gmra.mrb[2].mxu0 %v505_v43 }
  0xaa   :  { %5129 = vmatprep.mubr.f32.mxu0 %v506_v44 }
  0xab   :  { %5021 = vmatmul.mubr.f32.gmra.mrb[6].mxu1 %v141_v2 }
  0xac   :  { %5698 = vmatpush3.bf16.msra.mxu1 %v5695_v62  ;;  %5023 = vmatprep.mubr.f32.mxu1 %v142_v3 }
  0xad   :  { %5700 = vmatprep.subr.bf16.mxu1 %v5699_v4  ;;  %5130 = vmatmul.mubr.f32.gmra.mrb[4].mxu0 %v507_v45 }
  0xae   :  { %5132 = vmatprep.mubr.f32.mxu0 %v508_v46 }
  0xaf   :  { %5024 = vmatmul.mubr.f32.gmra.mrb[8].mxu1 %v143_v7 }
  0xb0   :  { %5702 = vmatpush3.bf16.msra.mxu1 %v5699_v4  ;;  %5026 = vmatprep.mubr.f32.mxu1 %v144_v8 }
  0xb1   :  { %5704 = vmatprep.subr.bf16.mxu1 %v5703_v9  ;;  %5133 = vmatmul.mubr.f32.gmra.mrb[6].mxu0 %v509_v47 }
  0xb3   :  { %5027 = vmatmul.mubr.f32.gmra.mrb[10].mxu1 %v145_v12 }
  0xb4   :  { %5706 = vmatpush3.bf16.msra.mxu1 %v5703_v9  ;;  %5029 = vmatprep.mubr.f32.mxu1 %v146_v13  ;;  %v510_v9 = vld [vmem:[#allocation8 + $0x40] sm:$0xff] }
  0xb5   :  { %5708 = vmatprep.subr.bf16.mxu1 %v5707_v14  ;;  %5135 = vmatprep.mubr.f32.mxu0 %v510_v9 }
  0xb6   :  { %5136 = vmatmul.mubr.f32.gmra.mrb[8].mxu0 %v511_v10 }
  0xb7   :  { %5030 = vmatmul.mubr.f32.gmra.mrb[12].mxu1 %v147_v17  ;;  %v513_v17 = vld [vmem:[#allocation8 + $0x58] sm:$0xff]  ;;  %5138 = vmatprep.mubr.f32.mxu0 %v512_v16 }
  0xb8   :  { %5710 = vmatpush3.bf16.msra.mxu1 %v5707_v14  ;;  %5032 = vmatprep.mubr.f32.mxu1 %v148_v18 }
  0xb9   :  { %5712 = vmatprep.subr.bf16.mxu1 %v5711_v19 }
  0xba   :  { %5139 = vmatmul.mubr.f32.gmra.mrb[10].mxu0 %v513_v17 }
  0xbb   :  { %5033 = vmatmul.mubr.f32.gmra.mrb[14].mxu1 %v149_v20 }
  0xbc   :  { %5714 = vmatpush3.bf16.msra.mxu1 %v5711_v19  ;;  %5067 = vmatprep.mubr.f32.mxu1 %v318_v21 }
  0xbf   :  { %5068 = vmatmul.mubr.f32.vlgmr.msra.gmra.mrb[16].mxu1 %v319_v22 }
  0xc0   :  { %5070 = vmatprep.mubr.f32.mxu1 %v320_v23  ;;  %v514_v23 = vld [vmem:[#allocation8 + $0x60] sm:$0xff] }
  0xc1   :  { %5141 = vmatprep.mubr.f32.mxu0 %v514_v23 }
  0xc3   :  { %5071 = vmatmul.mubr.f32.gmra.mrb[18].mxu1 %v321_v24  ;;  %v515_v24 = vld [vmem:[#allocation8 + $0x68] sm:$0xff] }
  0xc4   :  { %5073 = vmatprep.mubr.f32.mxu1 %v322_v25  ;;  %5142 = vmatmul.mubr.f32.gmra.mrb[12].mxu0 %v515_v24 }
  0xc7   :  { %5074 = vmatmul.mubr.f32.gmra.mrb[20].mxu1 %v323_v26 }
  0xc8   :  { %5076 = vmatprep.mubr.f32.mxu1 %v324_v27 }
  0xcb   :  { %5077 = vmatmul.mubr.f32.gmra.mrb[22].mxu1 %v325_v28 }
  0xcc   :  { %5079 = vmatprep.mubr.f32.mxu1 %v326_v29 }
  0xcf   :  { %5080 = vmatmul.mubr.f32.gmra.mrb[24].mxu1 %v327_v30 }
  0xd0   :  { %5082 = vmatprep.mubr.f32.mxu1 %v328_v31  ;;  %v516_v31 = vld [vmem:[#allocation8 + $0x70] sm:$0xff] }
  0xd1   :  { %5144 = vmatprep.mubr.f32.mxu0 %v516_v31 }
  0xd3   :  { %5083 = vmatmul.mubr.f32.gmra.mrb[26].mxu1 %v329_v32  ;;  %v517_v32 = vld [vmem:[#allocation8 + $0x78] sm:$0xff] }
  0xd4   :  { %5085 = vmatprep.mubr.f32.mxu1 %v330_v33  ;;  %5145 = vmatmul.mubr.f32.gmra.mrb[14].mxu0 %v517_v32 }
  0xd7   :  { %5086 = vmatmul.mubr.f32.gmra.mrb[28].mxu1 %v331_v36 }
  0xd8   :  { %5088 = vmatprep.mubr.f32.mxu1 %v332_v38 }
  0xdb   :  { %5089 = vmatmul.mubr.f32.gmra.mrb[30].mxu1 %v333_v39 }
 0x172   :  { %v6998_v49 = vpop.f32.mrb[0].mxu1 }
 0x173   :  { %v239_v50 = vpop.f32.mrb[1].mxu1  ;;  %v245_v39 = vadd.f32 %v6998_v49, %v6996_v48 }
 0x174   :  { %v240_v51 = vadd.f32 %v6996_v48, %v239_v50 }
 0x175   :  { %v7084_v46 = vmul.f32 0.17677669, %v245_v39 }
 0x176   :  { %v7001_v52 = vmul.f32 0.17677669, %v240_v51  ;;  %v7003_v53 = vpop.f32.mrb[2].mxu1 }
 0x177   :  { %v7005_v54 = vpop.f32.mrb[3].mxu1  ;;  %v255_v50 = vadd.f32 %v7003_v53, %v6996_v48 }
 0x178   :  { %5163 = vmatprep.mubr.msk.f32.mxu1 %vm702_vm0, %v7001_v52 }
 0x179   :  { %v7104_v51 = vmul.f32 0.17677669, %v255_v50 }
 0x17a   :  { %v5019_v55 = vpop.f32.mrb[4].mxu1 }
 0x17b   :  { %v7010_v56 = vadd.f32 %v5019_v55, %v6996_v48  ;;  %v7012_v57 = vpop.f32.mrb[5].mxu1  ;;  %v250_v55 = vadd.f32 %v6996_v48, %v7005_v54 }
 0x17d   :  { %v7116_v53 = vmul.f32 0.17677669, %v250_v55 }
 0x17e   :  { %v5022_v58 = vpop.f32.mrb[6].mxu1 }
 0x17f   :  { %v7015_v59 = vadd.f32 %v5022_v58, %v6996_v48  ;;  %v7017_v60 = vpop.f32.mrb[7].mxu1  ;;  %v260_v58 = vadd.f32 %v6996_v48, %v7012_v57  ;;  %v7135_v57 = vmul.f32 0.17677669, %v7010_v56  ;;  %v5125_v56 = vpop.f32.mrb[0].mxu0 }
 0x182   :  { %v5025_v61 = vpop.f32.mrb[8].mxu1 }
 0x183   :  { %v7020_v62 = vadd.f32 %v5025_v61, %v6996_v48  ;;  %v279_v63 = vpop.f32.mrb[9].mxu1  ;;  %v7118_v61 = vmul.f32 0.17677669, %v260_v58 }
 0x184   :  { %v7023_v0 = vadd.f32 %v6996_v48, %v279_v63  ;;  %v270_v63 = vadd.f32 %v6996_v48, %v7017_v60  ;;  %v607_v60 = vpop.f32.mrb[1].mxu0 }
 0x185   :  { %8716 = vst [vmem:[#allocation21_spill] sm:$0xff] %v7020_v62 }
 0x186   :  { %8717 = vst [vmem:[#allocation22_spill] sm:$0xff] %v7023_v0  ;;  %v5028_v1 = vpop.f32.mrb[10].mxu1  ;;  %v7128_v54 = vmul.f32 0.17677669, %v270_v63 }
 0x187   :  { %v7026_v2 = vadd.f32 %v5028_v1, %v6996_v48  ;;  %v289_v3 = vpop.f32.mrb[11].mxu1 }
 0x188   :  { %v7029_v4 = vadd.f32 %v6996_v48, %v289_v3 }
 0x189   :  { %8718 = vst [vmem:[#allocation23_spill] sm:$0xff] %v7026_v2 }
 0x18a   :  { %8719 = vst [vmem:[#allocation24_spill] sm:$0xff] %v7029_v4  ;;  %v5031_v5 = vpop.f32.mrb[12].mxu1 }
 0x18b   :  { %v7032_v6 = vadd.f32 %v5031_v5, %v6996_v48  ;;  %v299_v7 = vpop.f32.mrb[13].mxu1  ;;  %v5128_v5 = vpop.f32.mrb[2].mxu0 }
 0x18c   :  { %v7035_v8 = vadd.f32 %v6996_v48, %v299_v7  ;;  %v617_v7 = vpop.f32.mrb[3].mxu0 }
 0x18d   :  { %8720 = vst [vmem:[#allocation25_spill] sm:$0xff] %v7032_v6  ;;  %v5131_v9 = vpop.f32.mrb[4].mxu0 }
 0x18e   :  { %8721 = vst [vmem:[#allocation26_spill] sm:$0xff] %v7035_v8  ;;  %v5034_v11 = vpop.f32.mrb[14].mxu1 }
 0x18f   :  { %v7038_v12 = vadd.f32 %v5034_v11, %v6996_v48  ;;  %v309_v13 = vpop.f32.mrb[15].mxu1  ;;  %v627_v11 = vpop.f32.mrb[5].mxu0 }
 0x190   :  { %v7041_v14 = vadd.f32 %v6996_v48, %v309_v13  ;;  %v7144_v48 = vmul.f32 0.17677669, %v7015_v59  ;;  %v7177_v59 = vld [vmem:[%s8686_s8] ss:$0 sm:$0xff]  ;;  %v5134_v17 = vpop.f32.mrb[6].mxu0  ;;  %s6805_s8 = smov 32  }
 0x191   :  { %8722 = vst [vmem:[#allocation27_spill] sm:$0xff] %v7038_v12  ;;  %v613_v1 = vadd.f32 %v5125_v56, %v7177_v59  ;;  %v608_v3 = vadd.f32 %v7177_v59, %v607_v60  ;;  %v7182_v10 = vadd.f32 %v5131_v9, %v7177_v59  ;;  %v628_v16 = vadd.f32 %v7177_v59, %v627_v11 }
 0x192   :  { %8723 = vst [vmem:[#allocation28_spill] sm:$0xff] %v7041_v14  ;;  %v5069_v18 = vpop.f32.mrb[16].mxu1  ;;  %v623_v23 = vadd.f32 %v5128_v5, %v7177_v59  ;;  %v618_v24 = vadd.f32 %v7177_v59, %v617_v7 }
 0x193   :  { %v429_v19 = vadd.f32 %v5069_v18, %v7046_v15  ;;  %v423_v20 = vpop.f32.mrb[17].mxu1  ;;  %v7184_v13 = vpack.i.bf16 %v613_v1, %v608_v3  ;;  %v7190_v18 = vadd.f32 %v5134_v17, %v7177_v59  ;;  %v5771_v17 = vpack.c.bf16 %v613_v1, %v608_v3 }
 0x194   :  { %v424_v21 = vadd.f32 %v7046_v15, %v423_v20  ;;  %v7193_v20 = vpack.i.bf16 %v7182_v10, %v628_v16 }
 0x196   :  { %v5072_v25 = vpop.f32.mrb[18].mxu1  ;;  %v7056_v26 = vpack.i.bf16 %v429_v19, %v424_v21  ;;  %v5747_v27 = vpack.c.bf16 %v429_v19, %v424_v21  ;;  %v637_v19 = vpop.f32.mrb[7].mxu0 }
 0x197   :  { %v439_v28 = vadd.f32 %v5072_v25, %v7046_v15  ;;  %v433_v29 = vpop.f32.mrb[19].mxu1  ;;  %v638_v21 = vadd.f32 %v7177_v59, %v637_v19  ;;  %v5775_v19 = vpack.c.bf16 %v623_v23, %v618_v24 }
 0x198   :  { %v434_v30 = vadd.f32 %v7046_v15, %v433_v29  ;;  %6113 = vrot.lane.b32.xlu0 %v7056_v26, %s6803_s6  ;;  %5749 = vmatprep.subr.msk.bf16.mxu1 %vm7052_vm1, %v5747_v27 }
 0x199   :  { %5752 = vmatpush3.bf16.xpose.msk.msra.mxu1 %vm7052_vm1, %v5747_v27  ;;  %v7201_v25 = vpack.i.bf16 %v7190_v18, %v638_v21  ;;  %v5783_v1 = vpack.c.bf16 %v7190_v18, %v638_v21 }
 0x19a   :  { %v5075_v33 = vpop.f32.mrb[20].mxu1  ;;  %v7066_v34 = vpack.i.bf16 %v439_v28, %v434_v30  ;;  %v5753_v35 = vpack.c.bf16 %v439_v28, %v434_v30  ;;  %v7205_v28 = vpack.i.bf16 %v623_v23, %v618_v24 }
 0x19b   :  { %v449_v36 = vadd.f32 %v5075_v33, %v7046_v15  ;;  %v443_v37 = vpop.f32.mrb[21].mxu1 }
 0x19c   :  { %v444_v38 = vadd.f32 %v7046_v15, %v443_v37  ;;  %6118 = vrot.lane.b32.xlu0 %v7066_v34, %s6803_s6  ;;  %5755 = vmatprep.subr.msk.bf16.mxu1 %vm7052_vm1, %v5753_v35 }
 0x19e   :  { %v5078_v40 = vpop.f32.mrb[22].mxu1  ;;  %v7076_v41 = vpack.i.bf16 %v449_v36, %v444_v38  ;;  %v5759_v42 = vpack.c.bf16 %v449_v36, %v444_v38 }
 0x19f   :  { %v459_v43 = vadd.f32 %v5078_v40, %v7046_v15  ;;  %v453_v44 = vpop.f32.mrb[23].mxu1 }
 0x1a0   :  { %v454_v45 = vadd.f32 %v7046_v15, %v453_v44  ;;  %6123 = vrot.lane.b32.xlu1 %v7076_v41, %s6803_s6  ;;  %6133 = vrot.lane.b32.xlu0 %v7056_v26, %s6804_s18 }
 0x1a1   :  { %5758 = vmatpush3.bf16.xpose.msk.msra.mxu1 %vm7052_vm1, %v5753_v35 }
 0x1a2   :  { %v7088_v47 = vpack.i.bf16 %v459_v43, %v454_v45  ;;  %5761 = vmatprep.subr.msk.bf16.mxu1 %vm7052_vm1, %v5759_v42  ;;  %v5765_v49 = vpack.c.bf16 %v459_v43, %v454_v45  ;;  %v7203_v27 = vpop.f32.mrb[24].mxu1 }
 0x1a3   :  { %v7207_v29 = vpop.f32.mrb[25].mxu1 }
 0x1a4   :  { %6128 = vrot.lane.b32.xlu1 %v7088_v47, %s6803_s6  ;;  %1084 = vrot.lane.b32.xlu0 %v7084_v46, %s6803_s6 }
 0x1a6   :  { %v7209_v30 = vpop.f32.mrb[26].mxu1 }
 0x1a7   :  { %v7215_v31 = vpop.f32.mrb[27].mxu1 }
 0x1a8   :  { %6143 = vrot.lane.b32.xlu0 %v7076_v41, %s6804_s18  ;;  %1082 = vrot.lane.b32.xlu1 %v7001_v52, %s6803_s6 }
 0x1a9   :  { %5764 = vmatpush3.bf16.xpose.msk.msra.mxu1 %vm7052_vm1, %v5759_v42 }
 0x1aa   :  { %5767 = vmatprep.subr.msk.bf16.mxu1 %vm7052_vm1, %v5765_v49  ;;  %v7217_v32 = vpop.f32.mrb[28].mxu1 }
 0x1ab   :  { %v7219_v33 = vpop.f32.mrb[29].mxu1 }
 0x1ac   :  { %1088 = vrot.lane.b32.xlu0 %v7104_v51, %s6803_s6  ;;  %6138 = vrot.lane.b32.xlu1 %v7066_v34, %s6804_s18 }
 0x1ae   :  { %v7221_v35 = vpop.f32.mrb[30].mxu1 }
 0x1af   :  { %v7227_v36 = vpop.f32.mrb[31].mxu1 }
 0x1b0   :  { %1090 = vrot.lane.b32.xlu0 %v7118_v61, %s6803_s6  ;;  %1086 = vrot.lane.b32.xlu1 %v7116_v53, %s6803_s6 }
 0x1b1   :  { %5770 = vmatpush3.bf16.xpose.msk.msra.mxu1 %vm7052_vm1, %v5765_v49 }
 0x1b2   :  { %5772 = vmatprep.subr.bf16.mxu1 %v5771_v17 }
 0x1b4   :  { %1094 = vrot.lane.b32.xlu0 %v7128_v54, %s6803_s6  ;;  %6148 = vrot.lane.b32.xlu1 %v7088_v47, %s6804_s18 }
 0x1b8   :  { %1541 = vrot.lane.b32.xlu0 %v7001_v52, %s6804_s18  ;;  %1092 = vrot.lane.b32.xlu1 %v7135_v57, %s6803_s6 }
 0x1b9   :  { %5164 = vmatmul.mubr.msk.f32.vlgmr.msra.gmra.mrb[32].mxu1 %vm702_vm0, %v7084_v46 }
 0x1ba   :  { %5166 = vmatprep.mubr.msk.f32.mxu1 %vm702_vm0, %v7116_v53  ;;  %5774 = vmatpush3.bf16.msra.mxu1 %v5771_v17 }
 0x1bb   :  { %5776 = vmatprep.subr.bf16.mxu1 %v5775_v19 }
 0x1bc   :  { %1545 = vrot.lane.b32.xlu0 %v7116_v53, %s6804_s18  ;;  %1096 = vrot.lane.b32.xlu1 %v7144_v48, %s6803_s6 }
 0x1bd   :  { %5167 = vmatmul.mubr.msk.f32.gmra.mrb[34].mxu1 %vm702_vm0, %v7104_v51 }
 0x1be   :  { %5169 = vmatprep.mubr.msk.f32.mxu1 %vm702_vm0, %v7118_v61  ;;  %5778 = vmatpush3.bf16.msra.mxu1 %v5775_v19 }
 0x1c0   :  { %1549 = vrot.lane.b32.xlu0 %v7118_v61, %s6804_s18  ;;  %1543 = vrot.lane.b32.xlu1 %v7084_v46, %s6804_s18 }
 0x1c1   :  { %5170 = vmatmul.mubr.msk.f32.gmra.mrb[36].mxu1 %vm702_vm0, %v7135_v57 }
 0x1c2   :  { %5172 = vmatprep.mubr.msk.f32.mxu1 %vm702_vm0, %v7128_v54 }
 0x1c4   :  { %1553 = vrot.lane.b32.xlu0 %v7128_v54, %s6804_s18  ;;  %1547 = vrot.lane.b32.xlu1 %v7104_v51, %s6804_s18 }
 0x1c5   :  { %5173 = vmatmul.mubr.msk.f32.gmra.mrb[38].mxu1 %vm702_vm0, %v7144_v48 }
 0x1c8   :  { %1551 = vrot.lane.b32.xlu1 %v7135_v57, %s6804_s18  ;;  %6158 = vrot.lane.b32.xlu0 %v7205_v28, %s6803_s6 }
 0x1cc   :  { %1555 = vrot.lane.b32.xlu1 %v7144_v48, %s6804_s18  ;;  %6173 = vrot.lane.b32.xlu0 %v7184_v13, %s6804_s18 }
 0x1d0   :  { %6153 = vrot.lane.b32.xlu1 %v7184_v13, %s6803_s6 }
 0x1d4   :  { %6163 = vrot.lane.b32.xlu1 %v7193_v20, %s6803_s6 }
 0x1d8   :  { %6168 = vrot.lane.b32.xlu1 %v7201_v25, %s6803_s6 }
 0x1dc   :  { %6178 = vrot.lane.b32.xlu1 %v7205_v28, %s6804_s18 }
 0x1e0   :  { %6183 = vrot.lane.b32.xlu1 %v7193_v20, %s6804_s18 }
 0x1e4   :  { %6188 = vrot.lane.b32.xlu1 %v7201_v25, %s6804_s18 }
 0x20a   :  { %v6114_v37 = vpop.permute.xlu0 %6113 }
 0x20b   :  { %v6116_v38 = vunpack.i.h.bf16 %v6114_v37  ;;  %v6115_v39 = vunpack.i.l.bf16 %v6114_v37 }
 0x20d   :  { %v5787_v40 = vpack.c.bf16 %v6116_v38, %v6115_v39 }
 0x20e   :  { %v6119_v42 = vpop.permute.xlu0 %6118 }
 0x20f   :  { %v6121_v43 = vunpack.i.h.bf16 %v6119_v42  ;;  %v6120_v44 = vunpack.i.l.bf16 %v6119_v42  ;;  %5789 = vmatprep.subr.msk.bf16.mxu0 %vm7052_vm1, %v5787_v40  ;;  %v5779_v42 = vpack.c.bf16 %v7182_v10, %v628_v16 }
 0x210   :  { %5792 = vmatpush3.bf16.xpose.msk.msra.mxu0 %vm7052_vm1, %v5787_v40 }
 0x211   :  { %v5793_v45 = vpack.c.bf16 %v6121_v43, %v6120_v44  ;;  %5780 = vmatprep.subr.bf16.mxu1 %v5779_v42 }
 0x212   :  { %v6124_v49 = vpop.permute.xlu1 %6123  ;;  %v6134_v56 = vpop.permute.xlu0 %6133  ;;  %5782 = vmatpush3.bf16.msra.mxu1 %v5779_v42 }
 0x213   :  { %v6126_v50 = vunpack.i.h.bf16 %v6124_v49  ;;  %v6125_v55 = vunpack.i.l.bf16 %v6124_v49  ;;  %5795 = vmatprep.subr.msk.bf16.mxu0 %vm7052_vm1, %v5793_v45  ;;  %v6136_v38 = vunpack.i.h.bf16 %v6134_v56  ;;  %v6135_v39 = vunpack.i.l.bf16 %v6134_v56  ;;  %5784 = vmatprep.subr.bf16.mxu1 %v5783_v1 }
 0x215   :  { %v5799_v58 = vpack.c.bf16 %v6126_v50, %v6125_v55  ;;  %v5827_v43 = vpack.c.bf16 %v6136_v38, %v6135_v39  ;;  %v5137_v39 = vpop.f32.mrb[8].mxu0 }
 0x216   :  { %v6129_v63 = vpop.permute.xlu1 %6128  ;;  %v1085_v11 = vpop.permute.xlu0 %1084  ;;  %5786 = vmatpush3.bf16.msra.mxu1 %v5783_v1  ;;  %v464_v1 = vadd.f32 %v7046_v15, %v7207_v29  ;;  %v484_v29 = vadd.f32 %v7046_v15, %v7219_v33 }
 0x217   :  { %v6131_v60 = vunpack.i.h.bf16 %v6129_v63  ;;  %v6130_v5 = vunpack.i.l.bf16 %v6129_v63 }
 0x218   :  { %5798 = vmatpush3.bf16.xpose.msk.msra.mxu0 %vm7052_vm1, %v5793_v45 }
 0x219   :  { %5801 = vmatprep.subr.msk.bf16.mxu0 %vm7052_vm1, %v5799_v58  ;;  %v5805_v9 = vpack.c.bf16 %v6131_v60, %v6130_v5 }
 0x21a   :  { %v1083_v7 = vpop.permute.xlu1 %1082  ;;  %v6144_v40 = vpop.permute.xlu0 %6143 }
 0x21b   :  { %5219 = vmatprep.mubr.msk.f32.mxu0 %vm702_vm0, %v1083_v7  ;;  %v6146_v18 = vunpack.i.h.bf16 %v6144_v40  ;;  %v6145_v21 = vunpack.i.l.bf16 %v6144_v40  ;;  %v647_v40 = vpop.f32.mrb[9].mxu0 }
 0x21c   :  { %v5140_v42 = vpop.f32.mrb[10].mxu0 }
 0x21d   :  { %v5839_v55 = vpack.c.bf16 %v6146_v18, %v6145_v21  ;;  %v489_v18 = vadd.f32 %v7217_v32, %v7046_v15  ;;  %v663_v33 = vadd.f32 %v5140_v42, %v7177_v59 }
 0x21e   :  { %v6139_v37 = vpop.permute.xlu1 %6138  ;;  %v1089_v23 = vpop.permute.xlu0 %1088 }
 0x21f   :  { %v6141_v24 = vunpack.i.h.bf16 %v6139_v37  ;;  %v6140_v44 = vunpack.i.l.bf16 %v6139_v37  ;;  %v7309_v32 = vpack.c.bf16 %v489_v18, %v484_v29 }
 0x220   :  { %5804 = vmatpush3.bf16.xpose.msk.msra.mxu0 %vm7052_vm1, %v5799_v58 }
 0x221   :  { %5807 = vmatprep.subr.msk.bf16.mxu0 %vm7052_vm1, %v5805_v9  ;;  %v5833_v10 = vpack.c.bf16 %v6141_v24, %v6140_v44  ;;  %v474_v44 = vadd.f32 %v7046_v15, %v7215_v31  ;;  %v499_v31 = vadd.f32 %v7221_v35, %v7046_v15 }
 0x222   :  { %v1087_v3 = vpop.permute.xlu1 %1086  ;;  %v1091_v16 = vpop.permute.xlu0 %1090 }
 0x226   :  { %v6149_v45 = vpop.permute.xlu1 %6148  ;;  %v1095_v50 = vpop.permute.xlu0 %1094 }
 0x227   :  { %v6151_v63 = vunpack.i.h.bf16 %v6149_v45  ;;  %v6150_v56 = vunpack.i.l.bf16 %v6149_v45 }
 0x228   :  { %5810 = vmatpush3.bf16.xpose.msk.msra.mxu0 %vm7052_vm1, %v5805_v9 }
 0x229   :  { %5829 = vmatprep.subr.msk.bf16.mxu0 %vm7052_vm1, %v5827_v43  ;;  %v5845_v5 = vpack.c.bf16 %v6151_v63, %v6150_v56  ;;  %v7311_v63 = vpack.i.bf16 %v489_v18, %v484_v29 }
 0x22a   :  { %v1093_v49 = vpop.permute.xlu1 %1092  ;;  %v1542_v60 = vpop.permute.xlu0 %1541 }
 0x22b   :  { %8727 = vst [vmem:[#allocation30_spill] sm:$0xff] %v7311_v63 }
 0x22e   :  { %v1097_v58 = vpop.permute.xlu1 %1096  ;;  %v1546_v9 = vpop.permute.xlu0 %1545 }
 0x22f   :  { %5220 = vmatmul.mubr.msk.f32.vlgmr.msra.gmra.mrb[16].mxu0 %vm702_vm0, %v1085_v11 }
 0x230   :  { %5222 = vmatprep.mubr.msk.f32.mxu0 %vm702_vm0, %v1087_v3  ;;  %5832 = vmatpush3.bf16.xpose.msk.msra.mxu0 %vm7052_vm1, %v5827_v43  ;;  %v469_v43 = vadd.f32 %v7203_v27, %v7046_v15  ;;  %v657_v3 = vpop.f32.mrb[11].mxu0 }
 0x231   :  { %5835 = vmatprep.subr.msk.bf16.mxu0 %vm7052_vm1, %v5833_v10  ;;  %v5143_v24 = vpop.f32.mrb[12].mxu0  ;;  %v658_v56 = vadd.f32 %v7177_v59, %v657_v3 }
 0x232   :  { %v1544_v7 = vpop.permute.xlu1 %1543  ;;  %v1550_v17 = vpop.permute.xlu0 %1549 }
 0x233   :  { %5223 = vmatmul.mubr.msk.f32.gmra.mrb[18].mxu0 %vm702_vm0, %v1089_v23  ;;  %v479_v23 = vadd.f32 %v7209_v30, %v7046_v15  ;;  %v667_v45 = vpop.f32.mrb[13].mxu0 }
 0x234   :  { %5225 = vmatprep.mubr.msk.f32.mxu0 %vm702_vm0, %v1091_v16  ;;  %v7293_v16 = vpack.i.bf16 %v469_v43, %v464_v1  ;;  %v5146_v27 = vpop.f32.mrb[14].mxu0 }
 0x235   :  { %v677_v21 = vpop.f32.mrb[15].mxu0  ;;  %v7301_v30 = vpack.c.bf16 %v479_v23, %v474_v44 }
 0x236   :  { %v1548_v11 = vpop.permute.xlu1 %1547  ;;  %v1554_v37 = vpop.permute.xlu0 %1553  ;;  %8726 = vst [vmem:[#allocation29_spill] sm:$0xff] %v7293_v16 }
 0x237   :  { %5226 = vmatmul.mubr.msk.f32.gmra.mrb[20].mxu0 %vm702_vm0, %v1093_v49  ;;  %v7299_v49 = vpack.i.bf16 %v479_v23, %v474_v44 }
 0x238   :  { %5228 = vmatprep.mubr.msk.f32.mxu0 %vm702_vm0, %v1095_v50  ;;  %5838 = vmatpush3.bf16.xpose.msk.msra.mxu0 %vm7052_vm1, %v5833_v10  ;;  %v7291_v10 = vpack.c.bf16 %v469_v43, %v464_v1  ;;  %v494_v50 = vadd.f32 %v7046_v15, %v7227_v36  ;;  %v673_v15 = vadd.f32 %v5143_v24, %v7177_v59 }
 0x239   :  { %5841 = vmatprep.subr.msk.bf16.mxu0 %vm7052_vm1, %v5839_v55  ;;  %v668_v36 = vadd.f32 %v7177_v59, %v667_v45 }
 0x23a   :  { %v1552_v19 = vpop.permute.xlu1 %1551  ;;  %v7319_v35 = vpack.i.bf16 %v499_v31, %v494_v50 }
 0x23b   :  { %5229 = vmatmul.mubr.msk.f32.gmra.mrb[22].mxu0 %vm702_vm0, %v1097_v58  ;;  %v648_v58 = vadd.f32 %v7177_v59, %v647_v40 }
 0x23c   :  { %5275 = vmatprep.mubr.msk.f32.mxu0 %vm702_vm0, %v1542_v60  ;;  %8728 = vst [vmem:[#allocation31_spill] sm:$0xff] %v7319_v35 }
 0x23e   :  { %v1556_v38 = vpop.permute.xlu1 %1555 }
 0x240   :  { %5844 = vmatpush3.bf16.xpose.msk.msra.mxu0 %vm7052_vm1, %v5839_v55  ;;  %v653_v55 = vadd.f32 %v5137_v39, %v7177_v59 }
 0x241   :  { %5847 = vmatprep.subr.msk.bf16.mxu0 %vm7052_vm1, %v5845_v5 }
 0x242   :  { %v7315_v60 = vpack.c.bf16 %v653_v55, %v648_v58 }
 0x248   :  { %5850 = vmatpush3.bf16.xpose.msk.msra.mxu0 %vm7052_vm1, %v5845_v5  ;;  %v7317_v5 = vpack.c.bf16 %v499_v31, %v494_v50 }
 0x24f   :  { %5276 = vmatmul.mubr.msk.f32.vlgmr.msra.gmra.mrb[24].mxu0 %vm702_vm0, %v1544_v7  ;;  %v7321_v7 = vpack.i.bf16 %v653_v55, %v648_v58  ;;  %v6154_v58 = vpop.permute.xlu1 %6153 }
 0x250   :  { %5278 = vmatprep.mubr.msk.f32.mxu0 %vm702_vm0, %v1546_v9  ;;  %v7325_v9 = vpack.c.bf16 %v663_v33, %v658_v56 }
 0x251   :  { %8729 = vst [vmem:[#allocation32_spill] sm:$0xff] %v7321_v7 }
 0x253   :  { %5279 = vmatmul.mubr.msk.f32.gmra.mrb[26].mxu0 %vm702_vm0, %v1548_v11  ;;  %v7327_v11 = vpack.i.bf16 %v663_v33, %v658_v56  ;;  %v6156_v33 = vunpack.i.h.bf16 %v6154_v58  ;;  %v6155_v56 = vunpack.i.l.bf16 %v6154_v58 }
 0x254   :  { %5281 = vmatprep.mubr.msk.f32.mxu0 %vm702_vm0, %v1550_v17  ;;  %v683_v17 = vadd.f32 %v5146_v27, %v7177_v59 }
 0x255   :  { %8730 = vst [vmem:[#allocation33_spill] sm:$0xff] %v7327_v11 }
 0x257   :  { %5282 = vmatmul.mubr.msk.f32.gmra.mrb[28].mxu0 %vm702_vm0, %v1552_v19  ;;  %v678_v19 = vadd.f32 %v7177_v59, %v677_v21 }
 0x258   :  { %5284 = vmatprep.mubr.msk.f32.mxu0 %vm702_vm0, %v1554_v37  ;;  %v7331_v37 = vpack.c.bf16 %v673_v15, %v668_v36 }
 0x259   :  { %v7335_v39 = vpack.c.bf16 %v683_v17, %v678_v19  ;;  %v7337_v40 = vpack.i.bf16 %v683_v17, %v678_v19 }
 0x25b   :  { %5285 = vmatmul.mubr.msk.f32.gmra.mrb[30].mxu0 %vm702_vm0, %v1556_v38  ;;  %v7333_v38 = vpack.i.bf16 %v673_v15, %v668_v36  ;;  %8732 = vst [vmem:[#allocation35_spill] sm:$0xff] %v7337_v40  ;;  %v7371_v15 = vpack.c.bf16 %v6156_v33, %v6155_v56  ;;  %v7374_v36 = vpop.permute.xlu1 %6163 }
 0x25d   :  { %8731 = vst [vmem:[#allocation34_spill] sm:$0xff] %v7333_v38  ;;  %5812 = vmatprep.subr.bf16.mxu1 %v7371_v15  ;;  %v6159_v38 = vpop.permute.xlu0 %6158 }
 0x261   :  { %v7416_v7 = vpop.permute.xlu0 %6173 }
 0x28c   :  { %v7339_v42 = vpop.f32.mrb[32].mxu1 }
 0x28d   :  { %v7341_v43 = vpop.f32.mrb[33].mxu1  ;;  %v860_v1 = vsel %vm856_vm2, %v7339_v42, -inf }
 0x28e   :  { %861 = vmax.xlane.f32.xlu1 %v860_v1  ;;  %v857_v59 = vsel %vm856_vm2, %v7341_v43, -inf }
 0x28f   :  { %858 = vmax.xlane.f32.xlu0 %v857_v59  ;;  %v7382_v59 = vpop.permute.xlu1 %6168 }
 0x290   :  { %v7347_v3 = vpop.f32.mrb[34].mxu1 }
 0x291   :  { %v7349_v23 = vpop.f32.mrb[35].mxu1  ;;  %v866_v24 = vsel %vm856_vm2, %v7347_v3, -inf }
 0x292   :  { %v863_v18 = vsel %vm856_vm2, %v7349_v23, -inf }
 0x293   :  { %867 = vmax.xlane.f32.xlu0 %v866_v24 }
 0x294   :  { %v7353_v44 = vpop.f32.mrb[36].mxu1 }
 0x295   :  { %v7355_v45 = vpop.f32.mrb[37].mxu1  ;;  %v872_v31 = vsel %vm856_vm2, %v7353_v44, -inf }
 0x296   :  { %v869_v27 = vsel %vm856_vm2, %v7355_v45, -inf }
 0x297   :  { %864 = vmax.xlane.f32.xlu0 %v863_v18  ;;  %870 = vmax.xlane.f32.xlu1 %v869_v27 }
 0x298   :  { %v7361_v29 = vpop.f32.mrb[38].mxu1 }
 0x299   :  { %v7363_v21 = vpop.f32.mrb[39].mxu1  ;;  %v878_v55 = vsel %vm856_vm2, %v7361_v29, -inf }
 0x29a   :  { %v875_v50 = vsel %vm856_vm2, %v7363_v21, -inf }
 0x29b   :  { %873 = vmax.xlane.f32.xlu0 %v872_v31  ;;  %876 = vmax.xlane.f32.xlu1 %v875_v50 }
 0x29f   :  { %879 = vmax.xlane.f32.xlu0 %v878_v55  ;;  %v7394_v55 = vpop.permute.xlu1 %6178 }
 0x2a3   :  { %v7408_v40 = vpop.permute.xlu1 %6183 }
 0x302   :  { %v7376_v17 = vpop.f32.mrb[16].mxu0 }
 0x303   :  { %v7378_v19 = vpop.f32.mrb[17].mxu0  ;;  %v1254_v1 = vsel %vm856_vm2, %v7376_v17, -inf }
 0x304   :  { %1255 = vmax.xlane.f32.xlu0 %v1254_v1  ;;  %v1251_v24 = vsel %vm856_vm2, %v7378_v19, -inf }
 0x305   :  { %1252 = vmax.xlane.f32.xlu1 %v1251_v24 }
 0x306   :  { %v7386_v18 = vpop.f32.mrb[18].mxu0 }
 0x307   :  { %v7388_v27 = vpop.f32.mrb[19].mxu0  ;;  %v1260_v31 = vsel %vm856_vm2, %v7386_v18, -inf }
 0x308   :  { %1261 = vmax.xlane.f32.xlu0 %v1260_v31  ;;  %v1257_v50 = vsel %vm856_vm2, %v7388_v27, -inf }
 0x309   :  { %1258 = vmax.xlane.f32.xlu1 %v1257_v50 }
 0x30a   :  { %v7396_v58 = vpop.f32.mrb[20].mxu0 }
 0x30b   :  { %v7398_v33 = vpop.f32.mrb[21].mxu0  ;;  %v1266_v56 = vsel %vm856_vm2, %v7396_v58, -inf }
 0x30c   :  { %1267 = vmax.xlane.f32.xlu0 %v1266_v56  ;;  %v1263_v31 = vsel %vm856_vm2, %v7398_v33, -inf  ;;  %v7414_v56 = vpop.permute.xlu1 %6188 }
 0x30e   :  { %v7402_v1 = vpop.f32.mrb[22].mxu0 }
 0x30f   :  { %v7404_v24 = vpop.f32.mrb[23].mxu0  ;;  %v1272_v11 = vsel %vm856_vm2, %v7402_v1, -inf }
 0x310   :  { %1264 = vmax.xlane.f32.xlu0 %v1263_v31  ;;  %v1269_v50 = vsel %vm856_vm2, %v7404_v24, -inf }
 0x311   :  { %1270 = vmax.xlane.f32.xlu1 %v1269_v50 }
 0x314   :  { %1273 = vmax.xlane.f32.xlu0 %v1272_v11 }
 0x31b   :  { %v862_v63 = vpop.xlane.xlu1 %861 }
 0x31c   :  { %v882_v35 = vsub.f32 %v7339_v42, %v862_v63  ;;  %v859_v16 = vpop.xlane.xlu0 %858 }
 0x31d   :  { %v881_v12 = vsub.f32 %v7341_v43, %v859_v16 }
 0x31e   :  { %v891_v31 = vmul.f32 1.442695, %v882_v35  ;;  %v6161_v35 = vunpack.i.h.bf16 %v6159_v38 }
 0x31f   :  { %v889_v14 = vmul.f32 1.442695, %v881_v12 }
 0x320   :  { %v868_v6 = vpop.xlane.xlu0 %867 }
 0x321   :  { %6352 = vpow2.f32 %v889_v14  ;;  %v884_v50 = vsub.f32 %v7347_v3, %v868_v6  ;;  %v6160_v3 = vunpack.i.l.bf16 %v6159_v38 }
 0x322   :  { %6354 = vpow2.f32 %v891_v31  ;;  %v7421_v8 = vpop.f32.mrb[24].mxu0  ;;  %6198 = vrot.lane.b32.xlu1 %v7066_v34, %s6805_s8 }
 0x323   :  { %v7425_v11 = vpop.f32.mrb[25].mxu0  ;;  %v1713_v63 = vsel %vm856_vm2, %v7421_v8, -inf  ;;  %v895_v6 = vmul.f32 1.442695, %v884_v50  ;;  %v6166_v50 = vunpack.i.h.bf16 %v7374_v36 }
 0x324   :  { %v865_v42 = vpop.xlane.xlu0 %864  ;;  %v871_v16 = vpop.xlane.xlu1 %870  ;;  %1714 = vmax.xlane.f32.xlu0 %v1713_v63  ;;  %v1710_v4 = vsel %vm856_vm2, %v7425_v11, -inf  ;;  %v6165_v63 = vunpack.i.l.bf16 %v7374_v36 }
 0x325   :  { %v883_v12 = vsub.f32 %v7349_v23, %v865_v42  ;;  %v885_v14 = vsub.f32 %v7355_v45, %v871_v16 }
 0x326   :  { %v7431_v43 = vpop.f32.mrb[26].mxu0 }
 0x327   :  { %v893_v31 = vmul.f32 1.442695, %v883_v12  ;;  %v897_v2 = vmul.f32 1.442695, %v885_v14  ;;  %v7433_v34 = vpop.f32.mrb[27].mxu0 }
 0x328   :  { %v874_v62 = vpop.xlane.xlu0 %873  ;;  %v877_v0 = vpop.xlane.xlu1 %876  ;;  %1711 = vmax.xlane.f32.xlu0 %v1710_v4  ;;  %v5815_v4 = vpack.c.bf16 %v6161_v35, %v6160_v3 }
 0x329   :  { %6356 = vpow2.f32 %v893_v31  ;;  %v886_v23 = vsub.f32 %v7353_v44, %v874_v62  ;;  %v887_v45 = vsub.f32 %v7363_v21, %v877_v0  ;;  %v6171_v44 = vunpack.i.h.bf16 %v7382_v59 }
 0x32a   :  { %6358 = vpow2.f32 %v895_v6  ;;  %v7441_v38 = vpop.f32.mrb[28].mxu0  ;;  %v6170_v21 = vunpack.i.l.bf16 %v7382_v59  ;;  %v5819_v6 = vpack.c.bf16 %v6166_v50, %v6165_v63  ;;  %v6176_v59 = vunpack.i.h.bf16 %v7416_v7 }
 0x32b   :  { %v7443_v42 = vpop.eup %6352  ;;  %6360 = vpow2.f32 %v897_v2  ;;  %v899_v16 = vmul.f32 1.442695, %v886_v23  ;;  %v901_v12 = vmul.f32 1.442695, %v887_v45  ;;  %v7445_v14 = vpop.f32.mrb[29].mxu0  ;;  %v6175_v45 = vunpack.i.l.bf16 %v7416_v7 }
 0x32c   :  { %8733 = vst [vmem:[#allocation36_spill] sm:$0xff] %v7443_v42  ;;  %v7447_v31 = vpop.eup %6354  ;;  %5191 = vmatprep.mubr.msk.f32.mxu1 %vm856_vm2, %v7443_v42  ;;  %v880_v62 = vpop.xlane.xlu0 %879  ;;  %v5823_v3 = vpack.c.bf16 %v6171_v44, %v6170_v21 }
 0x32d   :  { %8734 = vst [vmem:[#allocation37_spill] sm:$0xff] %v7447_v31  ;;  %6362 = vpow2.f32 %v899_v16  ;;  %v888_v0 = vsub.f32 %v7361_v29, %v880_v62  ;;  %5192 = vmatmul.mubr.msk.f32.vlgmr.msra.gmra.mrb[40].mxu1 %vm856_vm2, %v7447_v31  ;;  %v7481_v16 = vpack.c.bf16 %v6176_v59, %v6175_v45  ;;  %v1725_v62 = vsel %vm856_vm2, %v7441_v38, -inf }
 0x32e   :  { %5814 = vmatpush3.bf16.msra.mxu1 %v7371_v15  ;;  %v7456_v2 = vpop.f32.mrb[30].mxu0  ;;  %6364 = vpow2.f32 %v901_v12  ;;  %v1716_v12 = vsel %vm856_vm2, %v7433_v34, -inf }
 0x32f   :  { %v903_v36 = vmul.f32 1.442695, %v888_v0  ;;  %5816 = vmatprep.subr.bf16.mxu1 %v5815_v4  ;;  %v7459_v35 = vpop.f32.mrb[31].mxu0 }
 0x330   :  { %v1728_v0 = vsel %vm856_vm2, %v7459_v35, -inf }
 0x331   :  { %6366 = vpow2.f32 %v903_v36 }
 0x332   :  { %5818 = vmatpush3.bf16.msra.mxu1 %v5815_v4  ;;  %v1719_v4 = vsel %vm856_vm2, %v7431_v43, -inf }
 0x333   :  { %v7461_v29 = vpop.eup %6356  ;;  %5820 = vmatprep.subr.bf16.mxu1 %v5819_v6 }
 0x334   :  { %8735 = vst [vmem:[#allocation38_spill] sm:$0xff] %v7461_v29  ;;  %v7463_v23 = vpop.eup %6358  ;;  %5194 = vmatprep.mubr.msk.f32.mxu1 %vm856_vm2, %v7461_v29 }
 0x335   :  { %8736 = vst [vmem:[#allocation39_spill] sm:$0xff] %v7463_v23  ;;  %v7467_v15 = vpop.eup %6360  ;;  %5195 = vmatmul.mubr.msk.f32.gmra.mrb[42].mxu1 %vm856_vm2, %v7463_v23 }
 0x336   :  { %8737 = vst [vmem:[#allocation40_spill] sm:$0xff] %v7467_v15  ;;  %5822 = vmatpush3.bf16.msra.mxu1 %v5819_v6  ;;  %5197 = vmatprep.mubr.msk.f32.mxu1 %vm856_vm2, %v7467_v15 }
 0x337   :  { %v7475_v50 = vpop.eup %6362  ;;  %5824 = vmatprep.subr.bf16.mxu1 %v5823_v3 }
 0x338   :  { %8738 = vst [vmem:[#allocation41_spill] sm:$0xff] %v7475_v50  ;;  %v7477_v63 = vpop.eup %6364 }
 0x339   :  { %8739 = vst [vmem:[#allocation42_spill] sm:$0xff] %v7477_v63  ;;  %5198 = vmatmul.mubr.msk.f32.gmra.mrb[44].mxu1 %vm856_vm2, %v7475_v50 }
 0x33a   :  { %5826 = vmatpush3.bf16.msra.mxu1 %v5823_v3  ;;  %5200 = vmatprep.mubr.msk.f32.mxu1 %vm856_vm2, %v7477_v63 }
 0x33b   :  { %v7485_v7 = vpop.eup %6366  ;;  %5852 = vmatprep.subr.bf16.mxu1 %v7481_v16 }
 0x33c   :  { %8740 = vst [vmem:[#allocation43_spill] sm:$0xff] %v7485_v7 }
 0x33d   :  { %5201 = vmatmul.mubr.msk.f32.gmra.mrb[46].mxu1 %vm856_vm2, %v7485_v7 }
 0x33e   :  { %6193 = vrot.lane.b32.xlu0 %v7056_v26, %s6805_s8  ;;  %v1722_v26 = vsel %vm856_vm2, %v7445_v14, -inf }
 0x346   :  { %1717 = vmax.xlane.f32.xlu1 %v1716_v12 }
 0x357   :  { %6208 = vrot.lane.b32.xlu1 %v7088_v47, %s6805_s8  ;;  %v1731_v47 = vsel %vm856_vm2, %v7456_v2, -inf }
 0x35d   :  { %1720 = vmax.xlane.f32.xlu0 %v1719_v4  ;;  %v6180_v4 = vunpack.i.l.bf16 %v7394_v55 }
 0x361   :  { %1726 = vmax.xlane.f32.xlu0 %v1725_v62 }
 0x377   :  { %6203 = vrot.lane.b32.xlu0 %v7076_v41, %s6805_s8 }
 0x37b   :  { %1992 = vrot.lane.b32.xlu0 %v7001_v52, %s6805_s8  ;;  %1723 = vmax.xlane.f32.xlu1 %v1722_v26 }
 0x37f   :  { %1996 = vrot.lane.b32.xlu0 %v7116_v53, %s6805_s8  ;;  %1732 = vmax.xlane.f32.xlu1 %v1731_v47 }
 0x383   :  { %2000 = vrot.lane.b32.xlu0 %v7118_v61, %s6805_s8  ;;  %1729 = vmax.xlane.f32.xlu1 %v1728_v0 }
 0x387   :  { %2004 = vrot.lane.b32.xlu0 %v7128_v54, %s6805_s8 }
 0x38b   :  { %6213 = vrot.lane.b32.xlu0 %v7184_v13, %s6805_s8 }
 0x391   :  { %v1256_v52 = vpop.xlane.xlu0 %1255 }
 0x392   :  { %v1276_v41 = vsub.f32 %v7376_v17, %v1256_v52  ;;  %v1253_v44 = vpop.xlane.xlu1 %1252 }
 0x393   :  { %v1275_v53 = vsub.f32 %v7378_v19, %v1253_v44 }
 0x394   :  { %v1285_v21 = vmul.f32 1.442695, %v1276_v41  ;;  %1994 = vrot.lane.b32.xlu1 %v7084_v46, %s6805_s8  ;;  %v6190_v41 = vunpack.i.l.bf16 %v7414_v56 }
 0x395   :  { %v1283_v36 = vmul.f32 1.442695, %v1275_v53  ;;  %v1262_v6 = vpop.xlane.xlu0 %1261 }
 0x396   :  { %v1278_v61 = vsub.f32 %v7386_v18, %v1262_v6  ;;  %v1259_v3 = vpop.xlane.xlu1 %1258 }
 0x397   :  { %6368 = vpow2.f32 %v1283_v36  ;;  %v1277_v54 = vsub.f32 %v7388_v27, %v1259_v3  ;;  %v6181_v27 = vunpack.i.h.bf16 %v7394_v55  ;;  %v6186_v55 = vunpack.i.h.bf16 %v7408_v40 }
 0x398   :  { %6370 = vpow2.f32 %v1285_v21  ;;  %v1289_v13 = vmul.f32 1.442695, %v1278_v61  ;;  %1998 = vrot.lane.b32.xlu1 %v7104_v51, %s6805_s8 }
 0x399   :  { %v1287_v17 = vmul.f32 1.442695, %v1277_v54  ;;  %v1268_v59 = vpop.xlane.xlu0 %1267 }
 0x39a   :  { %v1280_v19 = vsub.f32 %v7396_v58, %v1268_v59 }
 0x39b   :  { %6372 = vpow2.f32 %v1287_v17 }
 0x39c   :  { %6374 = vpow2.f32 %v1289_v13  ;;  %2002 = vrot.lane.b32.xlu1 %v7135_v57, %s6805_s8  ;;  %v1293_v46 = vmul.f32 1.442695, %v1280_v19 }
 0x39d   :  { %v1265_v18 = vpop.xlane.xlu0 %1264 }
 0x39e   :  { %v1279_v45 = vsub.f32 %v7398_v33, %v1265_v18  ;;  %v1271_v12 = vpop.xlane.xlu1 %1270  ;;  %6376 = vpow2.f32 %v1293_v46 }
 0x39f   :  { %v1281_v51 = vsub.f32 %v7404_v24, %v1271_v12  ;;  %v6185_v24 = vunpack.i.l.bf16 %v7408_v40  ;;  %v6191_v40 = vunpack.i.h.bf16 %v7414_v56 }
 0x3a0   :  { %v1291_v62 = vmul.f32 1.442695, %v1279_v45  ;;  %2006 = vrot.lane.b32.xlu1 %v7144_v48, %s6805_s8  ;;  %v5855_v48 = vpack.c.bf16 %v6181_v27, %v6180_v4 }
 0x3a1   :  { %v7535_v58 = vpop.eup %6368  ;;  %v1295_v26 = vmul.f32 1.442695, %v1281_v51  ;;  %v1274_v57 = vpop.xlane.xlu0 %1273  ;;  %v5863_v44 = vpack.c.bf16 %v6191_v40, %v6190_v41 }
 0x3a2   :  { %v7537_v47 = vpop.eup %6370  ;;  %6378 = vpow2.f32 %v1291_v62  ;;  %v1282_v33 = vsub.f32 %v7402_v1, %v1274_v57  ;;  %5247 = vmatprep.mubr.msk.f32.mxu1 %vm856_vm2, %v7535_v58  ;;  %v6199_v18 = vpop.permute.xlu1 %6198 }
 0x3a3   :  { %6380 = vpow2.f32 %v1295_v26  ;;  %5248 = vmatmul.mubr.msk.f32.vlgmr.msra.gmra.mrb[48].mxu1 %vm856_vm2, %v7537_v47  ;;  %v6201_v45 = vunpack.i.h.bf16 %v6199_v18  ;;  %v6200_v12 = vunpack.i.l.bf16 %v6199_v18 }
 0x3a4   :  { %v1297_v0 = vmul.f32 1.442695, %v1282_v33  ;;  %5854 = vmatpush3.bf16.msra.mxu1 %v7481_v16  ;;  %6218 = vrot.lane.b32.xlu1 %v7205_v28, %s6805_s8  ;;  %v5859_v16 = vpack.c.bf16 %v6186_v55, %v6185_v24 }
 0x3a5   :  { %v7549_v52 = vpop.eup %6372  ;;  %5856 = vmatprep.subr.bf16.mxu1 %v5855_v48 }
 0x3a6   :  { %v7551_v1 = vpop.eup %6374  ;;  %6382 = vpow2.f32 %v1297_v0  ;;  %5250 = vmatprep.mubr.msk.f32.mxu1 %vm856_vm2, %v7549_v52 }
 0x3a7   :  { %5251 = vmatmul.mubr.msk.f32.gmra.mrb[50].mxu1 %vm856_vm2, %v7551_v1 }
 0x3a8   :  { %5858 = vmatpush3.bf16.msra.mxu1 %v5855_v48  ;;  %v7559_v28 = vpop.eup %6376 }
 0x3a9   :  { %5860 = vmatprep.subr.bf16.mxu1 %v5859_v16 }
 0x3ac   :  { %v7561_v53 = vpop.eup %6378  ;;  %5862 = vmatpush3.bf16.msra.mxu1 %v5859_v16 }
 0x3ad   :  { %v7563_v21 = vpop.eup %6380  ;;  %5864 = vmatprep.subr.bf16.mxu1 %v5863_v44  ;;  %5253 = vmatprep.mubr.msk.f32.mxu1 %vm856_vm2, %v7561_v53 }
 0x3ae   :  { %5254 = vmatmul.mubr.msk.f32.gmra.mrb[52].mxu1 %vm856_vm2, %v7559_v28 }
 0x3af   :  { %5256 = vmatprep.mubr.msk.f32.mxu1 %vm856_vm2, %v7563_v21 }
 0x3b0   :  { %v7571_v56 = vpop.eup %6382  ;;  %5866 = vmatpush3.bf16.msra.mxu1 %v5863_v44 }
 0x3b1   :  { %v1715_v36 = vpop.xlane.xlu0 %1714 }
 0x3b2   :  { %5257 = vmatmul.mubr.msk.f32.gmra.mrb[54].mxu1 %vm856_vm2, %v7571_v56  ;;  %v1735_v6 = vsub.f32 %v7421_v8, %v1715_v36 }
 0x3b4   :  { %v1744_v54 = vmul.f32 1.442695, %v1735_v6 }
 0x3b5   :  { %v1712_v61 = vpop.xlane.xlu0 %1711 }
 0x3b6   :  { %v1734_v3 = vsub.f32 %v7425_v11, %v1712_v61  ;;  %v5873_v11 = vpack.c.bf16 %v6201_v45, %v6200_v12 }
 0x3b8   :  { %v1742_v13 = vmul.f32 1.442695, %v1734_v3 }
 0x3b9   :  { %v6194_v17 = vpop.permute.xlu0 %6193 }
 0x3ba   :  { %6384 = vpow2.f32 %v1742_v13  ;;  %v6196_v59 = vunpack.i.h.bf16 %v6194_v17  ;;  %v6195_v19 = vunpack.i.l.bf16 %v6194_v17 }
 0x3bb   :  { %6386 = vpow2.f32 %v1744_v54 }
 0x3bc   :  { %v5867_v46 = vpack.c.bf16 %v6196_v59, %v6195_v19 }
 0x3be   :  { %5869 = vmatprep.subr.msk.bf16.mxu1 %vm7052_vm1, %v5867_v46 }
 0x3c4   :  { %v7579_v27 = vpop.eup %6384 }
 0x3c5   :  { %v7581_v8 = vpop.eup %6386  ;;  %5303 = vmatprep.mubr.msk.f32.mxu1 %vm856_vm2, %v7579_v27 }
 0x3c6   :  { %5304 = vmatmul.mubr.msk.f32.vlgmr.msra.gmra.mrb[56].mxu1 %vm856_vm2, %v7581_v8 }
 0x3c7   :  { %5872 = vmatpush3.bf16.xpose.msk.msra.mxu1 %vm7052_vm1, %v5867_v46 }
 0x3c8   :  { %5875 = vmatprep.subr.msk.bf16.mxu1 %vm7052_vm1, %v5873_v11 }
 0x3cf   :  { %5878 = vmatpush3.bf16.xpose.msk.msra.mxu1 %vm7052_vm1, %v5873_v11 }
 0x3d3   :  { %v1718_v4 = vpop.xlane.xlu1 %1717 }
 0x3d4   :  { %v1736_v51 = vsub.f32 %v7433_v34, %v1718_v4 }
 0x3d6   :  { %v1746_v62 = vmul.f32 1.442695, %v1736_v51 }
 0x3d7   :  { %v6209_v48 = vpop.permute.xlu1 %6208 }
 0x3d8   :  { %6388 = vpow2.f32 %v1746_v62  ;;  %v6211_v40 = vunpack.i.h.bf16 %v6209_v48  ;;  %v6210_v41 = vunpack.i.l.bf16 %v6209_v48 }
 0x3da   :  { %v5885_v6 = vpack.c.bf16 %v6211_v40, %v6210_v41 }
 0x3e2   :  { %v7594_v26 = vpop.eup %6388 }
 0x3e3   :  { %5306 = vmatprep.mubr.msk.f32.mxu1 %vm856_vm2, %v7594_v26 }
 0x3ea   :  { %v1721_v57 = vpop.xlane.xlu0 %1720 }
 0x3eb   :  { %v1737_v33 = vsub.f32 %v7431_v43, %v1721_v57 }
 0x3ed   :  { %v1748_v55 = vmul.f32 1.442695, %v1737_v33 }
 0x3ee   :  { %v1727_v24 = vpop.xlane.xlu0 %1726 }
 0x3ef   :  { %6390 = vpow2.f32 %v1748_v55  ;;  %v1739_v59 = vsub.f32 %v7441_v38, %v1727_v24 }
 0x3f1   :  { %v1752_v62 = vmul.f32 1.442695, %v1739_v59 }
 0x3f2   :  { %v6204_v0 = vpop.permute.xlu0 %6203 }
 0x3f3   :  { %v6206_v16 = vunpack.i.h.bf16 %v6204_v0  ;;  %v6205_v44 = vunpack.i.l.bf16 %v6204_v0 }
 0x3f5   :  { %v5879_v34 = vpack.c.bf16 %v6206_v16, %v6205_v44 }
 0x3f6   :  { %v1993_v36 = vpop.permute.xlu0 %1992 }
 0x3f7   :  { %5881 = vmatprep.subr.msk.bf16.mxu1 %vm7052_vm1, %v5879_v34 }
 0x3f8   :  { %5884 = vmatpush3.bf16.xpose.msk.msra.mxu1 %vm7052_vm1, %v5879_v34 }
 0x3f9   :  { %v7603_v61 = vpop.eup %6390  ;;  %5887 = vmatprep.subr.msk.bf16.mxu1 %vm7052_vm1, %v5885_v6 }
 0x3fa   :  { %v1997_v43 = vpop.permute.xlu0 %1996  ;;  %5307 = vmatmul.mubr.msk.f32.gmra.mrb[58].mxu1 %vm856_vm2, %v7603_v61 }
 0x3fe   :  { %v2001_v3 = vpop.permute.xlu0 %2000 }
 0x400   :  { %v7609_v54 = vpop.f32.mrb[40].mxu1  ;;  %5890 = vmatpush3.bf16.xpose.msk.msra.mxu1 %vm7052_vm1, %v5885_v6 }
 0x401   :  { %8741 = vst [vmem:[#allocation44_spill] sm:$0xff] %v7609_v54  ;;  %v7613_v13 = vpop.f32.mrb[41].mxu1  ;;  %5932 = vmatprep.subr.bf16.mxu1 %v7315_v60 }
 0x402   :  { %8742 = vst [vmem:[#allocation45_spill] sm:$0xff] %v7613_v13  ;;  %v2005_v17 = vpop.permute.xlu0 %2004 }
 0x406   :  { %v6214_v19 = vpop.permute.xlu0 %6213 }
 0x407   :  { %v6216_v46 = vunpack.i.h.bf16 %v6214_v19  ;;  %v6215_v18 = vunpack.i.l.bf16 %v6214_v19 }
 0x408   :  { %v7617_v45 = vpop.f32.mrb[42].mxu1  ;;  %v1724_v12 = vpop.xlane.xlu1 %1723 }
 0x409   :  { %8743 = vst [vmem:[#allocation46_spill] sm:$0xff] %v7617_v45  ;;  %v7619_v11 = vpop.f32.mrb[43].mxu1  ;;  %v1738_v4 = vsub.f32 %v7445_v14, %v1724_v12  ;;  %v5891_v51 = vpack.c.bf16 %v6216_v46, %v6215_v18 }
 0x40a   :  { %8744 = vst [vmem:[#allocation47_spill] sm:$0xff] %v7619_v11 }
 0x40b   :  { %v1750_v57 = vmul.f32 1.442695, %v1738_v4  ;;  %5892 = vmatprep.subr.bf16.mxu0 %v5891_v51 }
 0x40c   :  { %v7622_v33 = vpop.f32.mrb[44].mxu1  ;;  %5894 = vmatpush3.bf16.msra.mxu0 %v5891_v51  ;;  %v1733_v55 = vpop.xlane.xlu1 %1732 }
 0x40d   :  { %8745 = vst [vmem:[#allocation48_spill] sm:$0xff] %v7622_v33  ;;  %6392 = vpow2.f32 %v1750_v57  ;;  %v7624_v38 = vpop.f32.mrb[45].mxu1  ;;  %v1741_v24 = vsub.f32 %v7456_v2, %v1733_v55 }
 0x40e   :  { %8746 = vst [vmem:[#allocation49_spill] sm:$0xff] %v7624_v38  ;;  %6394 = vpow2.f32 %v1752_v62 }
 0x40f   :  { %v1756_v41 = vmul.f32 1.442695, %v1741_v24 }
 0x410   :  { %v7627_v48 = vpop.f32.mrb[46].mxu1  ;;  %v1730_v0 = vpop.xlane.xlu1 %1729 }
 0x411   :  { %8747 = vst [vmem:[#allocation50_spill] sm:$0xff] %v7627_v48  ;;  %v7629_v40 = vpop.f32.mrb[47].mxu1  ;;  %v1740_v14 = vsub.f32 %v7459_v35, %v1730_v0 }
 0x412   :  { %8748 = vst [vmem:[#allocation51_spill] sm:$0xff] %v7629_v40 }
 0x413   :  { %v1754_v16 = vmul.f32 1.442695, %v1740_v14 }
 0x414   :  { %v1995_v44 = vpop.permute.xlu1 %1994 }
 0x415   :  { %6396 = vpow2.f32 %v1754_v16 }
 0x416   :  { %6398 = vpow2.f32 %v1756_v41 }
 0x417   :  { %v7632_v34 = vpop.eup %6392 }
 0x418   :  { %v7634_v6 = vpop.eup %6394  ;;  %5309 = vmatprep.mubr.msk.f32.mxu1 %vm856_vm2, %v7632_v34  ;;  %v1999_v2 = vpop.permute.xlu1 %1998 }
 0x419   :  { %5310 = vmatmul.mubr.msk.f32.gmra.mrb[60].mxu1 %vm856_vm2, %v7634_v6 }
 0x41c   :  { %v2003_v59 = vpop.permute.xlu1 %2002 }
 0x41f   :  { %v7640_v19 = vpop.eup %6396 }
 0x420   :  { %v7642_v35 = vpop.eup %6398  ;;  %5312 = vmatprep.mubr.msk.f32.mxu1 %vm856_vm2, %v7640_v19  ;;  %v2007_v46 = vpop.permute.xlu1 %2006 }
 0x421   :  { %8749 = vst [vmem:[#allocation52_spill] sm:$0xff] %v7642_v35  ;;  %5313 = vmatmul.mubr.msk.f32.gmra.mrb[62].mxu1 %vm856_vm2, %v7642_v35 }
 0x422   :  { %5331 = vmatprep.mubr.msk.f32.mxu1 %vm702_vm0, %v1993_v36 }
 0x424   :  { %v6219_v18 = vpop.permute.xlu1 %6218 }
 0x425   :  { %v6221_v12 = vunpack.i.h.bf16 %v6219_v18  ;;  %v6220_v4 = vunpack.i.l.bf16 %v6219_v18  ;;  %5332 = vmatmul.mubr.msk.f32.vlgmr.msra.gmra.mrb[64].mxu1 %vm702_vm0, %v1995_v44 }
 0x426   :  { %5934 = vmatpush3.bf16.msra.mxu1 %v7315_v60  ;;  %5334 = vmatprep.mubr.msk.f32.mxu1 %vm702_vm0, %v1997_v43 }
 0x427   :  { %5936 = vmatprep.subr.bf16.mxu1 %v7325_v9  ;;  %v5895_v51 = vpack.c.bf16 %v6221_v12, %v6220_v4 }
 0x429   :  { %5335 = vmatmul.mubr.msk.f32.gmra.mrb[66].mxu1 %vm702_vm0, %v1999_v2  ;;  %5896 = vmatprep.subr.bf16.mxu0 %v5895_v51 }
 0x42a   :  { %5938 = vmatpush3.bf16.msra.mxu1 %v7325_v9  ;;  %5337 = vmatprep.mubr.msk.f32.mxu1 %vm702_vm0, %v2001_v3 }
 0x42b   :  { %5898 = vmatpush3.bf16.msra.mxu0 %v5895_v51  ;;  %5940 = vmatprep.subr.bf16.mxu1 %v7331_v37 }
 0x42d   :  { %5338 = vmatmul.mubr.msk.f32.gmra.mrb[68].mxu1 %vm702_vm0, %v2003_v59 }
 0x42e   :  { %5942 = vmatpush3.bf16.msra.mxu1 %v7331_v37  ;;  %5340 = vmatprep.mubr.msk.f32.mxu1 %vm702_vm0, %v2005_v17 }
 0x42f   :  { %5944 = vmatprep.subr.bf16.mxu1 %v7335_v39 }
 0x431   :  { %5341 = vmatmul.mubr.msk.f32.gmra.mrb[70].mxu1 %vm702_vm0, %v2007_v46 }
 0x432   :  { %5946 = vmatpush3.bf16.msra.mxu1 %v7335_v39 }
 0x476   :  { %v7663_v60 = vpop.f32.mrb[48].mxu1 }
 0x477   :  { %8750 = vst [vmem:[#allocation53_spill] sm:$0xff] %v7663_v60  ;;  %v7665_v9 = vpop.f32.mrb[49].mxu1 }
 0x478   :  { %8751 = vst [vmem:[#allocation54_spill] sm:$0xff] %v7665_v9 }
 0x47a   :  { %v7667_v36 = vpop.f32.mrb[50].mxu1 }
 0x47b   :  { %8752 = vst [vmem:[#allocation55_spill] sm:$0xff] %v7667_v36  ;;  %v7669_v43 = vpop.f32.mrb[51].mxu1 }
 0x47c   :  { %8753 = vst [vmem:[#allocation56_spill] sm:$0xff] %v7669_v43  ;;  %v8785_v43 = vld [vmem:[#allocation30_spill] sm:$0xff] }
 0x481   :  { %v7671_v3 = vpop.f32.mrb[52].mxu1 }
 0x482   :  { %8754 = vst [vmem:[#allocation57_spill] sm:$0xff] %v7671_v3  ;;  %v7673_v62 = vpop.f32.mrb[53].mxu1 }
 0x483   :  { %8755 = vst [vmem:[#allocation58_spill] sm:$0xff] %v7673_v62 }
 0x485   :  { %v7675_v37 = vpop.f32.mrb[54].mxu1 }
 0x486   :  { %8756 = vst [vmem:[#allocation59_spill] sm:$0xff] %v7675_v37  ;;  %v7677_v17 = vpop.f32.mrb[55].mxu1 }
 0x487   :  { %8757 = vst [vmem:[#allocation60_spill] sm:$0xff] %v7677_v17 }
 0x499   :  { %v7679_v57 = vpop.f32.mrb[56].mxu1 }
 0x49a   :  { %8758 = vst [vmem:[#allocation61_spill] sm:$0xff] %v7679_v57  ;;  %v7681_v55 = vpop.f32.mrb[57].mxu1 }
 0x49b   :  { %8759 = vst [vmem:[#allocation62_spill] sm:$0xff] %v7681_v55 }
 0x4cd   :  { %v7683_v39 = vpop.f32.mrb[58].mxu1 }
 0x4ce   :  { %8760 = vst [vmem:[#allocation63_spill] sm:$0xff] %v7683_v39  ;;  %v7685_v24 = vpop.f32.mrb[59].mxu1  ;;  %v8783_v39 = vld [vmem:[#allocation29_spill] sm:$0xff] }
 0x4cf   :  { %8761 = vst [vmem:[#allocation64_spill] sm:$0xff] %v7685_v24 }
 0x4ec   :  { %v7687_v0 = vpop.f32.mrb[60].mxu1 }
 0x4ed   :  { %8762 = vst [vmem:[#allocation65_spill] sm:$0xff] %v7687_v0  ;;  %v7689_v14 = vpop.f32.mrb[61].mxu1 }
 0x4ee   :  { %8763 = vst [vmem:[#allocation66_spill] sm:$0xff] %v7689_v14 }
 0x4f4   :  { %v7691_v41 = vpop.f32.mrb[62].mxu1 }
 0x4f5   :  { %8764 = vst [vmem:[#allocation67_spill] sm:$0xff] %v7691_v41  ;;  %v7693_v16 = vpop.f32.mrb[63].mxu1 }
 0x4f6   :  { %8765 = vst [vmem:[#allocation68_spill] sm:$0xff] %v7693_v16 }
 0x4f8   :  { %v5333_v44 = vpop.f32.mrb[64].mxu1 }
 0x4f9   :  { %v2122_v2 = vpop.f32.mrb[65].mxu1  ;;  %v2164_v59 = vsel %vm856_vm2, %v5333_v44, -inf }
 0x4fa   :  { %2165 = vmax.xlane.f32.xlu1 %v2164_v59  ;;  %v2161_v46 = vsel %vm856_vm2, %v2122_v2, -inf }
 0x4fb   :  { %2162 = vmax.xlane.f32.xlu0 %v2161_v46 }
 0x4fc   :  { %v5336_v18 = vpop.f32.mrb[66].mxu1 }
 0x4fd   :  { %v2132_v12 = vpop.f32.mrb[67].mxu1  ;;  %v2170_v59 = vsel %vm856_vm2, %v5336_v18, -inf }
 0x4fe   :  { %v2167_v46 = vsel %vm856_vm2, %v2132_v12, -inf }
 0x500   :  { %v7697_v4 = vpop.f32.mrb[68].mxu1 }
 0x501   :  { %v2142_v51 = vpop.f32.mrb[69].mxu1  ;;  %v2176_v33 = vsel %vm856_vm2, %v7697_v4, -inf }
 0x502   :  { %v2173_v16 = vsel %vm856_vm2, %v2142_v51, -inf }
 0x504   :  { %v7699_v37 = vpop.f32.mrb[70].mxu1 }
 0x505   :  { %v7701_v48 = vpop.f32.mrb[71].mxu1 }
 0x506   :  { %v2179_v41 = vsel %vm856_vm2, %v7701_v48, -inf }
 0x50b   :  { %6228 = vrot.lane.b32.xlu1 %v7201_v25, %s6805_s8 }
 0x511   :  { %6223 = vrot.lane.b32.xlu0 %v7193_v20, %s6805_s8  ;;  %v2182_v20 = vsel %vm856_vm2, %v7699_v37, -inf }
 0x52f   :  { %2171 = vmax.xlane.f32.xlu1 %v2170_v59 }
 0x530   :  { %2168 = vmax.xlane.f32.xlu0 %v2167_v46 }
 0x533   :  { %2180 = vmax.xlane.f32.xlu1 %v2179_v41 }
 0x534   :  { %2174 = vmax.xlane.f32.xlu0 %v2173_v16 }
 0x538   :  { %2177 = vmax.xlane.f32.xlu0 %v2176_v33 }
 0x53c   :  { %2183 = vmax.xlane.f32.xlu0 %v2182_v20 }
 0x544   :  { %6238 = vrot.lane.b32.xlu1 %v7299_v49, %s6803_s6 }
 0x587   :  { %v2166_v25 = vpop.xlane.xlu1 %2165 }
 0x588   :  { %v2186_v59 = vsub.f32 %v5333_v44, %v2166_v25  ;;  %v2163_v46 = vpop.xlane.xlu0 %2162 }
 0x589   :  { %v2185_v40 = vsub.f32 %v2122_v2, %v2163_v46 }
 0x58a   :  { %v2195_v45 = vmul.f32 1.442695, %v2186_v59 }
 0x58b   :  { %v2193_v41 = vmul.f32 1.442695, %v2185_v40  ;;  %v6229_v38 = vpop.permute.xlu1 %6228 }
 0x58c   :  { %v6231_v54 = vunpack.i.h.bf16 %v6229_v38  ;;  %v6224_v16 = vpop.permute.xlu0 %6223  ;;  %v6230_v11 = vunpack.i.l.bf16 %v6229_v38 }
 0x58d   :  { %6400 = vpow2.f32 %v2193_v41  ;;  %v6226_v13 = vunpack.i.h.bf16 %v6224_v16  ;;  %v6225_v33 = vunpack.i.l.bf16 %v6224_v16 }
 0x58e   :  { %6402 = vpow2.f32 %v2195_v45  ;;  %v5903_v20 = vpack.c.bf16 %v6231_v54, %v6230_v11 }
 0x58f   :  { %v5899_v0 = vpack.c.bf16 %v6226_v13, %v6225_v33 }
 0x591   :  { %5900 = vmatprep.subr.bf16.mxu0 %v5899_v0 }
 0x592   :  { %5902 = vmatpush3.bf16.msra.mxu0 %v5899_v0 }
 0x593   :  { %5904 = vmatprep.subr.bf16.mxu0 %v5903_v20 }
 0x596   :  { %5906 = vmatpush3.bf16.msra.mxu0 %v5903_v20  ;;  %v8767_v20 = vld [vmem:[#allocation22_spill] sm:$0xff] }
 0x597   :  { %v7718_v14 = vpop.eup %6400  ;;  %5909 = vmatprep.subr.msk.bf16.mxu0 %vm7052_vm1, %v7291_v10 }
 0x598   :  { %v7723_v40 = vpop.eup %6402  ;;  %5359 = vmatprep.mubr.msk.f32.mxu0 %vm856_vm2, %v7718_v14 }
 0x599   :  { %5360 = vmatmul.mubr.msk.f32.vlgmr.msra.gmra.mrb[32].mxu0 %vm856_vm2, %v7723_v40 }
 0x59f   :  { %5912 = vmatpush3.bf16.xpose.msk.msra.mxu0 %vm7052_vm1, %v7291_v10 }
 0x5a0   :  { %5915 = vmatprep.subr.msk.bf16.mxu0 %vm7052_vm1, %v7301_v30 }
 0x5a7   :  { %5918 = vmatpush3.bf16.xpose.msk.msra.mxu0 %vm7052_vm1, %v7301_v30 }
 0x5a8   :  { %5921 = vmatprep.subr.msk.bf16.mxu0 %vm7052_vm1, %v7309_v32 }
 0x5af   :  { %5924 = vmatpush3.bf16.xpose.msk.msra.mxu0 %vm7052_vm1, %v7309_v32 }
 0x5b0   :  { %5927 = vmatprep.subr.msk.bf16.mxu0 %vm7052_vm1, %v7317_v5 }
 0x5b7   :  { %5930 = vmatpush3.bf16.xpose.msk.msra.mxu0 %vm7052_vm1, %v7317_v5 }
 0x5bc   :  { %v2172_v10 = vpop.xlane.xlu1 %2171 }
 0x5bd   :  { %v2188_v54 = vsub.f32 %v5336_v18, %v2172_v10  ;;  %v2169_v13 = vpop.xlane.xlu0 %2168  ;;  %v7776_v10 = vmul.f32 0.17677669, %v8767_v20 }
 0x5be   :  { %v2187_v30 = vsub.f32 %v2132_v12, %v2169_v13 }
 0x5bf   :  { %v2199_v45 = vmul.f32 1.442695, %v2188_v54  ;;  %v8768_v54 = vld [vmem:[#allocation21_spill] sm:$0xff] }
 0x5c0   :  { %v2197_v11 = vmul.f32 1.442695, %v2187_v30  ;;  %v2181_v38 = vpop.xlane.xlu1 %2180  ;;  %v7783_v13 = vmul.f32 0.17677669, %v8768_v54  ;;  %v8769_v30 = vld [vmem:[#allocation24_spill] sm:$0xff] }
 0x5c1   :  { %v2175_v0 = vpop.xlane.xlu0 %2174  ;;  %v2191_v32 = vsub.f32 %v7701_v48, %v2181_v38 }
 0x5c2   :  { %6404 = vpow2.f32 %v2197_v11  ;;  %v2189_v44 = vsub.f32 %v2142_v51, %v2175_v0  ;;  %v8770_v11 = vld [vmem:[#allocation23_spill] sm:$0xff]  ;;  %v8771_v0 = vld [vmem:[#allocation26_spill] sm:$0xff] }
 0x5c3   :  { %6406 = vpow2.f32 %v2199_v45  ;;  %v2205_v46 = vmul.f32 1.442695, %v2191_v32  ;;  %v7786_v45 = vmul.f32 0.17677669, %v8769_v30  ;;  %v7793_v38 = vmul.f32 0.17677669, %v8770_v11 }
 0x5c4   :  { %v2201_v2 = vmul.f32 1.442695, %v2189_v44  ;;  %v7796_v44 = vmul.f32 0.17677669, %v8771_v0  ;;  %v8772_v32 = vld [vmem:[#allocation25_spill] sm:$0xff] }
 0x5c5   :  { %v2178_v25 = vpop.xlane.xlu0 %2177 }
 0x5c6   :  { %6408 = vpow2.f32 %v2201_v2  ;;  %v2190_v59 = vsub.f32 %v7697_v4, %v2178_v25  ;;  %v7803_v2 = vmul.f32 0.17677669, %v8772_v32  ;;  %v8773_v25 = vld [vmem:[#allocation28_spill] sm:$0xff] }
 0x5c8   :  { %v2203_v5 = vmul.f32 1.442695, %v2190_v59  ;;  %v7806_v59 = vmul.f32 0.17677669, %v8773_v25 }
 0x5c9   :  { %v2184_v41 = vpop.xlane.xlu0 %2183 }
 0x5ca   :  { %6410 = vpow2.f32 %v2203_v5  ;;  %v2192_v18 = vsub.f32 %v7699_v37, %v2184_v41 }
 0x5cb   :  { %6412 = vpow2.f32 %v2205_v46  ;;  %v8774_v46 = vld [vmem:[#allocation27_spill] sm:$0xff] }
 0x5cc   :  { %v7753_v12 = vpop.eup %6404  ;;  %v2207_v16 = vmul.f32 1.442695, %v2192_v18  ;;  %v7813_v5 = vmul.f32 0.17677669, %v8774_v46 }
 0x5cd   :  { %v7755_v33 = vpop.eup %6406  ;;  %5362 = vmatprep.mubr.msk.f32.mxu0 %vm856_vm2, %v7753_v12 }
 0x5ce   :  { %6414 = vpow2.f32 %v2207_v16  ;;  %5363 = vmatmul.mubr.msk.f32.gmra.mrb[34].mxu0 %vm856_vm2, %v7755_v33 }
 0x5d0   :  { %v7761_v48 = vpop.eup %6408 }
 0x5d1   :  { %5365 = vmatprep.mubr.msk.f32.mxu0 %vm856_vm2, %v7761_v48 }
 0x5d4   :  { %v7765_v4 = vpop.eup %6410 }
 0x5d5   :  { %v7767_v37 = vpop.eup %6412  ;;  %5366 = vmatmul.mubr.msk.f32.gmra.mrb[36].mxu0 %vm856_vm2, %v7765_v4 }
 0x5d6   :  { %5368 = vmatprep.mubr.msk.f32.mxu0 %vm856_vm2, %v7767_v37 }
 0x5d8   :  { %v7773_v51 = vpop.eup %6414 }
 0x5d9   :  { %8766 = vst [vmem:[#allocation69_spill] sm:$0xff] %v7773_v51  ;;  %5369 = vmatmul.mubr.msk.f32.gmra.mrb[38].mxu0 %vm856_vm2, %v7773_v51 }
 0x5da   :  { %5387 = vmatprep.mubr.msk.f32.mxu0 %vm702_vm0, %v7776_v10 }
 0x5dd   :  { %5388 = vmatmul.mubr.msk.f32.vlgmr.msra.gmra.mrb[40].mxu0 %vm702_vm0, %v7783_v13 }
 0x5de   :  { %5390 = vmatprep.mubr.msk.f32.mxu0 %vm702_vm0, %v7786_v45 }
 0x5e1   :  { %5391 = vmatmul.mubr.msk.f32.gmra.mrb[42].mxu0 %vm702_vm0, %v7793_v38 }
 0x5e2   :  { %5393 = vmatprep.mubr.msk.f32.mxu0 %vm702_vm0, %v7796_v44 }
 0x5e5   :  { %5394 = vmatmul.mubr.msk.f32.gmra.mrb[44].mxu0 %vm702_vm0, %v7803_v2 }
 0x5e6   :  { %5396 = vmatprep.mubr.msk.f32.mxu0 %vm702_vm0, %v7806_v59 }
 0x5e9   :  { %5397 = vmatmul.mubr.msk.f32.gmra.mrb[46].mxu0 %vm702_vm0, %v7813_v5 }
 0x66c   :  { %v7817_v41 = vpop.f32.mrb[32].mxu0 }
 0x66d   :  { %8775 = vst [vmem:[#allocation22_spill] sm:$0xff] %v7817_v41  ;;  %v7819_v18 = vpop.f32.mrb[33].mxu0 }
 0x66e   :  { %8776 = vst [vmem:[#allocation21_spill] sm:$0xff] %v7819_v18 }
 0x6a1   :  { %v7821_v16 = vpop.f32.mrb[34].mxu0 }
 0x6a2   :  { %8777 = vst [vmem:[#allocation24_spill] sm:$0xff] %v7821_v16  ;;  %v7823_v20 = vpop.f32.mrb[35].mxu0 }
 0x6a3   :  { %8778 = vst [vmem:[#allocation23_spill] sm:$0xff] %v7823_v20 }
 0x6a8   :  { %v7825_v54 = vpop.f32.mrb[36].mxu0 }
 0x6a9   :  { %8779 = vst [vmem:[#allocation26_spill] sm:$0xff] %v7825_v54  ;;  %v7827_v30 = vpop.f32.mrb[37].mxu0 }
 0x6aa   :  { %8780 = vst [vmem:[#allocation25_spill] sm:$0xff] %v7827_v30 }
 0x6ac   :  { %v7829_v11 = vpop.f32.mrb[38].mxu0 }
 0x6ad   :  { %8781 = vst [vmem:[#allocation28_spill] sm:$0xff] %v7829_v11  ;;  %v7831_v0 = vpop.f32.mrb[39].mxu0 }
 0x6ae   :  { %8782 = vst [vmem:[#allocation27_spill] sm:$0xff] %v7831_v0 }
 0x6b0   :  { %v5389_v32 = vpop.f32.mrb[40].mxu0 }
 0x6b1   :  { %v2557_v25 = vpop.f32.mrb[41].mxu0  ;;  %v2599_v46 = vsel %vm856_vm2, %v5389_v32, -inf }
 0x6b2   :  { %2600 = vmax.xlane.f32.xlu0 %v2599_v46  ;;  %v2596_v3 = vsel %vm856_vm2, %v2557_v25, -inf  ;;  %v8784_v46 = vld [vmem:[#allocation31_spill] sm:$0xff] }
 0x6b3   :  { %2597 = vmax.xlane.f32.xlu1 %v2596_v3 }
 0x6b4   :  { %v7835_v62 = vpop.f32.mrb[42].mxu0 }
 0x6b5   :  { %v2567_v17 = vpop.f32.mrb[43].mxu0  ;;  %v2605_v3 = vsel %vm856_vm2, %v7835_v62, -inf }
 0x6b6   :  { %v2602_v20 = vsel %vm856_vm2, %v2567_v17, -inf }
 0x6b7   :  { %2603 = vmax.xlane.f32.xlu1 %v2602_v20 }
 0x6b8   :  { %v7838_v54 = vpop.f32.mrb[44].mxu0 }
 0x6b9   :  { %v7840_v30 = vpop.f32.mrb[45].mxu0  ;;  %v2611_v20 = vsel %vm856_vm2, %v7838_v54, -inf }
 0x6ba   :  { %v2608_v24 = vsel %vm856_vm2, %v7840_v30, -inf }
 0x6bc   :  { %v7842_v11 = vpop.f32.mrb[46].mxu0 }
 0x6bd   :  { %v7844_v0 = vpop.f32.mrb[47].mxu0  ;;  %v2617_v16 = vsel %vm856_vm2, %v7842_v11, -inf }
 0x6be   :  { %v2614_v36 = vsel %vm856_vm2, %v7844_v0, -inf }
 0x6c8   :  { %6233 = vrot.lane.b32.xlu0 %v8783_v39, %s6803_s6  ;;  %6248 = vrot.lane.b32.xlu1 %v8784_v46, %s6803_s6 }
 0x6e7   :  { %2606 = vmax.xlane.f32.xlu0 %v2605_v3  ;;  %v8789_v3 = vld [vmem:[#allocation35_spill] sm:$0xff] }
 0x6eb   :  { %2612 = vmax.xlane.f32.xlu0 %v2611_v20  ;;  %v6239_v20 = vpop.permute.xlu1 %6238 }
 0x6ec   :  { %2609 = vmax.xlane.f32.xlu1 %v2608_v24  ;;  %v8787_v24 = vld [vmem:[#allocation33_spill] sm:$0xff]  ;;  %v6241_v42 = vunpack.i.h.bf16 %v6239_v20  ;;  %v6240_v51 = vunpack.i.l.bf16 %v6239_v20 }
 0x6f0   :  { %2618 = vmax.xlane.f32.xlu1 %v2617_v16  ;;  %v8788_v16 = vld [vmem:[#allocation34_spill] sm:$0xff] }
 0x6f4   :  { %2615 = vmax.xlane.f32.xlu1 %v2614_v36  ;;  %v8786_v36 = vld [vmem:[#allocation32_spill] sm:$0xff] }
 0x701   :  { %6243 = vrot.lane.b32.xlu0 %v8785_v43, %s6803_s6 }
 0x705   :  { %2821 = vrot.lane.b32.xlu0 %v7776_v10, %s6803_s6  ;;  %2823 = vrot.lane.b32.xlu1 %v7783_v13, %s6803_s6 }
 0x709   :  { %2825 = vrot.lane.b32.xlu0 %v7786_v45, %s6803_s6  ;;  %2827 = vrot.lane.b32.xlu1 %v7793_v38, %s6803_s6 }
 0x70d   :  { %2829 = vrot.lane.b32.xlu0 %v7796_v44, %s6803_s6  ;;  %2831 = vrot.lane.b32.xlu1 %v7803_v2, %s6803_s6 }
 0x711   :  { %2833 = vrot.lane.b32.xlu0 %v7806_v59, %s6803_s6  ;;  %2835 = vrot.lane.b32.xlu1 %v7813_v5, %s6803_s6 }
 0x715   :  { %6253 = vrot.lane.b32.xlu0 %v8786_v36, %s6803_s6  ;;  %6258 = vrot.lane.b32.xlu1 %v8787_v24, %s6803_s6 }
 0x719   :  { %6263 = vrot.lane.b32.xlu0 %v8788_v16, %s6803_s6  ;;  %6268 = vrot.lane.b32.xlu1 %v8789_v3, %s6803_s6 }
 0x71d   :  { %6273 = vrot.lane.b32.xlu0 %v8783_v39, %s6804_s18  ;;  %6278 = vrot.lane.b32.xlu1 %v7299_v49, %s6804_s18 }
 0x73f   :  { %v2601_v41 = vpop.xlane.xlu0 %2600 }
 0x740   :  { %v2621_v18 = vsub.f32 %v5389_v32, %v2601_v41  ;;  %v2598_v57 = vpop.xlane.xlu1 %2597 }
 0x741   :  { %v2620_v60 = vsub.f32 %v2557_v25, %v2598_v57 }
 0x742   :  { %v2630_v55 = vmul.f32 1.442695, %v2621_v18 }
 0x743   :  { %v2628_v9 = vmul.f32 1.442695, %v2620_v60  ;;  %v6234_v7 = vpop.permute.xlu0 %6233 }
 0x744   :  { %v6236_v50 = vunpack.i.h.bf16 %v6234_v7  ;;  %v6235_v63 = vunpack.i.l.bf16 %v6234_v7  ;;  %v2604_v23 = vpop.xlane.xlu1 %2603  ;;  %v5953_v7 = vpack.c.bf16 %v6241_v42, %v6240_v51 }
 0x745   :  { %6416 = vpow2.f32 %v2628_v9  ;;  %v2622_v15 = vsub.f32 %v2567_v17, %v2604_v23 }
 0x746   :  { %6418 = vpow2.f32 %v2630_v55  ;;  %v5947_v31 = vpack.c.bf16 %v6236_v50, %v6235_v63 }
 0x747   :  { %v2632_v29 = vmul.f32 1.442695, %v2622_v15 }
 0x748   :  { %5949 = vmatprep.subr.msk.bf16.mxu1 %vm7052_vm1, %v5947_v31  ;;  %v6249_v15 = vpop.permute.xlu1 %6248 }
 0x749   :  { %6420 = vpow2.f32 %v2632_v29  ;;  %v6251_v18 = vunpack.i.h.bf16 %v6249_v15  ;;  %v6250_v32 = vunpack.i.l.bf16 %v6249_v15 }
 0x74f   :  { %v7892_v41 = vpop.eup %6416 }
 0x750   :  { %8790 = vst [vmem:[#allocation29_spill] sm:$0xff] %v7892_v41  ;;  %v7894_v57 = vpop.eup %6418  ;;  %5415 = vmatprep.mubr.msk.f32.mxu1 %vm856_vm2, %v7892_v41 }
 0x751   :  { %8791 = vst [vmem:[#allocation31_spill] sm:$0xff] %v7894_v57  ;;  %5416 = vmatmul.mubr.msk.f32.vlgmr.msra.gmra.mrb[72].mxu1 %vm856_vm2, %v7894_v57 }
 0x752   :  { %5952 = vmatpush3.bf16.xpose.msk.msra.mxu1 %vm7052_vm1, %v5947_v31 }
 0x753   :  { %v7902_v23 = vpop.eup %6420  ;;  %5955 = vmatprep.subr.msk.bf16.mxu1 %vm7052_vm1, %v5953_v7 }
 0x754   :  { %8792 = vst [vmem:[#allocation30_spill] sm:$0xff] %v7902_v23  ;;  %5418 = vmatprep.mubr.msk.f32.mxu1 %vm856_vm2, %v7902_v23 }
 0x75a   :  { %5958 = vmatpush3.bf16.xpose.msk.msra.mxu1 %vm7052_vm1, %v5953_v7 }
 0x774   :  { %v2607_v29 = vpop.xlane.xlu0 %2606 }
 0x775   :  { %v2623_v42 = vsub.f32 %v7835_v62, %v2607_v29 }
 0x777   :  { %v2634_v50 = vmul.f32 1.442695, %v2623_v42  ;;  %v5965_v42 = vpack.c.bf16 %v6251_v18, %v6250_v32 }
 0x778   :  { %v2613_v63 = vpop.xlane.xlu0 %2612 }
 0x779   :  { %6422 = vpow2.f32 %v2634_v50  ;;  %v2625_v31 = vsub.f32 %v7838_v54, %v2613_v63  ;;  %v2610_v60 = vpop.xlane.xlu1 %2609 }
 0x77a   :  { %v2624_v9 = vsub.f32 %v7840_v30, %v2610_v60 }
 0x77b   :  { %v2638_v17 = vmul.f32 1.442695, %v2625_v31 }
 0x77c   :  { %v2636_v55 = vmul.f32 1.442695, %v2624_v9  ;;  %v6244_v51 = vpop.permute.xlu0 %6243 }
 0x77d   :  { %v6246_v25 = vunpack.i.h.bf16 %v6244_v51  ;;  %v6245_v20 = vunpack.i.l.bf16 %v6244_v51  ;;  %v2619_v7 = vpop.xlane.xlu1 %2618 }
 0x77e   :  { %6424 = vpow2.f32 %v2636_v55  ;;  %v2627_v62 = vsub.f32 %v7842_v11, %v2619_v7 }
 0x77f   :  { %6426 = vpow2.f32 %v2638_v17  ;;  %v5959_v57 = vpack.c.bf16 %v6246_v25, %v6245_v20 }
 0x780   :  { %v2822_v29 = vpop.permute.xlu0 %2821  ;;  %v2642_v15 = vmul.f32 1.442695, %v2627_v62 }
 0x781   :  { %v2616_v50 = vpop.xlane.xlu1 %2615  ;;  %5961 = vmatprep.subr.msk.bf16.mxu1 %vm7052_vm1, %v5959_v57 }
 0x782   :  { %v2626_v54 = vsub.f32 %v7844_v0, %v2616_v50  ;;  %5964 = vmatpush3.bf16.xpose.msk.msra.mxu1 %vm7052_vm1, %v5959_v57 }
 0x783   :  { %v7919_v30 = vpop.eup %6422  ;;  %5967 = vmatprep.subr.msk.bf16.mxu1 %vm7052_vm1, %v5965_v42 }
 0x784   :  { %8793 = vst [vmem:[#allocation32_spill] sm:$0xff] %v7919_v30  ;;  %v2640_v63 = vmul.f32 1.442695, %v2626_v54  ;;  %v2826_v31 = vpop.permute.xlu0 %2825  ;;  %5419 = vmatmul.mubr.msk.f32.gmra.mrb[74].mxu1 %vm856_vm2, %v7919_v30 }
 0x785   :  { %v2824_v11 = vpop.permute.xlu1 %2823 }
 0x786   :  { %6428 = vpow2.f32 %v2640_v63 }
 0x787   :  { %6430 = vpow2.f32 %v2642_v15 }
 0x788   :  { %v7925_v60 = vpop.eup %6424  ;;  %v2830_v0 = vpop.permute.xlu0 %2829 }
 0x789   :  { %8794 = vst [vmem:[#allocation33_spill] sm:$0xff] %v7925_v60  ;;  %v7927_v9 = vpop.eup %6426  ;;  %5421 = vmatprep.mubr.msk.f32.mxu1 %vm856_vm2, %v7925_v60  ;;  %v2828_v57 = vpop.permute.xlu1 %2827 }
 0x78a   :  { %8795 = vst [vmem:[#allocation34_spill] sm:$0xff] %v7927_v9  ;;  %5422 = vmatmul.mubr.msk.f32.gmra.mrb[76].mxu1 %vm856_vm2, %v7927_v9 }
 0x78b   :  { %5970 = vmatpush3.bf16.xpose.msk.msra.mxu1 %vm7052_vm1, %v5965_v42 }
 0x78c   :  { %v2834_v17 = vpop.permute.xlu0 %2833 }
 0x78d   :  { %v2832_v55 = vpop.permute.xlu1 %2831 }
 0x790   :  { %v7935_v51 = vpop.eup %6428  ;;  %v6254_v18 = vpop.permute.xlu0 %6253 }
 0x791   :  { %8796 = vst [vmem:[#allocation35_spill] sm:$0xff] %v7935_v51  ;;  %v7937_v32 = vpop.eup %6430  ;;  %v6256_v25 = vunpack.i.h.bf16 %v6254_v18  ;;  %v6255_v20 = vunpack.i.l.bf16 %v6254_v18  ;;  %5424 = vmatprep.mubr.msk.f32.mxu1 %vm856_vm2, %v7935_v51  ;;  %v2836_v7 = vpop.permute.xlu1 %2835 }
 0x792   :  { %8797 = vst [vmem:[#allocation70_spill] sm:$0xff] %v7937_v32  ;;  %5425 = vmatmul.mubr.msk.f32.gmra.mrb[78].mxu1 %vm856_vm2, %v7937_v32 }
 0x793   :  { %5443 = vmatprep.mubr.msk.f32.mxu1 %vm702_vm0, %v2822_v29  ;;  %v5971_v62 = vpack.c.bf16 %v6256_v25, %v6255_v20 }
 0x794   :  { %v6264_v42 = vpop.permute.xlu0 %6263 }
 0x795   :  { %5972 = vmatprep.subr.bf16.mxu0 %v5971_v62  ;;  %v6259_v50 = vpop.permute.xlu1 %6258  ;;  %v6266_v54 = vunpack.i.h.bf16 %v6264_v42  ;;  %v6265_v15 = vunpack.i.l.bf16 %v6264_v42 }
 0x796   :  { %v6261_v63 = vunpack.i.h.bf16 %v6259_v50  ;;  %v6260_v9 = vunpack.i.l.bf16 %v6259_v50  ;;  %5444 = vmatmul.mubr.msk.f32.vlgmr.msra.gmra.mrb[80].mxu1 %vm702_vm0, %v2824_v11  ;;  %5974 = vmatpush3.bf16.msra.mxu0 %v5971_v62 }
 0x797   :  { %5446 = vmatprep.mubr.msk.f32.mxu1 %vm702_vm0, %v2826_v31  ;;  %v5979_v29 = vpack.c.bf16 %v6266_v54, %v6265_v15 }
 0x798   :  { %v5975_v18 = vpack.c.bf16 %v6261_v63, %v6260_v9  ;;  %v6274_v25 = vpop.permute.xlu0 %6273 }
 0x799   :  { %v6269_v51 = vpop.permute.xlu1 %6268  ;;  %v6276_v20 = vunpack.i.h.bf16 %v6274_v25  ;;  %v6275_v42 = vunpack.i.l.bf16 %v6274_v25 }
 0x79a   :  { %v6271_v30 = vunpack.i.h.bf16 %v6269_v51  ;;  %v6270_v60 = vunpack.i.l.bf16 %v6269_v51  ;;  %5447 = vmatmul.mubr.msk.f32.gmra.mrb[82].mxu1 %vm702_vm0, %v2828_v57  ;;  %5976 = vmatprep.subr.bf16.mxu0 %v5975_v18 }
 0x79b   :  { %5449 = vmatprep.mubr.msk.f32.mxu1 %vm702_vm0, %v2830_v0  ;;  %5978 = vmatpush3.bf16.msra.mxu0 %v5975_v18  ;;  %v7950_v31 = vpack.c.bf16 %v6276_v20, %v6275_v42 }
 0x79c   :  { %5980 = vmatprep.subr.bf16.mxu0 %v5979_v29  ;;  %v5983_v11 = vpack.c.bf16 %v6271_v30, %v6270_v60 }
 0x79e   :  { %5450 = vmatmul.mubr.msk.f32.gmra.mrb[84].mxu1 %vm702_vm0, %v2832_v55 }
 0x79f   :  { %5452 = vmatprep.mubr.msk.f32.mxu1 %vm702_vm0, %v2834_v17  ;;  %5982 = vmatpush3.bf16.msra.mxu0 %v5979_v29 }
 0x7a0   :  { %5984 = vmatprep.subr.bf16.mxu0 %v5983_v11 }
 0x7a2   :  { %5453 = vmatmul.mubr.msk.f32.gmra.mrb[86].mxu1 %vm702_vm0, %v2836_v7 }
 0x7a3   :  { %5986 = vmatpush3.bf16.msra.mxu0 %v5983_v11 }
 0x7a4   :  { %5989 = vmatprep.subr.msk.bf16.mxu0 %vm7052_vm1, %v7950_v31 }
 0x824   :  { %v7956_v0 = vpop.f32.mrb[72].mxu1 }
 0x825   :  { %8798 = vst [vmem:[#allocation71_spill] sm:$0xff] %v7956_v0  ;;  %v7958_v9 = vpop.f32.mrb[73].mxu1 }
 0x826   :  { %8799 = vst [vmem:[#allocation72_spill] sm:$0xff] %v7958_v9 }
 0x857   :  { %v7960_v57 = vpop.f32.mrb[74].mxu1 }
 0x858   :  { %8800 = vst [vmem:[#allocation73_spill] sm:$0xff] %v7960_v57  ;;  %v7962_v30 = vpop.f32.mrb[75].mxu1 }
 0x859   :  { %8801 = vst [vmem:[#allocation74_spill] sm:$0xff] %v7962_v30 }
 0x85d   :  { %v7964_v60 = vpop.f32.mrb[76].mxu1 }
 0x85e   :  { %8802 = vst [vmem:[#allocation75_spill] sm:$0xff] %v7964_v60  ;;  %v7966_v17 = vpop.f32.mrb[77].mxu1 }
 0x85f   :  { %8803 = vst [vmem:[#allocation76_spill] sm:$0xff] %v7966_v17 }
 0x865   :  { %v7968_v55 = vpop.f32.mrb[78].mxu1 }
 0x866   :  { %8804 = vst [vmem:[#allocation77_spill] sm:$0xff] %v7968_v55  ;;  %v7970_v51 = vpop.f32.mrb[79].mxu1 }
 0x867   :  { %8805 = vst [vmem:[#allocation78_spill] sm:$0xff] %v7970_v51 }
 0x869   :  { %v5445_v7 = vpop.f32.mrb[80].mxu1 }
 0x86a   :  { %v2951_v62 = vpop.f32.mrb[81].mxu1  ;;  %v2993_v50 = vsel %vm856_vm2, %v5445_v7, -inf }
 0x86b   :  { %2994 = vmax.xlane.f32.xlu1 %v2993_v50  ;;  %v2990_v54 = vsel %vm856_vm2, %v2951_v62, -inf }
 0x86c   :  { %2991 = vmax.xlane.f32.xlu0 %v2990_v54 }
 0x86d   :  { %v5448_v15 = vpop.f32.mrb[82].mxu1 }
 0x86e   :  { %v2961_v63 = vpop.f32.mrb[83].mxu1  ;;  %v2999_v18 = vsel %vm856_vm2, %v5448_v15, -inf }
 0x86f   :  { %3000 = vmax.xlane.f32.xlu1 %v2999_v18  ;;  %v2996_v29 = vsel %vm856_vm2, %v2961_v63, -inf }
 0x870   :  { %2997 = vmax.xlane.f32.xlu0 %v2996_v29 }
 0x871   :  { %v5451_v25 = vpop.f32.mrb[84].mxu1 }
 0x872   :  { %v2971_v20 = vpop.f32.mrb[85].mxu1  ;;  %v3005_v42 = vsel %vm856_vm2, %v5451_v25, -inf }
 0x873   :  { %v3002_v50 = vsel %vm856_vm2, %v2971_v20, -inf }
 0x874   :  { %3006 = vmax.xlane.f32.xlu0 %v3005_v42 }
 0x875   :  { %v7977_v11 = vpop.f32.mrb[86].mxu1 }
 0x876   :  { %v7979_v55 = vpop.f32.mrb[87].mxu1  ;;  %v3011_v54 = vsel %vm856_vm2, %v7977_v11, -inf }
 0x877   :  { %v3008_v18 = vsel %vm856_vm2, %v7979_v55, -inf }
 0x878   :  { %3003 = vmax.xlane.f32.xlu0 %v3002_v50 }
 0x880   :  { %6288 = vrot.lane.b32.xlu1 %v8784_v46, %s6804_s18 }
 0x88e   :  { %6283 = vrot.lane.b32.xlu0 %v8785_v43, %s6804_s18 }
 0x892   :  { %3279 = vrot.lane.b32.xlu0 %v7776_v10, %s6804_s18 }
 0x896   :  { %3283 = vrot.lane.b32.xlu0 %v7786_v45, %s6804_s18 }
 0x89a   :  { %3287 = vrot.lane.b32.xlu0 %v7796_v44, %s6804_s18 }
 0x89e   :  { %3291 = vrot.lane.b32.xlu0 %v7806_v59, %s6804_s18 }
 0x8a2   :  { %6293 = vrot.lane.b32.xlu0 %v8786_v36, %s6804_s18 }
 0x8a4   :  { %3012 = vmax.xlane.f32.xlu1 %v3011_v54 }
 0x8a6   :  { %6303 = vrot.lane.b32.xlu0 %v8788_v16, %s6804_s18 }
 0x8a8   :  { %3009 = vmax.xlane.f32.xlu1 %v3008_v18 }
 0x8aa   :  { %6313 = vrot.lane.b32.xlu0 %v8783_v39, %s6805_s8  ;;  %v6279_v39 = vpop.permute.xlu1 %6278 }
 0x8ab   :  { %v6281_v41 = vunpack.i.h.bf16 %v6279_v39  ;;  %v6280_v35 = vunpack.i.l.bf16 %v6279_v39 }
 0x8b9   :  { %3281 = vrot.lane.b32.xlu1 %v7783_v13, %s6804_s18 }
 0x8bd   :  { %3285 = vrot.lane.b32.xlu1 %v7793_v38, %s6804_s18 }
 0x8c1   :  { %3289 = vrot.lane.b32.xlu1 %v7803_v2, %s6804_s18 }
 0x8c5   :  { %3293 = vrot.lane.b32.xlu1 %v7813_v5, %s6804_s18 }
 0x8c9   :  { %6298 = vrot.lane.b32.xlu1 %v8787_v24, %s6804_s18 }
 0x8cd   :  { %6308 = vrot.lane.b32.xlu1 %v8789_v3, %s6804_s18 }
 0x8d1   :  { %6318 = vrot.lane.b32.xlu1 %v7299_v49, %s6805_s8 }
 0x8f8   :  { %v2995_v29 = vpop.xlane.xlu1 %2994 }
 0x8f9   :  { %v3015_v42 = vsub.f32 %v5445_v7, %v2995_v29  ;;  %v2992_v50 = vpop.xlane.xlu0 %2991 }
 0x8fa   :  { %v3014_v54 = vsub.f32 %v2951_v62, %v2992_v50 }
 0x8fb   :  { %v3024_v18 = vmul.f32 1.442695, %v3015_v42 }
 0x8fc   :  { %v3022_v51 = vmul.f32 1.442695, %v3014_v54  ;;  %v3001_v60 = vpop.xlane.xlu1 %3000 }
 0x8fd   :  { %v3017_v57 = vsub.f32 %v5448_v15, %v3001_v60  ;;  %v2998_v17 = vpop.xlane.xlu0 %2997 }
 0x8fe   :  { %6432 = vpow2.f32 %v3022_v51  ;;  %v3016_v0 = vsub.f32 %v2961_v63, %v2998_v17 }
 0x8ff   :  { %6434 = vpow2.f32 %v3024_v18  ;;  %v3028_v30 = vmul.f32 1.442695, %v3017_v57  ;;  %v5993_v57 = vpack.c.bf16 %v6281_v41, %v6280_v35 }
 0x900   :  { %v3026_v9 = vmul.f32 1.442695, %v3016_v0  ;;  %v6289_v17 = vpop.permute.xlu1 %6288 }
 0x901   :  { %v3007_v32 = vpop.xlane.xlu0 %3006  ;;  %v6291_v63 = vunpack.i.h.bf16 %v6289_v17 }
 0x902   :  { %6436 = vpow2.f32 %v3026_v9  ;;  %v3019_v23 = vsub.f32 %v5451_v25, %v3007_v32  ;;  %v6290_v25 = vunpack.i.l.bf16 %v6289_v17 }
 0x903   :  { %6438 = vpow2.f32 %v3028_v30 }
 0x904   :  { %v3032_v29 = vmul.f32 1.442695, %v3019_v23  ;;  %v6005_v39 = vpack.c.bf16 %v6291_v63, %v6290_v25 }
 0x905   :  { %v3004_v49 = vpop.xlane.xlu0 %3003 }
 0x906   :  { %v3018_v7 = vsub.f32 %v2971_v20, %v3004_v49 }
 0x908   :  { %v8018_v62 = vpop.eup %6432  ;;  %v3030_v42 = vmul.f32 1.442695, %v3018_v7 }
 0x909   :  { %v8020_v50 = vpop.eup %6434  ;;  %5471 = vmatprep.mubr.msk.f32.mxu0 %vm856_vm2, %v8018_v62  ;;  %v6284_v60 = vpop.permute.xlu0 %6283 }
 0x90a   :  { %6440 = vpow2.f32 %v3030_v42  ;;  %5472 = vmatmul.mubr.msk.f32.vlgmr.msra.gmra.mrb[48].mxu0 %vm856_vm2, %v8020_v50  ;;  %v6286_v41 = vunpack.i.h.bf16 %v6284_v60  ;;  %v6285_v0 = vunpack.i.l.bf16 %v6284_v60 }
 0x90b   :  { %6442 = vpow2.f32 %v3032_v29  ;;  %5992 = vmatpush3.bf16.xpose.msk.msra.mxu0 %vm7052_vm1, %v7950_v31 }
 0x90c   :  { %v8029_v23 = vpop.eup %6436  ;;  %5995 = vmatprep.subr.msk.bf16.mxu0 %vm7052_vm1, %v5993_v57  ;;  %v5999_v30 = vpack.c.bf16 %v6286_v41, %v6285_v0 }
 0x90d   :  { %v8033_v32 = vpop.eup %6438  ;;  %5474 = vmatprep.mubr.msk.f32.mxu0 %vm856_vm2, %v8029_v23  ;;  %v3280_v35 = vpop.permute.xlu0 %3279 }
 0x90e   :  { %5475 = vmatmul.mubr.msk.f32.gmra.mrb[50].mxu0 %vm856_vm2, %v8033_v32 }
 0x911   :  { %v3284_v9 = vpop.permute.xlu0 %3283 }
 0x913   :  { %5998 = vmatpush3.bf16.xpose.msk.msra.mxu0 %vm7052_vm1, %v5993_v57 }
 0x914   :  { %v8041_v31 = vpop.eup %6440  ;;  %6001 = vmatprep.subr.msk.bf16.mxu0 %vm7052_vm1, %v5999_v30 }
 0x915   :  { %v8045_v51 = vpop.eup %6442  ;;  %5477 = vmatprep.mubr.msk.f32.mxu0 %vm856_vm2, %v8041_v31  ;;  %v3288_v15 = vpop.permute.xlu0 %3287 }
 0x916   :  { %5478 = vmatmul.mubr.msk.f32.gmra.mrb[52].mxu0 %vm856_vm2, %v8045_v51 }
 0x919   :  { %v3292_v20 = vpop.permute.xlu0 %3291 }
 0x91b   :  { %6004 = vmatpush3.bf16.xpose.msk.msra.mxu0 %vm7052_vm1, %v5999_v30 }
 0x91c   :  { %6007 = vmatprep.subr.msk.bf16.mxu0 %vm7052_vm1, %v6005_v39 }
 0x91d   :  { %v6294_v54 = vpop.permute.xlu0 %6293 }
 0x91e   :  { %v6296_v18 = vunpack.i.h.bf16 %v6294_v54  ;;  %v6295_v49 = vunpack.i.l.bf16 %v6294_v54 }
 0x920   :  { %v6011_v7 = vpack.c.bf16 %v6296_v18, %v6295_v49 }
 0x922   :  { %6012 = vmatprep.subr.bf16.mxu1 %v6011_v7 }
 0x923   :  { %6010 = vmatpush3.bf16.xpose.msk.msra.mxu0 %vm7052_vm1, %v6005_v39  ;;  %6014 = vmatpush3.bf16.msra.mxu1 %v6011_v7 }
 0x931   :  { %v3013_v29 = vpop.xlane.xlu1 %3012 }
 0x932   :  { %v3021_v42 = vsub.f32 %v7977_v11, %v3013_v29  ;;  %v6304_v11 = vpop.permute.xlu0 %6303 }
 0x933   :  { %v6306_v18 = vunpack.i.h.bf16 %v6304_v11  ;;  %v6305_v49 = vunpack.i.l.bf16 %v6304_v11 }
 0x934   :  { %v3036_v41 = vmul.f32 1.442695, %v3021_v42 }
 0x935   :  { %v3010_v60 = vpop.xlane.xlu1 %3009 }
 0x936   :  { %v3020_v57 = vsub.f32 %v7979_v55, %v3010_v60 }
 0x938   :  { %v3034_v0 = vmul.f32 1.442695, %v3020_v57 }
 0x939   :  { %v3282_v30 = vpop.permute.xlu1 %3281 }
 0x93a   :  { %6444 = vpow2.f32 %v3034_v0  ;;  %v6019_v0 = vpack.c.bf16 %v6306_v18, %v6305_v49 }
 0x93b   :  { %6446 = vpow2.f32 %v3036_v41 }
 0x93d   :  { %v3286_v17 = vpop.permute.xlu1 %3285 }
 0x941   :  { %v3290_v63 = vpop.permute.xlu1 %3289 }
 0x944   :  { %v8059_v25 = vpop.eup %6444 }
 0x945   :  { %v8061_v54 = vpop.eup %6446  ;;  %5480 = vmatprep.mubr.msk.f32.mxu0 %vm856_vm2, %v8059_v25  ;;  %v3294_v39 = vpop.permute.xlu1 %3293 }
 0x946   :  { %8806 = vst [vmem:[#allocation79_spill] sm:$0xff] %v8061_v54  ;;  %5481 = vmatmul.mubr.msk.f32.gmra.mrb[54].mxu0 %vm856_vm2, %v8061_v54  ;;  %v6314_v54 = vpop.permute.xlu0 %6313 }
 0x947   :  { %5499 = vmatprep.mubr.msk.f32.mxu0 %vm702_vm0, %v3280_v35  ;;  %v6316_v35 = vunpack.i.h.bf16 %v6314_v54  ;;  %v6315_v11 = vunpack.i.l.bf16 %v6314_v54 }
 0x949   :  { %v6299_v55 = vpop.permute.xlu1 %6298 }
 0x94a   :  { %v6301_v7 = vunpack.i.h.bf16 %v6299_v55  ;;  %v6300_v29 = vunpack.i.l.bf16 %v6299_v55  ;;  %5500 = vmatmul.mubr.msk.f32.vlgmr.msra.gmra.mrb[56].mxu0 %vm702_vm0, %v3282_v30 }
 0x94b   :  { %5502 = vmatprep.mubr.msk.f32.mxu0 %vm702_vm0, %v3284_v9  ;;  %v8074_v9 = vpack.c.bf16 %v6316_v35, %v6315_v11 }
 0x94c   :  { %v6015_v42 = vpack.c.bf16 %v6301_v7, %v6300_v29 }
 0x94d   :  { %v6309_v60 = vpop.permute.xlu1 %6308 }
 0x94e   :  { %v6311_v57 = vunpack.i.h.bf16 %v6309_v60  ;;  %v6310_v41 = vunpack.i.l.bf16 %v6309_v60  ;;  %5503 = vmatmul.mubr.msk.f32.gmra.mrb[58].mxu0 %vm702_vm0, %v3286_v17  ;;  %6016 = vmatprep.subr.bf16.mxu1 %v6015_v42 }
 0x94f   :  { %5505 = vmatprep.mubr.msk.f32.mxu0 %vm702_vm0, %v3288_v15  ;;  %6018 = vmatpush3.bf16.msra.mxu1 %v6015_v42 }
 0x950   :  { %6020 = vmatprep.subr.bf16.mxu1 %v6019_v0  ;;  %v6023_v30 = vpack.c.bf16 %v6311_v57, %v6310_v41 }
 0x952   :  { %5506 = vmatmul.mubr.msk.f32.gmra.mrb[60].mxu0 %vm702_vm0, %v3290_v63 }
 0x953   :  { %5508 = vmatprep.mubr.msk.f32.mxu0 %vm702_vm0, %v3292_v20  ;;  %6022 = vmatpush3.bf16.msra.mxu1 %v6019_v0 }
 0x954   :  { %6024 = vmatprep.subr.bf16.mxu1 %v6023_v30 }
 0x956   :  { %5509 = vmatmul.mubr.msk.f32.gmra.mrb[62].mxu0 %vm702_vm0, %v3294_v39 }
 0x957   :  { %6026 = vmatpush3.bf16.msra.mxu1 %v6023_v30 }
 0x958   :  { %6029 = vmatprep.subr.msk.bf16.mxu1 %vm7052_vm1, %v8074_v9 }
 0x9dd   :  { %v8080_v15 = vpop.f32.mrb[48].mxu0 }
 0x9de   :  { %v8082_v17 = vpop.f32.mrb[49].mxu0 }
 0x9e1   :  { %v8084_v54 = vpop.f32.mrb[50].mxu0 }
 0x9e2   :  { %v8086_v63 = vpop.f32.mrb[51].mxu0 }
 0x9e9   :  { %v8088_v20 = vpop.f32.mrb[52].mxu0 }
 0x9ea   :  { %v8090_v55 = vpop.f32.mrb[53].mxu0 }
 0x9eb   :  { %8807 = vst [vmem:[#allocation80_spill] sm:$0xff] %v8090_v55 }
 0xa19   :  { %v8092_v18 = vpop.f32.mrb[54].mxu0 }
 0xa1a   :  { %v8094_v39 = vpop.f32.mrb[55].mxu0 }
 0xa1b   :  { %8808 = vst [vmem:[#allocation81_spill] sm:$0xff] %v8094_v39 }
 0xa1d   :  { %v5501_v49 = vpop.f32.mrb[56].mxu0 }
 0xa1e   :  { %v3409_v7 = vpop.f32.mrb[57].mxu0  ;;  %v3451_v29 = vsel %vm856_vm2, %v5501_v49, -inf }
 0xa1f   :  { %3452 = vmax.xlane.f32.xlu1 %v3451_v29  ;;  %v3448_v42 = vsel %vm856_vm2, %v3409_v7, -inf }
 0xa20   :  { %3449 = vmax.xlane.f32.xlu0 %v3448_v42 }
 0xa21   :  { %v5504_v60 = vpop.f32.mrb[58].mxu0 }
 0xa22   :  { %v3419_v57 = vpop.f32.mrb[59].mxu0  ;;  %v3457_v41 = vsel %vm856_vm2, %v5504_v60, -inf }
 0xa23   :  { %3458 = vmax.xlane.f32.xlu1 %v3457_v41  ;;  %v3454_v0 = vsel %vm856_vm2, %v3419_v57, -inf }
 0xa24   :  { %3455 = vmax.xlane.f32.xlu0 %v3454_v0 }
 0xa25   :  { %v5507_v35 = vpop.f32.mrb[60].mxu0 }
 0xa26   :  { %v3429_v11 = vpop.f32.mrb[61].mxu0  ;;  %v3463_v30 = vsel %vm856_vm2, %v5507_v35, -inf }
 0xa27   :  { %v3460_v29 = vsel %vm856_vm2, %v3429_v11, -inf }
 0xa28   :  { %3464 = vmax.xlane.f32.xlu0 %v3463_v30 }
 0xa29   :  { %v8101_v39 = vpop.f32.mrb[62].mxu0 }
 0xa2a   :  { %v8103_v55 = vpop.f32.mrb[63].mxu0 }
 0xa2c   :  { %3461 = vmax.xlane.f32.xlu0 %v3460_v29 }
 0xa34   :  { %6328 = vrot.lane.b32.xlu1 %v8784_v46, %s6805_s8  ;;  %v3469_v46 = vsel %vm856_vm2, %v8101_v39, -inf }
 0xa42   :  { %6323 = vrot.lane.b32.xlu0 %v8785_v43, %s6805_s8  ;;  %v3466_v43 = vsel %vm856_vm2, %v8103_v55, -inf }
 0xa46   :  { %3729 = vrot.lane.b32.xlu0 %v7776_v10, %s6805_s8  ;;  %v1299_v10 = vsel %vm856_vm2, %v7535_v58, 0.0  ;;  %v1302_v58 = vsel %vm856_vm2, %v7537_v47, 0.0 }
 0xa4a   :  { %3733 = vrot.lane.b32.xlu0 %v7786_v45, %s6805_s8  ;;  %v1758_v45 = vsel %vm856_vm2, %v7579_v27, 0.0 }
 0xa4e   :  { %3737 = vrot.lane.b32.xlu0 %v7796_v44, %s6805_s8  ;;  %v2209_v44 = vsel %vm856_vm2, %v7718_v14, 0.0 }
 0xa52   :  { %3741 = vrot.lane.b32.xlu0 %v7806_v59, %s6805_s8 }
 0xa56   :  { %6333 = vrot.lane.b32.xlu0 %v8786_v36, %s6805_s8 }
 0xa58   :  { %3470 = vmax.xlane.f32.xlu1 %v3469_v46 }
 0xa5a   :  { %6343 = vrot.lane.b32.xlu0 %v8788_v16, %s6805_s8 }
 0xa5c   :  { %3467 = vmax.xlane.f32.xlu1 %v3466_v43 }
 0xa6d   :  { %3731 = vrot.lane.b32.xlu1 %v7783_v13, %s6805_s8  ;;  %v1761_v13 = vsel %vm856_vm2, %v7581_v8, 0.0 }
 0xa71   :  { %3735 = vrot.lane.b32.xlu1 %v7793_v38, %s6805_s8  ;;  %v6319_v38 = vpop.permute.xlu1 %6318 }
 0xa72   :  { %v6321_v29 = vunpack.i.h.bf16 %v6319_v38  ;;  %v6320_v46 = vunpack.i.l.bf16 %v6319_v38 }
 0xa75   :  { %3739 = vrot.lane.b32.xlu1 %v7803_v2, %s6805_s8 }
 0xa79   :  { %1300 = vadd.xlane.f32.xlu0 %v1299_v10  ;;  %3743 = vrot.lane.b32.xlu1 %v7813_v5, %s6805_s8 }
 0xa7d   :  { %1759 = vadd.xlane.f32.xlu0 %v1758_v45  ;;  %6338 = vrot.lane.b32.xlu1 %v8787_v24, %s6805_s8 }
 0xa81   :  { %1762 = vadd.xlane.f32.xlu0 %v1761_v13  ;;  %6348 = vrot.lane.b32.xlu1 %v8789_v3, %s6805_s8 }
 0xaa5   :  { %1303 = vadd.xlane.f32.xlu1 %v1302_v58 }
 0xaa9   :  { %2210 = vadd.xlane.f32.xlu1 %v2209_v44 }
 0xaac   :  { %v3453_v27 = vpop.xlane.xlu1 %3452 }
 0xaad   :  { %v3473_v2 = vsub.f32 %v5501_v49, %v3453_v27  ;;  %v3450_v59 = vpop.xlane.xlu0 %3449 }
 0xaae   :  { %v3472_v5 = vsub.f32 %v3409_v7, %v3450_v59 }
 0xaaf   :  { %v3482_v36 = vmul.f32 1.442695, %v3473_v2 }
 0xab0   :  { %v3480_v24 = vmul.f32 1.442695, %v3472_v5  ;;  %v3459_v8 = vpop.xlane.xlu1 %3458 }
 0xab1   :  { %v3475_v16 = vsub.f32 %v5504_v60, %v3459_v8  ;;  %v3456_v42 = vpop.xlane.xlu0 %3455 }
 0xab2   :  { %6448 = vpow2.f32 %v3480_v24  ;;  %v3474_v3 = vsub.f32 %v3419_v57, %v3456_v42  ;;  %v6033_v57 = vpack.c.bf16 %v6321_v29, %v6320_v46 }
 0xab3   :  { %6450 = vpow2.f32 %v3482_v36  ;;  %v3486_v41 = vmul.f32 1.442695, %v3475_v16 }
 0xab4   :  { %v3484_v47 = vmul.f32 1.442695, %v3474_v3  ;;  %v6329_v2 = vpop.permute.xlu1 %6328 }
 0xab5   :  { %v3465_v0 = vpop.xlane.xlu0 %3464  ;;  %v6331_v36 = vunpack.i.h.bf16 %v6329_v2  ;;  %v6330_v24 = vunpack.i.l.bf16 %v6329_v2 }
 0xab6   :  { %6452 = vpow2.f32 %v3484_v47  ;;  %v3477_v30 = vsub.f32 %v5507_v35, %v3465_v0 }
 0xab7   :  { %6454 = vpow2.f32 %v3486_v41  ;;  %v6045_v16 = vpack.c.bf16 %v6331_v36, %v6330_v24 }
 0xab8   :  { %v3490_v43 = vmul.f32 1.442695, %v3477_v30 }
 0xab9   :  { %v3462_v14 = vpop.xlane.xlu0 %3461 }
 0xaba   :  { %v3476_v49 = vsub.f32 %v3429_v11, %v3462_v14 }
 0xabc   :  { %v8148_v7 = vpop.eup %6448  ;;  %v3488_v10 = vmul.f32 1.442695, %v3476_v49 }
 0xabd   :  { %v8150_v45 = vpop.eup %6450  ;;  %5527 = vmatprep.mubr.msk.f32.mxu1 %vm856_vm2, %v8148_v7  ;;  %v6324_v60 = vpop.permute.xlu0 %6323 }
 0xabe   :  { %6456 = vpow2.f32 %v3488_v10  ;;  %5528 = vmatmul.mubr.msk.f32.vlgmr.msra.gmra.mrb[88].mxu1 %vm856_vm2, %v8150_v45  ;;  %v6326_v58 = vunpack.i.h.bf16 %v6324_v60  ;;  %v6325_v38 = vunpack.i.l.bf16 %v6324_v60 }
 0xabf   :  { %6458 = vpow2.f32 %v3490_v43  ;;  %6032 = vmatpush3.bf16.xpose.msk.msra.mxu1 %vm7052_vm1, %v8074_v9 }
 0xac0   :  { %v8159_v35 = vpop.eup %6452  ;;  %6035 = vmatprep.subr.msk.bf16.mxu1 %vm7052_vm1, %v6033_v57  ;;  %v6039_v27 = vpack.c.bf16 %v6326_v58, %v6325_v38 }
 0xac1   :  { %v8163_v11 = vpop.eup %6454  ;;  %v3730_v13 = vpop.permute.xlu0 %3729  ;;  %5530 = vmatprep.mubr.msk.f32.mxu1 %vm856_vm2, %v8159_v35 }
 0xac2   :  { %5531 = vmatmul.mubr.msk.f32.gmra.mrb[90].mxu1 %vm856_vm2, %v8163_v11 }
 0xac5   :  { %v3734_v44 = vpop.permute.xlu0 %3733 }
 0xac7   :  { %6038 = vmatpush3.bf16.xpose.msk.msra.mxu1 %vm7052_vm1, %v6033_v57 }
 0xac8   :  { %v8171_v9 = vpop.eup %6456  ;;  %6041 = vmatprep.subr.msk.bf16.mxu1 %vm7052_vm1, %v6039_v27 }
 0xac9   :  { %v8175_v59 = vpop.eup %6458  ;;  %v3738_v5 = vpop.permute.xlu0 %3737  ;;  %5533 = vmatprep.mubr.msk.f32.mxu1 %vm856_vm2, %v8171_v9 }
 0xaca   :  { %5534 = vmatmul.mubr.msk.f32.gmra.mrb[92].mxu1 %vm856_vm2, %v8175_v59 }
 0xacd   :  { %v3742_v8 = vpop.permute.xlu0 %3741 }
 0xacf   :  { %6044 = vmatpush3.bf16.xpose.msk.msra.mxu1 %vm7052_vm1, %v6039_v27 }
 0xad0   :  { %6047 = vmatprep.subr.msk.bf16.mxu1 %vm7052_vm1, %v6045_v16 }
 0xad1   :  { %v6334_v42 = vpop.permute.xlu0 %6333 }
 0xad2   :  { %v6336_v3 = vunpack.i.h.bf16 %v6334_v42  ;;  %v6335_v41 = vunpack.i.l.bf16 %v6334_v42 }
 0xad4   :  { %v6051_v47 = vpack.c.bf16 %v6336_v3, %v6335_v41 }
 0xad6   :  { %6052 = vmatprep.subr.bf16.mxu0 %v6051_v47 }
 0xad7   :  { %6050 = vmatpush3.bf16.xpose.msk.msra.mxu1 %vm7052_vm1, %v6045_v16  ;;  %6054 = vmatpush3.bf16.msra.mxu0 %v6051_v47 }
 0xae5   :  { %v3471_v0 = vpop.xlane.xlu1 %3470 }
 0xae6   :  { %v3479_v30 = vsub.f32 %v8101_v39, %v3471_v0  ;;  %v6344_v39 = vpop.permute.xlu0 %6343 }
 0xae7   :  { %v6346_v38 = vunpack.i.h.bf16 %v6344_v39  ;;  %v6345_v27 = vunpack.i.l.bf16 %v6344_v39  ;;  %v1305_v39 = vsel %vm856_vm2, %v7549_v52, 0.0 }
 0xae8   :  { %v3494_v46 = vmul.f32 1.442695, %v3479_v30 }
 0xae9   :  { %v3468_v14 = vpop.xlane.xlu1 %3467  ;;  %v6059_v41 = vpack.c.bf16 %v6346_v38, %v6345_v27 }
 0xaea   :  { %v3478_v29 = vsub.f32 %v8103_v55, %v3468_v14 }
 0xaec   :  { %v3492_v49 = vmul.f32 1.442695, %v3478_v29 }
 0xaed   :  { %v3732_v43 = vpop.permute.xlu1 %3731 }
 0xaee   :  { %6460 = vpow2.f32 %v3492_v49 }
 0xaef   :  { %6462 = vpow2.f32 %v3494_v46 }
 0xaf1   :  { %v3736_v10 = vpop.permute.xlu1 %3735 }
 0xaf5   :  { %v3740_v60 = vpop.permute.xlu1 %3739 }
 0xaf8   :  { %v8189_v57 = vpop.eup %6460 }
 0xaf9   :  { %v8191_v58 = vpop.eup %6462  ;;  %v3744_v22 = vpop.permute.xlu1 %3743  ;;  %5536 = vmatprep.mubr.msk.f32.mxu1 %vm856_vm2, %v8189_v57 }
 0xafa   :  { %5537 = vmatmul.mubr.msk.f32.gmra.mrb[94].mxu1 %vm856_vm2, %v8191_v58 }
 0xafb   :  { %5555 = vmatprep.mubr.msk.f32.mxu1 %vm702_vm0, %v3730_v13 }
 0xafd   :  { %v6339_v55 = vpop.permute.xlu1 %6338 }
 0xafe   :  { %v6341_v2 = vunpack.i.h.bf16 %v6339_v55  ;;  %v6340_v36 = vunpack.i.l.bf16 %v6339_v55  ;;  %5556 = vmatmul.mubr.msk.f32.vlgmr.msra.gmra.mrb[96].mxu1 %vm702_vm0, %v3732_v43 }
 0xaff   :  { %5558 = vmatprep.mubr.msk.f32.mxu1 %vm702_vm0, %v3734_v44 }
 0xb00   :  { %v6055_v24 = vpack.c.bf16 %v6341_v2, %v6340_v36  ;;  %v1764_v2 = vsel %vm856_vm2, %v7594_v26, 0.0 }
 0xb01   :  { %v6349_v16 = vpop.permute.xlu1 %6348 }
 0xb02   :  { %v6351_v42 = vunpack.i.h.bf16 %v6349_v16  ;;  %v6350_v3 = vunpack.i.l.bf16 %v6349_v16  ;;  %5559 = vmatmul.mubr.msk.f32.gmra.mrb[98].mxu1 %vm702_vm0, %v3736_v10  ;;  %6056 = vmatprep.subr.bf16.mxu0 %v6055_v24 }
 0xb03   :  { %5561 = vmatprep.mubr.msk.f32.mxu1 %vm702_vm0, %v3738_v5  ;;  %6058 = vmatpush3.bf16.msra.mxu0 %v6055_v24 }
 0xb04   :  { %6060 = vmatprep.subr.bf16.mxu0 %v6059_v41  ;;  %v6063_v13 = vpack.c.bf16 %v6351_v42, %v6350_v3  ;;  %v2212_v3 = vsel %vm856_vm2, %v7723_v40, 0.0  ;;  %v1311_v40 = vsel %vm856_vm2, %v7561_v53, 0.0  ;;  %v1773_v53 = vsel %vm856_vm2, %v7634_v6, 0.0 }
 0xb05   :  { %v2227_v6 = vsel %vm856_vm2, %v7767_v37, 0.0  ;;  %v3041_v37 = vsel %vm856_vm2, %v8020_v50, 0.0  ;;  %v3050_v50 = vsel %vm856_vm2, %v8041_v31, 0.0  ;;  %v3511_v31 = vsel %vm856_vm2, %v8175_v59, 0.0 }
 0xb06   :  { %5562 = vmatmul.mubr.msk.f32.gmra.mrb[100].mxu1 %vm702_vm0, %v3740_v60 }
 0xb07   :  { %5564 = vmatprep.mubr.msk.f32.mxu1 %vm702_vm0, %v3742_v8  ;;  %6062 = vmatpush3.bf16.msra.mxu0 %v6059_v41 }
 0xb08   :  { %6064 = vmatprep.subr.bf16.mxu0 %v6063_v13 }
 0xb0a   :  { %5565 = vmatmul.mubr.msk.f32.gmra.mrb[102].mxu1 %vm702_vm0, %v3744_v22 }
 0xb0b   :  { %6066 = vmatpush3.bf16.msra.mxu0 %v6063_v13  ;;  %v1308_v13 = vsel %vm856_vm2, %v7551_v1, 0.0  ;;  %v1770_v1 = vsel %vm856_vm2, %v7632_v34, 0.0  ;;  %v2224_v34 = vsel %vm856_vm2, %v7765_v4, 0.0  ;;  %v3038_v4 = vsel %vm856_vm2, %v8018_v62, 0.0 }
 0xb0c   :  { %v3499_v62 = vsel %vm856_vm2, %v8150_v45, 0.0  ;;  %v3508_v45 = vsel %vm856_vm2, %v8171_v9, 0.0 }
 0xb91   :  { %v8205_v44 = vpop.f32.mrb[88].mxu1 }
 0xb92   :  { %v8207_v47 = vpop.f32.mrb[89].mxu1 }
 0xb95   :  { %v8209_v0 = vpop.f32.mrb[90].mxu1 }
 0xb96   :  { %v8211_v30 = vpop.f32.mrb[91].mxu1 }
 0xb9d   :  { %v8213_v5 = vpop.f32.mrb[92].mxu1 }
 0xb9e   :  { %v8215_v14 = vpop.f32.mrb[93].mxu1 }
 0xbcd   :  { %v8217_v29 = vpop.f32.mrb[94].mxu1 }
 0xbce   :  { %v8219_v8 = vpop.f32.mrb[95].mxu1 }
 0xbd1   :  { %v8221_v46 = vpop.f32.mrb[96].mxu1 }
 0xbd2   :  { %v8223_v49 = vpop.f32.mrb[97].mxu1  ;;  %v3901_v43 = vsel %vm856_vm2, %v8221_v46, -inf }
 0xbd3   :  { %3902 = vmax.xlane.f32.xlu1 %v3901_v43  ;;  %v3898_v10 = vsel %vm856_vm2, %v8223_v49, -inf  ;;  %v2215_v43 = vsel %vm856_vm2, %v7753_v12, 0.0  ;;  %v1314_v12 = vsel %vm856_vm2, %v7559_v28, 0.0  ;;  %v1776_v28 = vsel %vm856_vm2, %v7640_v19, 0.0 }
 0xbd4   :  { %3899 = vmax.xlane.f32.xlu0 %v3898_v10  ;;  %v1767_v10 = vsel %vm856_vm2, %v7603_v61, 0.0  ;;  %v2221_v61 = vsel %vm856_vm2, %v7761_v48, 0.0  ;;  %v1320_v48 = vsel %vm856_vm2, %v7571_v56, 0.0  ;;  %v3496_v56 = vsel %vm856_vm2, %v8148_v7, 0.0 }
 0xbd5   :  { %v8229_v60 = vpop.f32.mrb[98].mxu1  ;;  %v3047_v7 = vsel %vm856_vm2, %v8033_v32, 0.0  ;;  %v3056_v32 = vsel %vm856_vm2, %v8059_v25, 0.0  ;;  %v3517_v25 = vsel %vm856_vm2, %v8191_v58, 0.0 }
 0xbd6   :  { %v8231_v22 = vpop.f32.mrb[99].mxu1  ;;  %v3907_v55 = vsel %vm856_vm2, %v8229_v60, -inf }
 0xbd7   :  { %1306 = vadd.xlane.f32.xlu1 %v1305_v39  ;;  %v3904_v36 = vsel %vm856_vm2, %v8231_v22, -inf  ;;  %v2218_v39 = vsel %vm856_vm2, %v7755_v33, 0.0  ;;  %v1317_v33 = vsel %vm856_vm2, %v7563_v21, 0.0 }
 0xbd8   :  { %3908 = vmax.xlane.f32.xlu0 %v3907_v55  ;;  %v8809_v55 = vld [vmem:[#allocation52_spill] sm:$0xff] }
 0xbd9   :  { %v8237_v38 = vpop.f32.mrb[100].mxu1  ;;  %v1779_v21 = vsel %vm856_vm2, %v8809_v55, 0.0 }
 0xbda   :  { %v8239_v27 = vpop.f32.mrb[101].mxu1  ;;  %v3913_v42 = vsel %vm856_vm2, %v8237_v38, -inf }
 0xbdb   :  { %1765 = vadd.xlane.f32.xlu1 %v1764_v2  ;;  %v3910_v16 = vsel %vm856_vm2, %v8239_v27, -inf  ;;  %v8810_v2 = vld [vmem:[#allocation69_spill] sm:$0xff] }
 0xbdc   :  { %3905 = vmax.xlane.f32.xlu0 %v3904_v36  ;;  %v2230_v19 = vsel %vm856_vm2, %v8810_v2, 0.0  ;;  %v3044_v36 = vsel %vm856_vm2, %v8029_v23, 0.0  ;;  %v3505_v23 = vsel %vm856_vm2, %v8163_v11, 0.0  ;;  %v3514_v11 = vsel %vm856_vm2, %v8189_v57, 0.0 }
 0xbdd   :  { %v8245_v24 = vpop.f32.mrb[102].mxu1 }
 0xbde   :  { %v8247_v52 = vpop.f32.mrb[103].mxu1  ;;  %v3919_v26 = vsel %vm856_vm2, %v8245_v24, -inf }
 0xbdf   :  { %3911 = vmax.xlane.f32.xlu1 %v3910_v16  ;;  %v3916_v41 = vsel %vm856_vm2, %v8247_v52, -inf  ;;  %v3502_v16 = vsel %vm856_vm2, %v8159_v35, 0.0  ;;  %v3053_v35 = vsel %vm856_vm2, %v8045_v51, 0.0 }
 0xbe0   :  { %3914 = vmax.xlane.f32.xlu0 %v3913_v42  ;;  %v8811_v42 = vld [vmem:[#allocation79_spill] sm:$0xff] }
 0xbe1   :  { %v3059_v9 = vsel %vm856_vm2, %v8811_v42, 0.0 }
 0xbe3   :  { %3920 = vmax.xlane.f32.xlu1 %v3919_v26  ;;  %v8812_v26 = vld [vmem:[#allocation36_spill] sm:$0xff] }
 0xbe4   :  { %2213 = vadd.xlane.f32.xlu0 %v2212_v3  ;;  %v905_v51 = vsel %vm856_vm2, %v8812_v26, 0.0  ;;  %v8813_v3 = vld [vmem:[#allocation38_spill] sm:$0xff] }
 0xbe5   :  { %v911_v59 = vsel %vm856_vm2, %v8813_v3, 0.0 }
 0xbe7   :  { %3917 = vmax.xlane.f32.xlu1 %v3916_v41  ;;  %v8814_v41 = vld [vmem:[#allocation37_spill] sm:$0xff] }
 0xbe8   :  { %1309 = vadd.xlane.f32.xlu0 %v1308_v13  ;;  %v908_v57 = vsel %vm856_vm2, %v8814_v41, 0.0  ;;  %v8815_v13 = vld [vmem:[#allocation40_spill] sm:$0xff] }
 0xbeb   :  { %2216 = vadd.xlane.f32.xlu1 %v2215_v43  ;;  %v917_v43 = vsel %vm856_vm2, %v8815_v13, 0.0 }
 0xbec   :  { %1768 = vadd.xlane.f32.xlu0 %v1767_v10  ;;  %v8816_v10 = vld [vmem:[#allocation39_spill] sm:$0xff] }
 0xbef   :  { %1312 = vadd.xlane.f32.xlu1 %v1311_v40  ;;  %v914_v40 = vsel %vm856_vm2, %v8816_v10, 0.0 }
 0xbf0   :  { %2219 = vadd.xlane.f32.xlu0 %v2218_v39  ;;  %v8817_v39 = vld [vmem:[#allocation42_spill] sm:$0xff] }
 0xbf1   :  { %v923_v58 = vsel %vm856_vm2, %v8817_v39, 0.0 }
 0xbf3   :  { %1771 = vadd.xlane.f32.xlu1 %v1770_v1  ;;  %v8818_v1 = vld [vmem:[#allocation41_spill] sm:$0xff] }
 0xbf4   :  { %1315 = vadd.xlane.f32.xlu0 %v1314_v12  ;;  %v920_v12 = vsel %vm856_vm2, %v8818_v1, 0.0 }
 0xbf7   :  { %2222 = vadd.xlane.f32.xlu1 %v2221_v61  ;;  %v8819_v61 = vld [vmem:[#allocation29_spill] sm:$0xff] }
 0xbf8   :  { %1774 = vadd.xlane.f32.xlu0 %v1773_v53  ;;  %v2644_v53 = vsel %vm856_vm2, %v8819_v61, 0.0 }
 0xbfb   :  { %1318 = vadd.xlane.f32.xlu1 %v1317_v33  ;;  %v8820_v33 = vld [vmem:[#allocation43_spill] sm:$0xff] }
 0xbfc   :  { %2225 = vadd.xlane.f32.xlu0 %v2224_v34  ;;  %v926_v34 = vsel %vm856_vm2, %v8820_v33, 0.0  ;;  %v8831_v33 = vld [vmem:[#allocation21_spill] sm:$0xff] }
 0xbff   :  { %1777 = vadd.xlane.f32.xlu1 %v1776_v28  ;;  %v8821_v28 = vld [vmem:[#allocation30_spill] sm:$0xff] }
 0xc00   :  { %1321 = vadd.xlane.f32.xlu0 %v1320_v48  ;;  %v2650_v48 = vsel %vm856_vm2, %v8821_v28, 0.0 }
 0xc03   :  { %2228 = vadd.xlane.f32.xlu1 %v2227_v6  ;;  %v8822_v6 = vld [vmem:[#allocation31_spill] sm:$0xff] }
 0xc04   :  { %1780 = vadd.xlane.f32.xlu0 %v1779_v21  ;;  %v2647_v55 = vsel %vm856_vm2, %v8822_v6, 0.0  ;;  %v1301_v21 = vpop.xlane.xlu0 %1300 }
 0xc05   :  { %6464 = vrcp.f32 %v1301_v21 }
 0xc07   :  { %3039 = vadd.xlane.f32.xlu1 %v3038_v4  ;;  %v8823_v4 = vld [vmem:[#allocation33_spill] sm:$0xff] }
 0xc08   :  { %2231 = vadd.xlane.f32.xlu0 %v2230_v19  ;;  %v2656_v2 = vsel %vm856_vm2, %v8823_v4, 0.0  ;;  %v8824_v19 = vld [vmem:[#allocation32_spill] sm:$0xff] }
 0xc0b   :  { %3497 = vadd.xlane.f32.xlu1 %v3496_v56  ;;  %v2653_v56 = vsel %vm856_vm2, %v8824_v19, 0.0 }
 0xc0c   :  { %3042 = vadd.xlane.f32.xlu0 %v3041_v37  ;;  %v1760_v37 = vpop.xlane.xlu0 %1759 }
 0xc0d   :  { %6466 = vrcp.f32 %v1760_v37  ;;  %v4198_v37 = vld [vmem:[#allocation14 + $0x18] sm:$0xff] }
 0xc0f   :  { %3045 = vadd.xlane.f32.xlu1 %v3044_v36  ;;  %v8825_v36 = vld [vmem:[#allocation34_spill] sm:$0xff] }
 0xc10   :  { %3500 = vadd.xlane.f32.xlu0 %v3499_v62  ;;  %v2659_v62 = vsel %vm856_vm2, %v8825_v36, 0.0 }
 0xc13   :  { %3503 = vadd.xlane.f32.xlu1 %v3502_v16  ;;  %v8826_v16 = vld [vmem:[#allocation35_spill] sm:$0xff] }
 0xc14   :  { %3048 = vadd.xlane.f32.xlu0 %v3047_v7  ;;  %v2662_v7 = vsel %vm856_vm2, %v8826_v16, 0.0 }
 0xc17   :  { %3051 = vadd.xlane.f32.xlu1 %v3050_v50  ;;  %v6465_v50 = vpop.eup %6464 }
 0xc18   :  { %3506 = vadd.xlane.f32.xlu0 %v3505_v23  ;;  %v1304_v23 = vpop.xlane.xlu1 %1303 }
 0xc19   :  { %6468 = vrcp.f32 %v1304_v23 }
 0xc1b   :  { %3509 = vadd.xlane.f32.xlu1 %v3508_v45  ;;  %v8827_v45 = vld [vmem:[#allocation54_spill] sm:$0xff] }
 0xc1c   :  { %3054 = vadd.xlane.f32.xlu0 %v3053_v35  ;;  %v1492_v35 = vmul.f32 %v6465_v50, %v8827_v45  ;;  %v4200_v45 = vld [vmem:[#allocation14 + $0x28] sm:$0xff] }
 0xc1f   :  { %3057 = vadd.xlane.f32.xlu1 %v3056_v32  ;;  %v6467_v32 = vpop.eup %6466 }
 0xc20   :  { %3512 = vadd.xlane.f32.xlu0 %v3511_v31  ;;  %v1763_v31 = vpop.xlane.xlu0 %1762 }
 0xc21   :  { %6470 = vrcp.f32 %v1763_v31 }
 0xc23   :  { %3515 = vadd.xlane.f32.xlu1 %v3514_v11  ;;  %v8828_v11 = vld [vmem:[#allocation62_spill] sm:$0xff]  ;;  %v6469_v26 = vpop.eup %6468 }
 0xc24   :  { %3060 = vadd.xlane.f32.xlu0 %v3059_v9  ;;  %v1943_v42 = vmul.f32 %v6467_v32, %v8828_v11  ;;  %v2211_v9 = vpop.xlane.xlu1 %2210 }
 0xc25   :  { %6472 = vrcp.f32 %v2211_v9  ;;  %v4202_v9 = vld [vmem:[#allocation14 + $0x38] sm:$0xff] }
 0xc27   :  { %906 = vadd.xlane.f32.xlu1 %v905_v51  ;;  %v4195_v51 = vld [vmem:[#allocation14] sm:$0xff] }
 0xc28   :  { %3518 = vadd.xlane.f32.xlu0 %v3517_v25  ;;  %v4196_v25 = vld [vmem:[#allocation14 + $0x8] sm:$0xff] }
 0xc29   :  { %v6067_v3 = vpack.c.bf16 %v4196_v25, %v4195_v51  ;;  %v8832_v25 = vld [vmem:[#allocation70_spill] sm:$0xff] }
 0xc2b   :  { %912 = vadd.xlane.f32.xlu1 %v911_v59  ;;  %v8829_v59 = vld [vmem:[#allocation53_spill] sm:$0xff]  ;;  %6068 = vmatprep.subr.bf16.mxu0 %v6067_v3 }
 0xc2c   :  { %909 = vadd.xlane.f32.xlu0 %v908_v57  ;;  %v1493_v41 = vmul.f32 %v6469_v26, %v8829_v59  ;;  %v6471_v57 = vpop.eup %6470  ;;  %v2665_v59 = vsel %vm856_vm2, %v8832_v25, 0.0 }
 0xc2f   :  { %918 = vadd.xlane.f32.xlu1 %v917_v43  ;;  %v8830_v43 = vld [vmem:[#allocation61_spill] sm:$0xff] }
 0xc30   :  { %915 = vadd.xlane.f32.xlu0 %v914_v40  ;;  %v1944_v10 = vmul.f32 %v6471_v57, %v8830_v43  ;;  %v6473_v40 = vpop.eup %6472  ;;  %v4204_v43 = vld [vmem:[#allocation14 + $0x48] sm:$0xff] }
 0xc33   :  { %924 = vadd.xlane.f32.xlu1 %v923_v58 }
 0xc34   :  { %921 = vadd.xlane.f32.xlu0 %v920_v12 }
 0xc37   :  { %2645 = vadd.xlane.f32.xlu1 %v2644_v53 }
 0xc38   :  { %927 = vadd.xlane.f32.xlu0 %v926_v34  ;;  %v2394_v34 = vmul.f32 %v6473_v40, %v8831_v33  ;;  %v4205_v33 = vld [vmem:[#allocation14 + $0x50] sm:$0xff] }
 0xc3b   :  { %2651 = vadd.xlane.f32.xlu1 %v2650_v48 }
 0xc3c   :  { %2648 = vadd.xlane.f32.xlu0 %v2647_v55 }
 0xc3f   :  { %2657 = vadd.xlane.f32.xlu1 %v2656_v2 }
 0xc40   :  { %2654 = vadd.xlane.f32.xlu0 %v2653_v56  ;;  %v4197_v56 = vld [vmem:[#allocation14 + $0x10] sm:$0xff] }
 0xc41   :  { %v6071_v50 = vpack.c.bf16 %v4198_v37, %v4197_v56 }
 0xc44   :  { %2660 = vadd.xlane.f32.xlu0 %v2659_v62 }
 0xc48   :  { %2663 = vadd.xlane.f32.xlu0 %v2662_v7 }
 0xc50   :  { %1508 = vrot.lane.b32.xlu1 %v1492_v35, %s6805_s8 }
 0xc54   :  { %1959 = vrot.lane.b32.xlu1 %v1943_v42, %s6804_s18  ;;  %v4201_v42 = vld [vmem:[#allocation14 + $0x30] sm:$0xff] }
 0xc5e   :  { %1510 = vrot.lane.b32.xlu0 %v1493_v41, %s6805_s8  ;;  %v6079_v41 = vpack.c.bf16 %v4202_v9, %v4201_v42  ;;  %v8837_v42 = vld [vmem:[#allocation64_spill] sm:$0xff] }
 0xc60   :  { %v3903_v13 = vpop.xlane.xlu1 %3902 }
 0xc61   :  { %v3923_v39 = vsub.f32 %v8221_v46, %v3903_v13  ;;  %v3900_v58 = vpop.xlane.xlu0 %3899  ;;  %v4203_v13 = vld [vmem:[#allocation14 + $0x40] sm:$0xff] }
 0xc62   :  { %v3922_v1 = vsub.f32 %v8223_v49, %v3900_v58  ;;  %1961 = vrot.lane.b32.xlu0 %v1944_v10, %s6804_s18  ;;  %v6083_v58 = vpack.c.bf16 %v4204_v43, %v4203_v13  ;;  %v8839_v43 = vld [vmem:[#allocation25_spill] sm:$0xff] }
 0xc63   :  { %v3932_v12 = vmul.f32 1.442695, %v3923_v39 }
 0xc64   :  { %v3930_v61 = vmul.f32 1.442695, %v3922_v1  ;;  %v1307_v53 = vpop.xlane.xlu1 %1306 }
 0xc65   :  { %v3909_v28 = vpop.xlane.xlu0 %3908 }
 0xc66   :  { %6474 = vpow2.f32 %v3930_v61  ;;  %2410 = vrot.lane.b32.xlu0 %v2394_v34, %s6803_s6  ;;  %v3925_v48 = vsub.f32 %v8229_v60, %v3909_v28  ;;  %v8833_v61 = vld [vmem:[#allocation22_spill] sm:$0xff]  ;;  %v4206_v34 = vld [vmem:[#allocation14 + $0x58] sm:$0xff] }
 0xc67   :  { %6476 = vpow2.f32 %v3932_v12 }
 0xc68   :  { %v1766_v6 = vpop.xlane.xlu1 %1765  ;;  %v3936_v21 = vmul.f32 1.442695, %v3925_v48 }
 0xc69   :  { %v3906_v55 = vpop.xlane.xlu0 %3905 }
 0xc6a   :  { %v3924_v46 = vsub.f32 %v8231_v22, %v3906_v55 }
 0xc6c   :  { %v3934_v49 = vmul.f32 1.442695, %v3924_v46  ;;  %v3912_v4 = vpop.xlane.xlu1 %3911  ;;  %v6087_v46 = vpack.c.bf16 %v4206_v34, %v4205_v33  ;;  %v8841_v34 = vld [vmem:[#allocation60_spill] sm:$0xff] }
 0xc6d   :  { %v3926_v2 = vsub.f32 %v8239_v27, %v3912_v4  ;;  %v3915_v19 = vpop.xlane.xlu0 %3914  ;;  %v4199_v27 = vld [vmem:[#allocation14 + $0x20] sm:$0xff]  ;;  %v8834_v4 = vld [vmem:[#allocation56_spill] sm:$0xff] }
 0xc6e   :  { %6478 = vpow2.f32 %v3934_v49  ;;  %v3927_v36 = vsub.f32 %v8237_v38, %v3915_v19  ;;  %v6075_v32 = vpack.c.bf16 %v4200_v45, %v4199_v27 }
 0xc6f   :  { %6480 = vpow2.f32 %v3936_v21  ;;  %v3938_v62 = vmul.f32 1.442695, %v3926_v2  ;;  %v4207_v21 = vld [vmem:[#allocation14 + $0x60] sm:$0xff] }
 0xc70   :  { %v8369_v16 = vpop.eup %6474  ;;  %v3940_v60 = vmul.f32 1.442695, %v3927_v36  ;;  %v3921_v7 = vpop.xlane.xlu1 %3920 }
 0xc71   :  { %v8371_v23 = vpop.eup %6476  ;;  %6482 = vpow2.f32 %v3938_v62  ;;  %5583 = vmatprep.mubr.msk.f32.mxu0 %vm856_vm2, %v8369_v16  ;;  %v2214_v22 = vpop.xlane.xlu0 %2213  ;;  %v3929_v35 = vsub.f32 %v8245_v24, %v3921_v7  ;;  %v4210_v7 = vld [vmem:[#allocation14 + $0x78] sm:$0xff] }
 0xc72   :  { %6484 = vpow2.f32 %v3940_v60  ;;  %5584 = vmatmul.mubr.msk.f32.vlgmr.msra.gmra.mrb[64].mxu0 %vm856_vm2, %v8371_v23  ;;  %v4209_v60 = vld [vmem:[#allocation14 + $0x70] sm:$0xff] }
 0xc73   :  { %6486 = vrcp.f32 %v2214_v22  ;;  %6070 = vmatpush3.bf16.msra.mxu0 %v6067_v3  ;;  %v3944_v26 = vmul.f32 1.442695, %v3929_v35 }
 0xc74   :  { %v3918_v38 = vpop.xlane.xlu1 %3917  ;;  %6072 = vmatprep.subr.bf16.mxu0 %v6071_v50  ;;  %6488 = vrcp.f32 %v1307_v53 }
 0xc75   :  { %v3928_v31 = vsub.f32 %v8247_v52, %v3918_v38  ;;  %v1310_v11 = vpop.xlane.xlu0 %1309  ;;  %v6095_v38 = vpack.c.bf16 %v4210_v7, %v4209_v60  ;;  %v8844_v60 = vld [vmem:[#allocation66_spill] sm:$0xff] }
 0xc76   :  { %6490 = vrcp.f32 %v1310_v11 }
 0xc77   :  { %v3942_v51 = vmul.f32 1.442695, %v3928_v31  ;;  %6074 = vmatpush3.bf16.msra.mxu0 %v6071_v50  ;;  %v8835_v50 = vld [vmem:[#allocation55_spill] sm:$0xff]  ;;  %v8836_v31 = vld [vmem:[#allocation24_spill] sm:$0xff] }
 0xc78   :  { %v8381_v24 = vpop.eup %6478  ;;  %2666 = vadd.xlane.f32.xlu1 %v2665_v59  ;;  %v2217_v3 = vpop.xlane.xlu1 %2216  ;;  %6076 = vmatprep.subr.bf16.mxu0 %v6075_v32 }
 0xc79   :  { %v8383_v57 = vpop.eup %6480  ;;  %6492 = vpow2.f32 %v3942_v51  ;;  %5586 = vmatprep.mubr.msk.f32.mxu0 %vm856_vm2, %v8381_v24  ;;  %v1769_v52 = vpop.xlane.xlu0 %1768 }
 0xc7a   :  { %6494 = vpow2.f32 %v3944_v26  ;;  %5587 = vmatmul.mubr.msk.f32.gmra.mrb[66].mxu0 %vm856_vm2, %v8383_v57 }
 0xc7b   :  { %v8389_v10 = vpop.eup %6482  ;;  %6078 = vmatpush3.bf16.msra.mxu0 %v6075_v32  ;;  %6496 = vrcp.f32 %v1766_v6  ;;  %v4208_v6 = vld [vmem:[#allocation14 + $0x68] sm:$0xff] }
 0xc7c   :  { %v8391_v40 = vpop.eup %6484  ;;  %5589 = vmatprep.mubr.msk.f32.mxu0 %vm856_vm2, %v8389_v10  ;;  %v1313_v39 = vpop.xlane.xlu1 %1312  ;;  %6080 = vmatprep.subr.bf16.mxu0 %v6079_v41  ;;  %v6091_v36 = vpack.c.bf16 %v4208_v6, %v4207_v21 }
 0xc7d   :  { %v6487_v1 = vpop.eup %6486  ;;  %v2220_v12 = vpop.xlane.xlu0 %2219 }
 0xc7e   :  { %6498 = vrcp.f32 %v2220_v12  ;;  %5590 = vmatmul.mubr.msk.f32.gmra.mrb[68].mxu0 %vm856_vm2, %v8391_v40  ;;  %v2395_v53 = vmul.f32 %v6487_v1, %v8833_v61  ;;  %v6489_v28 = vpop.eup %6488  ;;  %v8840_v12 = vld [vmem:[#allocation23_spill] sm:$0xff] }
 0xc7f   :  { %6082 = vmatpush3.bf16.msra.mxu0 %v6079_v41  ;;  %6500 = vrcp.f32 %v1769_v52  ;;  %v1494_v2 = vmul.f32 %v6489_v28, %v8834_v4  ;;  %v8843_v4 = vld [vmem:[#allocation57_spill] sm:$0xff] }
 0xc80   :  { %2412 = vrot.lane.b32.xlu0 %v2395_v53, %s6803_s6  ;;  %v1772_v48 = vpop.xlane.xlu1 %1771  ;;  %6084 = vmatprep.subr.bf16.mxu0 %v6083_v58  ;;  %v6491_v49 = vpop.eup %6490  ;;  %6502 = vrcp.f32 %v2217_v3  ;;  %v8838_v3 = vld [vmem:[#allocation63_spill] sm:$0xff] }
 0xc81   :  { %v1316_v55 = vpop.xlane.xlu0 %1315  ;;  %v1495_v22 = vmul.f32 %v6491_v49, %v8835_v50 }
 0xc83   :  { %v8400_v19 = vpop.eup %6492  ;;  %6086 = vmatpush3.bf16.msra.mxu0 %v6083_v58 }
 0xc84   :  { %v8402_v56 = vpop.eup %6494  ;;  %1512 = vrot.lane.b32.xlu0 %v1494_v2, %s6805_s8  ;;  %5592 = vmatprep.mubr.msk.f32.mxu0 %vm856_vm2, %v8400_v19  ;;  %v2223_v37 = vpop.xlane.xlu1 %2222 }
 0xc85   :  { %6504 = vrcp.f32 %v2223_v37  ;;  %v1775_v62 = vpop.xlane.xlu0 %1774  ;;  %5593 = vmatmul.mubr.msk.f32.gmra.mrb[70].mxu0 %vm856_vm2, %v8402_v56  ;;  %6088 = vmatprep.subr.bf16.mxu0 %v6087_v46  ;;  %v6497_v27 = vpop.eup %6496 }
 0xc86   :  { %6506 = vrcp.f32 %v1313_v39  ;;  %v1945_v9 = vmul.f32 %v6497_v27, %v8837_v42 }
 0xc87   :  { %6090 = vmatpush3.bf16.msra.mxu0 %v6087_v46 }
 0xc88   :  { %v6499_v45 = vpop.eup %6498  ;;  %1514 = vrot.lane.b32.xlu0 %v1495_v22, %s6805_s8  ;;  %v1319_v35 = vpop.xlane.xlu1 %1318  ;;  %6092 = vmatprep.subr.bf16.mxu0 %v6091_v36 }
 0xc89   :  { %6508 = vrcp.f32 %v1319_v35  ;;  %v2226_v32 = vpop.xlane.xlu0 %2225  ;;  %v2397_v11 = vmul.f32 %v6499_v45, %v8836_v31  ;;  %v6501_v26 = vpop.eup %6500  ;;  %v8845_v45 = vld [vmem:[#allocation65_spill] sm:$0xff] }
 0xc8a   :  { %6510 = vrcp.f32 %v1316_v55  ;;  %v6503_v59 = vpop.eup %6502  ;;  %v1946_v41 = vmul.f32 %v6501_v26, %v8838_v3 }
 0xc8b   :  { %2416 = vrot.lane.b32.xlu1 %v2397_v11, %s6803_s6  ;;  %6094 = vmatpush3.bf16.msra.mxu0 %v6091_v36  ;;  %6512 = vrcp.f32 %v1772_v48  ;;  %v2396_v61 = vmul.f32 %v6503_v59, %v8840_v12  ;;  %v8842_v48 = vld [vmem:[#allocation58_spill] sm:$0xff] }
 0xc8c   :  { %1963 = vrot.lane.b32.xlu0 %v1945_v9, %s6804_s18  ;;  %v8415_v51 = vpop.xlane.xlu1 %1777  ;;  %6096 = vmatprep.subr.bf16.mxu0 %v6095_v38  ;;  %6514 = vrcp.f32 %v1775_v62  ;;  %v8846_v9 = vld [vmem:[#allocation26_spill] sm:$0xff] }
 0xc8d   :  { %v8417_v25 = vpop.xlane.xlu0 %1321  ;;  %6516 = vrcp.f32 %v2226_v32 }
 0xc8f   :  { %v6505_v52 = vpop.eup %6504  ;;  %6098 = vmatpush3.bf16.msra.mxu0 %v6095_v38 }
 0xc90   :  { %1965 = vrot.lane.b32.xlu0 %v1946_v41, %s6804_s18  ;;  %v8421_v13 = vpop.xlane.xlu1 %2228  ;;  %v2398_v39 = vmul.f32 %v6505_v52, %v8839_v43  ;;  %v6507_v1 = vpop.eup %6506 }
 0xc91   :  { %v8424_v58 = vpop.xlane.xlu0 %1780  ;;  %v1496_v46 = vmul.f32 %v6507_v1, %v8842_v48 }
 0xc92   :  { %2418 = vrot.lane.b32.xlu1 %v2398_v39, %s6803_s6 }
 0xc93   :  { %v6509_v53 = vpop.eup %6508 }
 0xc94   :  { %2414 = vrot.lane.b32.xlu0 %v2396_v61, %s6803_s6  ;;  %v8429_v33 = vpop.xlane.xlu1 %3039  ;;  %v1498_v28 = vmul.f32 %v6509_v53, %v8841_v34  ;;  %v6511_v21 = vpop.eup %6510 }
 0xc95   :  { %v8432_v55 = vpop.xlane.xlu0 %2231  ;;  %v1497_v2 = vmul.f32 %v6511_v21, %v8843_v4  ;;  %v6513_v37 = vpop.eup %6512  ;;  %v3946_v4 = vsel %vm856_vm2, %v8369_v16, 0.0  ;;  %v8847_v16 = vld [vmem:[#allocation45_spill] sm:$0xff] }
 0xc96   :  { %1520 = vrot.lane.b32.xlu1 %v1498_v28, %s6805_s8  ;;  %v1947_v7 = vmul.f32 %v6513_v37, %v8844_v60  ;;  %v6515_v50 = vpop.eup %6514 }
 0xc97   :  { %v1948_v35 = vmul.f32 %v6515_v50, %v8845_v45  ;;  %v6517_v38 = vpop.eup %6516 }
 0xc98   :  { %1516 = vrot.lane.b32.xlu0 %v1496_v46, %s6805_s8  ;;  %v8437_v6 = vpop.xlane.xlu1 %3497  ;;  %v2399_v26 = vmul.f32 %v6517_v38, %v8846_v9 }
 0xc99   :  { %v3043_v49 = vpop.xlane.xlu0 %3042 }
 0xc9a   :  { %6518 = vrcp.f32 %v3043_v49 }
 0xc9c   :  { %1518 = vrot.lane.b32.xlu0 %v1497_v2, %s6805_s8  ;;  %v8441_v36 = vpop.xlane.xlu1 %3045 }
 0xc9d   :  { %v3501_v62 = vpop.xlane.xlu0 %3500 }
 0xc9e   :  { %6520 = vrcp.f32 %v3501_v62 }
 0xca0   :  { %1967 = vrot.lane.b32.xlu0 %v1947_v7, %s6804_s18  ;;  %v8445_v22 = vpop.xlane.xlu1 %3503 }
 0xca1   :  { %v3049_v27 = vpop.xlane.xlu0 %3048 }
 0xca2   :  { %6522 = vrcp.f32 %v3049_v27 }
 0xca4   :  { %v6519_v32 = vpop.eup %6518  ;;  %1969 = vrot.lane.b32.xlu0 %v1948_v35, %s6804_s18  ;;  %v8449_v31 = vpop.xlane.xlu1 %3051  ;;  %v3958_v35 = vsel %vm856_vm2, %v8389_v10, 0.0 }
 0xca5   :  { %v3507_v11 = vpop.xlane.xlu0 %3506  ;;  %v8452_v42 = vmul.f32 %v6519_v32, %v8080_v15  ;;  %v8848_v32 = vld [vmem:[#allocation47_spill] sm:$0xff] }
 0xca6   :  { %6524 = vrcp.f32 %v3507_v11 }
 0xca8   :  { %v6521_v59 = vpop.eup %6520  ;;  %2420 = vrot.lane.b32.xlu0 %v2399_v26, %s6803_s6  ;;  %v8456_v3 = vpop.xlane.xlu1 %3509  ;;  %v8849_v26 = vld [vmem:[#allocation44_spill] sm:$0xff] }
 0xca9   :  { %v3055_v41 = vpop.xlane.xlu0 %3054  ;;  %v8459_v52 = vmul.f32 %v6521_v59, %v8205_v44 }
 0xcaa   :  { %6526 = vrcp.f32 %v3055_v41 }
 0xcac   :  { %v6523_v43 = vpop.eup %6522  ;;  %v8461_v39 = vpop.xlane.xlu1 %3057 }
 0xcad   :  { %v3513_v1 = vpop.xlane.xlu0 %3512  ;;  %v8464_v15 = vmul.f32 %v6523_v43, %v8084_v54  ;;  %v3964_v43 = vsel %vm856_vm2, %v8400_v19, 0.0 }
 0xcae   :  { %6528 = vrcp.f32 %v3513_v1 }
 0xcb0   :  { %v6525_v12 = vpop.eup %6524  ;;  %v8466_v61 = vpop.xlane.xlu1 %3515 }
 0xcb1   :  { %v3061_v53 = vpop.xlane.xlu0 %3060  ;;  %v8469_v34 = vmul.f32 %v6525_v12, %v8209_v0  ;;  %v8850_v12 = vld [vmem:[#allocation49_spill] sm:$0xff] }
 0xcb2   :  { %6530 = vrcp.f32 %v3061_v53 }
 0xcb4   :  { %v6527_v28 = vpop.eup %6526  ;;  %v907_v44 = vpop.xlane.xlu1 %906 }
 0xcb5   :  { %6532 = vrcp.f32 %v907_v44  ;;  %v3519_v48 = vpop.xlane.xlu0 %3518  ;;  %v8472_v46 = vmul.f32 %v6527_v28, %v8088_v20  ;;  %v3952_v20 = vsel %vm856_vm2, %v8381_v24, 0.0  ;;  %v8851_v44 = vld [vmem:[#allocation46_spill] sm:$0xff] }
 0xcb6   :  { %6534 = vrcp.f32 %v3519_v48 }
 0xcb8   :  { %v6529_v21 = vpop.eup %6528  ;;  %v913_v54 = vpop.xlane.xlu1 %912 }
 0xcb9   :  { %6536 = vrcp.f32 %v913_v54  ;;  %v910_v49 = vpop.xlane.xlu0 %909  ;;  %v8477_v2 = vmul.f32 %v6529_v21, %v8213_v5 }
 0xcba   :  { %6538 = vrcp.f32 %v910_v49  ;;  %3947 = vadd.xlane.f32.xlu1 %v3946_v4 }
 0xcbc   :  { %v6531_v0 = vpop.eup %6530  ;;  %v919_v37 = vpop.xlane.xlu1 %918 }
 0xcbd   :  { %6540 = vrcp.f32 %v919_v37  ;;  %v916_v62 = vpop.xlane.xlu0 %915  ;;  %v8482_v60 = vmul.f32 %v6531_v0, %v8092_v18  ;;  %v8853_v0 = vld [vmem:[#allocation48_spill] sm:$0xff] }
 0xcbe   :  { %6542 = vrcp.f32 %v916_v62  ;;  %3953 = vadd.xlane.f32.xlu1 %v3952_v20 }
 0xcbf   :  { %v6533_v7 = vpop.eup %6532 }
 0xcc0   :  { %v6535_v50 = vpop.eup %6534  ;;  %v1066_v27 = vmul.f32 %v6533_v7, %v8847_v16  ;;  %v925_v5 = vpop.xlane.xlu1 %924 }
 0xcc1   :  { %6544 = vrcp.f32 %v925_v5  ;;  %v922_v45 = vpop.xlane.xlu0 %921  ;;  %v8488_v38 = vmul.f32 %v6535_v50, %v8217_v29  ;;  %v3949_v29 = vsel %vm856_vm2, %v8371_v23, 0.0  ;;  %v3955_v23 = vsel %vm856_vm2, %v8383_v57, 0.0 }
 0xcc2   :  { %1074 = vst.msk [vmem:[#allocation2] sm:$0xff] %vm702_vm0, %v1066_v27  ;;  %6546 = vrcp.f32 %v922_v45  ;;  %3959 = vadd.xlane.f32.xlu1 %v3958_v35  ;;  %v3961_v57 = vsel %vm856_vm2, %v8391_v40, 0.0  ;;  %v8855_v27 = vld [vmem:[#allocation50_spill] sm:$0xff]  ;;  %v3967_v40 = vsel %vm856_vm2, %v8402_v56, 0.0 }
 0xcc3   :  { %v6537_v18 = vpop.eup %6536 }
 0xcc4   :  { %v6539_v24 = vpop.eup %6538  ;;  %v1068_v11 = vmul.f32 %v6537_v18, %v8848_v32  ;;  %v2646_v9 = vpop.xlane.xlu1 %2645 }
 0xcc5   :  { %v1067_v59 = vmul.f32 %v6539_v24, %v8849_v26  ;;  %6548 = vrcp.f32 %v2646_v9  ;;  %v928_v41 = vpop.xlane.xlu0 %927  ;;  %v8856_v24 = vld [vmem:[#allocation74_spill] sm:$0xff]  ;;  %v8857_v9 = vld [vmem:[#allocation71_spill] sm:$0xff] }
 0xcc6   :  { %1076 = vst.msk [vmem:[#allocation2 + $0x10] sm:$0xff] %vm702_vm0, %v1068_v11  ;;  %6550 = vrcp.f32 %v928_v41  ;;  %3965 = vadd.xlane.f32.xlu1 %v3964_v43  ;;  %v8858_v41 = vld [vmem:[#allocation68_spill] sm:$0xff] }
 0xcc7   :  { %v6541_v10 = vpop.eup %6540  ;;  %1075 = vst.msk [vmem:[#allocation2 + $0x8] sm:$0xff] %vm702_vm0, %v1067_v59  ;;  %3950 = vadd.xlane.f32.xlu0 %v3949_v29  ;;  %6552 = vrcp.f32 %v8415_v51  ;;  %v8852_v51 = vld [vmem:[#allocation51_spill] sm:$0xff] }
 0xcc8   :  { %v6543_v1 = vpop.eup %6542  ;;  %v1070_v53 = vmul.f32 %v6541_v10, %v8850_v12  ;;  %v2652_v28 = vpop.xlane.xlu1 %2651  ;;  %v8859_v10 = vld [vmem:[#allocation76_spill] sm:$0xff]  ;;  %v8860_v12 = vld [vmem:[#allocation73_spill] sm:$0xff] }
 0xcc9   :  { %v1069_v48 = vmul.f32 %v6543_v1, %v8851_v44  ;;  %6554 = vrcp.f32 %v2652_v28  ;;  %v2649_v19 = vpop.xlane.xlu0 %2648  ;;  %v8861_v44 = vld [vmem:[#allocation27_spill] sm:$0xff] }
 0xcca   :  { %1078 = vst.msk [vmem:[#allocation2 + $0x20] sm:$0xff] %vm702_vm0, %v1070_v53  ;;  %6556 = vrcp.f32 %v2649_v19 }
 0xccb   :  { %v6545_v21 = vpop.eup %6544  ;;  %1077 = vst.msk [vmem:[#allocation2 + $0x18] sm:$0xff] %vm702_vm0, %v1069_v48  ;;  %3956 = vadd.xlane.f32.xlu0 %v3955_v23  ;;  %6558 = vrcp.f32 %v8421_v13  ;;  %v8854_v13 = vld [vmem:[#allocation72_spill] sm:$0xff] }
 0xccc   :  { %v6547_v54 = vpop.eup %6546  ;;  %v1072_v49 = vmul.f32 %v6545_v21, %v8852_v51  ;;  %v2658_v4 = vpop.xlane.xlu1 %2657 }
 0xccd   :  { %v1071_v37 = vmul.f32 %v6547_v54, %v8853_v0  ;;  %6560 = vrcp.f32 %v2658_v4  ;;  %v2655_v62 = vpop.xlane.xlu0 %2654  ;;  %v8863_v4 = vld [vmem:[#allocation78_spill] sm:$0xff] }
 0xcce   :  { %1080 = vst.msk [vmem:[#allocation2 + $0x30] sm:$0xff] %vm702_vm0, %v1072_v49  ;;  %6562 = vrcp.f32 %v2655_v62 }
 0xccf   :  { %v6549_v20 = vpop.eup %6548  ;;  %1079 = vst.msk [vmem:[#allocation2 + $0x28] sm:$0xff] %vm702_vm0, %v1071_v37  ;;  %3962 = vadd.xlane.f32.xlu0 %v3961_v57  ;;  %6564 = vrcp.f32 %v8429_v33  ;;  %v8864_v57 = vld [vmem:[#allocation59_spill] sm:$0xff] }
 0xcd0   :  { %v6551_v7 = vpop.eup %6550  ;;  %v2805_v50 = vmul.f32 %v6549_v20, %v8854_v13  ;;  %v1509_v16 = vpop.permute.xlu1 %1508 }
 0xcd1   :  { %v1073_v5 = vmul.f32 %v6551_v7, %v8855_v27  ;;  %1533 = vst.msk [vmem:[#allocation2] sm:$0xff] %vm1532_vm3, %v1509_v16  ;;  %v2661_v45 = vpop.xlane.xlu0 %2660  ;;  %v6553_v35 = vpop.eup %6552  ;;  %v8866_v16 = vld [vmem:[#allocation80_spill] sm:$0xff] }
 0xcd2   :  { %2813 = vst.msk [vmem:[#allocation2 + $0x40] sm:$0xff] %vm702_vm0, %v2805_v50  ;;  %6566 = vrcp.f32 %v2661_v45  ;;  %v1949_v43 = vmul.f32 %v6553_v35, %v8858_v41 }
 0xcd3   :  { %v6555_v18 = vpop.eup %6554  ;;  %1081 = vst.msk [vmem:[#allocation2 + $0x38] sm:$0xff] %vm702_vm0, %v1073_v5  ;;  %3968 = vadd.xlane.f32.xlu0 %v3967_v40  ;;  %6568 = vrcp.f32 %v8437_v6 }
 0xcd4   :  { %v6557_v33 = vpop.eup %6556  ;;  %v2807_v32 = vmul.f32 %v6555_v18, %v8856_v24  ;;  %v1960_v11 = vpop.permute.xlu1 %1959 }
 0xcd5   :  { %v2806_v26 = vmul.f32 %v6557_v33, %v8857_v9  ;;  %1984 = vst.msk [vmem:[#allocation2] sm:$0xff] %vm1983_vm4, %v1960_v11  ;;  %v2664_v59 = vpop.xlane.xlu0 %2663  ;;  %v6559_v29 = vpop.eup %6558 }
 0xcd6   :  { %2815 = vst.msk [vmem:[#allocation2 + $0x50] sm:$0xff] %vm702_vm0, %v2807_v32  ;;  %6570 = vrcp.f32 %v2664_v59  ;;  %v2400_v48 = vmul.f32 %v6559_v29, %v8861_v44 }
 0xcd7   :  { %v6561_v56 = vpop.eup %6560  ;;  %2814 = vst.msk [vmem:[#allocation2 + $0x48] sm:$0xff] %vm702_vm0, %v2806_v26  ;;  %1971 = vrot.lane.b32.xlu1 %v1949_v43, %s6804_s18  ;;  %6572 = vrcp.f32 %v8441_v36  ;;  %v8862_v36 = vld [vmem:[#allocation75_spill] sm:$0xff]  ;;  %v8869_v43 = vld [vmem:[#allocation77_spill] sm:$0xff] }
 0xcd8   :  { %v6563_v6 = vpop.eup %6562  ;;  %v2809_v1 = vmul.f32 %v6561_v56, %v8859_v10  ;;  %6574 = vrcp.f32 %v8417_v25 }
 0xcd9   :  { %v2808_v53 = vmul.f32 %v6563_v6, %v8860_v12  ;;  %v1511_v28 = vpop.permute.xlu0 %1510  ;;  %v6565_v19 = vpop.eup %6564  ;;  %6576 = vrcp.f32 %v8445_v22 }
 0xcda   :  { %2817 = vst.msk [vmem:[#allocation2 + $0x60] sm:$0xff] %vm702_vm0, %v2809_v1  ;;  %v3231_v51 = vmul.f32 %v6565_v19, %v8082_v17  ;;  %6578 = vrcp.f32 %v8424_v58 }
 0xcdb   :  { %1534 = vst.msk [vmem:[#allocation2 + $0x8] sm:$0xff] %vm1532_vm3, %v1511_v28  ;;  %2422 = vrot.lane.b32.xlu1 %v2400_v48, %s6803_s6  ;;  %6580 = vrcp.f32 %v8449_v31 }
 0xcdc   :  { %2816 = vst.msk [vmem:[#allocation2 + $0x58] sm:$0xff] %vm702_vm0, %v2808_v53  ;;  %v6567_v23 = vpop.eup %6566  ;;  %6582 = vrcp.f32 %v8432_v55 }
 0xcdd   :  { %v2810_v21 = vmul.f32 %v6567_v23, %v8862_v36  ;;  %v1962_v54 = vpop.permute.xlu0 %1961  ;;  %v6569_v49 = vpop.eup %6568  ;;  %6584 = vrcp.f32 %v8456_v3  ;;  %v8865_v3 = vld [vmem:[#allocation67_spill] sm:$0xff] }
 0xcde   :  { %1985 = vst.msk [vmem:[#allocation2 + $0x8] sm:$0xff] %vm1983_vm4, %v1962_v54  ;;  %v3681_v37 = vmul.f32 %v6569_v49, %v8207_v47  ;;  %6586 = vrcp.f32 %v8461_v39  ;;  %v8867_v39 = vld [vmem:[#allocation28_spill] sm:$0xff] }
 0xcdf   :  { %2818 = vst.msk [vmem:[#allocation2 + $0x68] sm:$0xff] %vm702_vm0, %v2810_v21  ;;  %3247 = vrot.lane.b32.xlu1 %v3231_v51, %s6805_s8  ;;  %6588 = vrcp.f32 %v8466_v61  ;;  %v8868_v61 = vld [vmem:[#allocation81_spill] sm:$0xff] }
 0xce0   :  { %v6571_v25 = vpop.eup %6570 }
 0xce1   :  { %v2811_v22 = vmul.f32 %v6571_v25, %v8863_v4  ;;  %v2411_v0 = vpop.permute.xlu0 %2410  ;;  %v6573_v62 = vpop.eup %6572 }
 0xce2   :  { %2435 = vst.msk [vmem:[#allocation2] sm:$0xff] %vm2434_vm5, %v2411_v0  ;;  %v6575_v17 = vpop.eup %6574  ;;  %v3233_v58 = vmul.f32 %v6573_v62, %v8086_v63 }
 0xce3   :  { %2819 = vst.msk [vmem:[#allocation2 + $0x70] sm:$0xff] %vm702_vm0, %v2811_v22  ;;  %3697 = vrot.lane.b32.xlu1 %v3681_v37, %s6804_s18  ;;  %v6577_v31 = vpop.eup %6576  ;;  %v1499_v20 = vmul.f32 %v6575_v17, %v8864_v57 }
 0xce4   :  { %v6579_v47 = vpop.eup %6578  ;;  %v3683_v7 = vmul.f32 %v6577_v31, %v8211_v30 }
 0xce5   :  { %v6581_v13 = vpop.eup %6580  ;;  %v1950_v50 = vmul.f32 %v6579_v47, %v8865_v3 }
 0xce6   :  { %v6583_v63 = vpop.eup %6582  ;;  %v3235_v27 = vmul.f32 %v6581_v13, %v8866_v16 }
 0xce7   :  { %3251 = vrot.lane.b32.xlu1 %v3233_v58, %s6805_s8  ;;  %v6585_v5 = vpop.eup %6584  ;;  %v2401_v45 = vmul.f32 %v6583_v63, %v8867_v39 }
 0xce8   :  { %v3685_v30 = vmul.f32 %v6585_v5, %v8215_v14  ;;  %v6587_v35 = vpop.eup %6586 }
 0xce9   :  { %1522 = vrot.lane.b32.xlu0 %v1499_v20, %s6805_s8  ;;  %v4179_v55 = vld [vmem:[#allocation2] sm:$0xff]  ;;  %v3237_v18 = vmul.f32 %v6587_v35, %v8868_v61  ;;  %v6589_v33 = vpop.eup %6588 }
 0xcea   :  { %5627 = vmatprep.mubr.f32.mxu0 %v4179_v55  ;;  %v3687_v14 = vmul.f32 %v6589_v33, %v8219_v8 }
 0xceb   :  { %3701 = vrot.lane.b32.xlu1 %v3683_v7, %s6804_s18 }
 0xced   :  { %1973 = vrot.lane.b32.xlu0 %v1950_v50, %s6804_s18 }
 0xcef   :  { %3255 = vrot.lane.b32.xlu1 %v3235_v27, %s6805_s8 }
 0xcf1   :  { %2424 = vrot.lane.b32.xlu0 %v2401_v45, %s6803_s6 }
 0xcf2   :  { %v2413_v40 = vpop.permute.xlu0 %2412 }
 0xcf3   :  { %2436 = vst.msk [vmem:[#allocation2 + $0x8] sm:$0xff] %vm2434_vm5, %v2413_v40  ;;  %3705 = vrot.lane.b32.xlu1 %v3685_v30, %s6804_s18 }
 0xcf5   :  { %3249 = vrot.lane.b32.xlu0 %v8452_v42, %s6805_s8 }
 0xcf6   :  { %v1513_v24 = vpop.permute.xlu0 %1512 }
 0xcf7   :  { %1535 = vst.msk [vmem:[#allocation2 + $0x10] sm:$0xff] %vm1532_vm3, %v1513_v24  ;;  %3259 = vrot.lane.b32.xlu1 %v3237_v18, %s6805_s8 }
 0xcf9   :  { %3699 = vrot.lane.b32.xlu0 %v8459_v52, %s6804_s18 }
 0xcfa   :  { %v1515_v32 = vpop.permute.xlu0 %1514  ;;  %v4180_v11 = vld [vmem:[#allocation2 + $0x8] sm:$0xff] }
 0xcfb   :  { %1536 = vst.msk [vmem:[#allocation2 + $0x18] sm:$0xff] %vm1532_vm3, %v1515_v32  ;;  %5628 = vmatmul.mubr.f32.vlgmr.msra.gmra.mrb[72].mxu0 %v4180_v11  ;;  %3709 = vrot.lane.b32.xlu1 %v3687_v14, %s6804_s18 }
 0xcfd   :  { %3253 = vrot.lane.b32.xlu0 %v8464_v15, %s6805_s8 }
 0xcfe   :  { %v1964_v42 = vpop.permute.xlu0 %1963 }
 0xcff   :  { %1986 = vst.msk [vmem:[#allocation2 + $0x10] sm:$0xff] %vm1983_vm4, %v1964_v42 }
 0xd01   :  { %3703 = vrot.lane.b32.xlu0 %v8469_v34, %s6804_s18 }
 0xd02   :  { %v1966_v9 = vpop.permute.xlu0 %1965 }
 0xd03   :  { %1987 = vst.msk [vmem:[#allocation2 + $0x18] sm:$0xff] %vm1983_vm4, %v1966_v9 }
 0xd05   :  { %3257 = vrot.lane.b32.xlu0 %v8472_v46, %s6805_s8  ;;  %v2667_v8 = vpop.xlane.xlu1 %2666 }
 0xd06   :  { %v2415_v52 = vpop.permute.xlu0 %2414  ;;  %6590 = vrcp.f32 %v2667_v8 }
 0xd07   :  { %2437 = vst.msk [vmem:[#allocation2 + $0x10] sm:$0xff] %vm2434_vm5, %v2415_v52 }
 0xd09   :  { %3707 = vrot.lane.b32.xlu0 %v8477_v2, %s6804_s18  ;;  %v2417_v15 = vpop.permute.xlu1 %2416 }
 0xd0a   :  { %v1517_v26 = vpop.permute.xlu0 %1516  ;;  %2438 = vst.msk [vmem:[#allocation2 + $0x18] sm:$0xff] %vm2434_vm5, %v2417_v15 }
 0xd0b   :  { %1537 = vst.msk [vmem:[#allocation2 + $0x20] sm:$0xff] %vm1532_vm3, %v1517_v26 }
 0xd0d   :  { %3261 = vrot.lane.b32.xlu0 %v8482_v60, %s6805_s8  ;;  %v2419_v34 = vpop.permute.xlu1 %2418 }
 0xd0e   :  { %v1519_v59 = vpop.permute.xlu0 %1518  ;;  %v4181_v46 = vld [vmem:[#allocation2 + $0x10] sm:$0xff] }
 0xd0f   :  { %1538 = vst.msk [vmem:[#allocation2 + $0x28] sm:$0xff] %vm1532_vm3, %v1519_v59  ;;  %5630 = vmatprep.mubr.f32.mxu0 %v4181_v46 }
 0xd10   :  { %v6591_v41 = vpop.eup %6590 }
 0xd11   :  { %v2812_v29 = vmul.f32 %v6591_v41, %v8869_v43  ;;  %3711 = vrot.lane.b32.xlu0 %v8488_v38, %s6804_s18  ;;  %v1521_v2 = vpop.permute.xlu1 %1520  ;;  %v4182_v56 = vld [vmem:[#allocation2 + $0x18] sm:$0xff] }
 0xd12   :  { %v1968_v6 = vpop.permute.xlu0 %1967  ;;  %1539 = vst.msk [vmem:[#allocation2 + $0x30] sm:$0xff] %vm1532_vm3, %v1521_v2  ;;  %5631 = vmatmul.mubr.f32.gmra.mrb[74].mxu0 %v4182_v56  ;;  %v8639_v2 = vld [vmem:[%s8688_s10] ss:$0 sm:$0xff]  ;;  %s6806_s10 = smov [#allocation15]  }
 0xd13   :  { %2820 = vst.msk [vmem:[#allocation2 + $0x78] sm:$0xff] %vm702_vm0, %v2812_v29  ;;  %s4384_s25 = sshll.u32 %s6806_s10, 4  ;;  %s4385_s25 = int_to_ptr.vmem [resolvable:$true] %s4384_s25 }
 0xd14   :  { %1988 = vst.msk [vmem:[#allocation2 + $0x20] sm:$0xff] %vm1983_vm4, %v1968_v6  ;;  %s6762_s12 = scalar_lea.vmem %s4385_s25, 2048  ;;  %p6767_p1 = scmp.lt.s32.totalorder %s4385_s25, %s4385_s25 }
 0xd15   :  { %2439 = vst.msk [vmem:[#allocation2 + $0x20] sm:$0xff] %vm2434_vm5, %v2419_v34  ;;  %p6763_p0 = scmp.ne.s32.totalorder %s4385_s25, %s6762_s12  ;;  %p6768_p2 = scmp.lt.s32.totalorder %s6762_s12, %s6762_s12 }
 0xd16   :  { %v1970_v60 = vpop.permute.xlu0 %1969 }
 0xd17   :  { %1989 = vst.msk [vmem:[#allocation2 + $0x28] sm:$0xff] %vm1983_vm4, %v1970_v60  ;;  %p6769_p3 = por %p6768_p2, %p6767_p1 }
 0xd19   :  { %p6770_p4 = pnand %p6769_p3, %p6763_p0 }
 0xd1a   :  { %v2421_v10 = vpop.permute.xlu0 %2420 }
 0xd1b   :  { %2440 = vst.msk [vmem:[#allocation2 + $0x28] sm:$0xff] %vm2434_vm5, %v2421_v10 }
 0xd1c   :  { %v4183_v1 = vld [vmem:[#allocation2 + $0x20] sm:$0xff] }
 0xd1d   :  { %5633 = vmatprep.mubr.f32.mxu0 %v4183_v1 }
 0xd22   :  { %v4184_v38 = vld [vmem:[#allocation2 + $0x28] sm:$0xff] }
 0xd23   :  { %5634 = vmatmul.mubr.f32.gmra.mrb[76].mxu0 %v4184_v38 }
 0xd45   :  { %v5585_v12 = vpop.f32.mrb[64].mxu0 }
 0xd46   :  { %v4092_v53 = vpop.f32.mrb[65].mxu0 }
 0xd47   :  { %v3948_v28 = vpop.xlane.xlu1 %3947 }
 0xd48   :  { %6592 = vrcp.f32 %v3948_v28 }
 0xd4b   :  { %v3954_v44 = vpop.xlane.xlu1 %3953 }
 0xd4c   :  { %6594 = vrcp.f32 %v3954_v44 }
 0xd4d   :  { %v5588_v48 = vpop.f32.mrb[66].mxu0 }
 0xd4e   :  { %v4102_v19 = vpop.f32.mrb[67].mxu0 }
 0xd4f   :  { %v3960_v23 = vpop.xlane.xlu1 %3959 }
 0xd50   :  { %6596 = vrcp.f32 %v3960_v23 }
 0xd51   :  { %v5591_v36 = vpop.f32.mrb[68].mxu0 }
 0xd52   :  { %v6593_v21 = vpop.eup %6592  ;;  %v4112_v54 = vpop.f32.mrb[69].mxu0 }
 0xd53   :  { %v3966_v51 = vpop.xlane.xlu1 %3965  ;;  %v4131_v49 = vmul.f32 %v6593_v21, %v4092_v53 }
 0xd54   :  { %v3951_v25 = vpop.xlane.xlu0 %3950  ;;  %6598 = vrcp.f32 %v3966_v51 }
 0xd55   :  { %6600 = vrcp.f32 %v3951_v25  ;;  %4147 = vrot.lane.b32.xlu1 %v4131_v49, %s6803_s6 }
 0xd56   :  { %v6595_v4 = vpop.eup %6594 }
 0xd57   :  { %v4133_v22 = vmul.f32 %v6595_v4, %v4102_v19  ;;  %v1972_v0 = vpop.permute.xlu1 %1971 }
 0xd58   :  { %v3957_v37 = vpop.xlane.xlu0 %3956  ;;  %1990 = vst.msk [vmem:[#allocation2 + $0x30] sm:$0xff] %vm1983_vm4, %v1972_v0  ;;  %v5594_v62 = vpop.f32.mrb[70].mxu0 }
 0xd59   :  { %6602 = vrcp.f32 %v3957_v37  ;;  %v4122_v17 = vpop.f32.mrb[71].mxu0  ;;  %4151 = vrot.lane.b32.xlu1 %v4133_v22, %s6803_s6 }
 0xd5a   :  { %v6597_v58 = vpop.eup %6596 }
 0xd5b   :  { %v4135_v31 = vmul.f32 %v6597_v58, %v4112_v54  ;;  %v2423_v57 = vpop.permute.xlu1 %2422 }
 0xd5c   :  { %v3963_v20 = vpop.xlane.xlu0 %3962  ;;  %2441 = vst.msk [vmem:[#allocation2 + $0x30] sm:$0xff] %vm2434_vm5, %v2423_v57 }
 0xd5d   :  { %6604 = vrcp.f32 %v3963_v20  ;;  %4155 = vrot.lane.b32.xlu1 %v4135_v31, %s6803_s6 }
 0xd5e   :  { %v6599_v47 = vpop.eup %6598 }
 0xd5f   :  { %v6601_v55 = vpop.eup %6600  ;;  %v4137_v7 = vmul.f32 %v6599_v47, %v4122_v17  ;;  %v3248_v13 = vpop.permute.xlu1 %3247 }
 0xd60   :  { %v3969_v3 = vpop.xlane.xlu0 %3968  ;;  %3271 = vst.msk [vmem:[#allocation2 + $0x40] sm:$0xff] %vm1532_vm3, %v3248_v13  ;;  %v4132_v50 = vmul.f32 %v6601_v55, %v5585_v12 }
 0xd61   :  { %6606 = vrcp.f32 %v3969_v3  ;;  %4159 = vrot.lane.b32.xlu1 %v4137_v7, %s6803_s6 }
 0xd62   :  { %4149 = vrot.lane.b32.xlu0 %v4132_v50, %s6803_s6 }
 0xd63   :  { %v6603_v63 = vpop.eup %6602  ;;  %v3698_v16 = vpop.permute.xlu1 %3697  ;;  %v4185_v27 = vld [vmem:[#allocation2 + $0x30] sm:$0xff] }
 0xd64   :  { %v1523_v5 = vpop.permute.xlu0 %1522  ;;  %3721 = vst.msk [vmem:[#allocation2 + $0x40] sm:$0xff] %vm1983_vm4, %v3698_v16  ;;  %5636 = vmatprep.mubr.f32.mxu0 %v4185_v27  ;;  %v4134_v39 = vmul.f32 %v6603_v63, %v5588_v48 }
 0xd65   :  { %1540 = vst.msk [vmem:[#allocation2 + $0x38] sm:$0xff] %vm1532_vm3, %v1523_v5 }
 0xd66   :  { %4153 = vrot.lane.b32.xlu0 %v4134_v39, %s6803_s6 }
 0xd67   :  { %v6605_v45 = vpop.eup %6604  ;;  %v3252_v30 = vpop.permute.xlu1 %3251 }
 0xd68   :  { %v1974_v35 = vpop.permute.xlu0 %1973  ;;  %3273 = vst.msk [vmem:[#allocation2 + $0x50] sm:$0xff] %vm1532_vm3, %v3252_v30  ;;  %v4136_v40 = vmul.f32 %v6605_v45, %v5591_v36 }
 0xd69   :  { %1991 = vst.msk [vmem:[#allocation2 + $0x38] sm:$0xff] %vm1983_vm4, %v1974_v35 }
 0xd6a   :  { %4157 = vrot.lane.b32.xlu0 %v4136_v40, %s6803_s6 }
 0xd6b   :  { %v6607_v61 = vpop.eup %6606  ;;  %v3702_v18 = vpop.permute.xlu1 %3701 }
 0xd6c   :  { %v2425_v33 = vpop.permute.xlu0 %2424  ;;  %3723 = vst.msk [vmem:[#allocation2 + $0x50] sm:$0xff] %vm1983_vm4, %v3702_v18  ;;  %v4138_v24 = vmul.f32 %v6607_v61, %v5594_v62 }
 0xd6d   :  { %2442 = vst.msk [vmem:[#allocation2 + $0x38] sm:$0xff] %vm2434_vm5, %v2425_v33 }
 0xd6e   :  { %4161 = vrot.lane.b32.xlu0 %v4138_v24, %s6803_s6 }
 0xd6f   :  { %v3256_v14 = vpop.permute.xlu1 %3255 }
 0xd70   :  { %v3250_v32 = vpop.permute.xlu0 %3249  ;;  %3275 = vst.msk [vmem:[#allocation2 + $0x60] sm:$0xff] %vm1532_vm3, %v3256_v14 }
 0xd71   :  { %3272 = vst.msk [vmem:[#allocation2 + $0x48] sm:$0xff] %vm1532_vm3, %v3250_v32 }
 0xd73   :  { %v3706_v11 = vpop.permute.xlu1 %3705 }
 0xd74   :  { %v3700_v42 = vpop.permute.xlu0 %3699  ;;  %3725 = vst.msk [vmem:[#allocation2 + $0x60] sm:$0xff] %vm1983_vm4, %v3706_v11  ;;  %v4186_v9 = vld [vmem:[#allocation2 + $0x38] sm:$0xff] }
 0xd75   :  { %3722 = vst.msk [vmem:[#allocation2 + $0x48] sm:$0xff] %vm1983_vm4, %v3700_v42  ;;  %5637 = vmatmul.mubr.f32.gmra.mrb[78].mxu0 %v4186_v9 }
 0xd77   :  { %v3260_v8 = vpop.permute.xlu1 %3259 }
 0xd78   :  { %v3254_v52 = vpop.permute.xlu0 %3253  ;;  %3277 = vst.msk [vmem:[#allocation2 + $0x70] sm:$0xff] %vm1532_vm3, %v3260_v8 }
 0xd79   :  { %3274 = vst.msk [vmem:[#allocation2 + $0x58] sm:$0xff] %vm1532_vm3, %v3254_v52 }
 0xd7b   :  { %v3710_v15 = vpop.permute.xlu1 %3709 }
 0xd7c   :  { %v3704_v26 = vpop.permute.xlu0 %3703  ;;  %3727 = vst.msk [vmem:[#allocation2 + $0x70] sm:$0xff] %vm1983_vm4, %v3710_v15 }
 0xd7d   :  { %3724 = vst.msk [vmem:[#allocation2 + $0x58] sm:$0xff] %vm1983_vm4, %v3704_v26 }
 0xd80   :  { %v3258_v34 = vpop.permute.xlu0 %3257 }
 0xd81   :  { %3276 = vst.msk [vmem:[#allocation2 + $0x68] sm:$0xff] %vm1532_vm3, %v3258_v34 }
 0xd84   :  { %v3708_v59 = vpop.permute.xlu0 %3707 }
 0xd85   :  { %3726 = vst.msk [vmem:[#allocation2 + $0x68] sm:$0xff] %vm1983_vm4, %v3708_v59 }
 0xd88   :  { %v3262_v46 = vpop.permute.xlu0 %3261 }
 0xd89   :  { %3278 = vst.msk [vmem:[#allocation2 + $0x78] sm:$0xff] %vm1532_vm3, %v3262_v46 }
 0xd8c   :  { %v3712_v41 = vpop.permute.xlu0 %3711 }
 0xd8d   :  { %3728 = vst.msk [vmem:[#allocation2 + $0x78] sm:$0xff] %vm1983_vm4, %v3712_v41 }
 0xdc7   :  { %v4148_v43 = vpop.permute.xlu1 %4147 }
 0xdc8   :  { %4171 = vst.msk [vmem:[#allocation2 + $0x40] sm:$0xff] %vm2434_vm5, %v4148_v43 }
 0xdcb   :  { %v4152_v29 = vpop.permute.xlu1 %4151 }
 0xdcc   :  { %4173 = vst.msk [vmem:[#allocation2 + $0x50] sm:$0xff] %vm2434_vm5, %v4152_v29 }
 0xdce   :  { %v5629_v56 = vpop.f32.mrb[72].mxu0 }
 0xdcf   :  { %v4290_v6 = vadd.f32 %v5629_v56, %v8639_v2  ;;  %v4284_v60 = vpop.f32.mrb[73].mxu0  ;;  %v4156_v10 = vpop.permute.xlu1 %4155  ;;  %v4187_v1 = vld [vmem:[#allocation2 + $0x40] sm:$0xff] }
 0xdd0   :  { %v4285_v38 = vadd.f32 %v8639_v2, %v4284_v60  ;;  %4175 = vst.msk [vmem:[#allocation2 + $0x60] sm:$0xff] %vm2434_vm5, %v4156_v10  ;;  %5639 = vmatprep.mubr.f32.mxu0 %v4187_v1 }
 0xdd1   :  { %4364 = vst [vmem:[#allocation15 + $0x8] sm:$0xff] %v4290_v6 }
 0xdd2   :  { %4363 = vst [vmem:[#allocation15] sm:$0xff] %v4285_v38 }
 0xdd3   :  { %v4160_v12 = vpop.permute.xlu1 %4159  ;;  %v4189_v19 = vld [vmem:[#allocation2 + $0x50] sm:$0xff] }
 0xdd4   :  { %v4150_v53 = vpop.permute.xlu0 %4149  ;;  %4177 = vst.msk [vmem:[#allocation2 + $0x70] sm:$0xff] %vm2434_vm5, %v4160_v12 }
 0xdd5   :  { %4172 = vst.msk [vmem:[#allocation2 + $0x48] sm:$0xff] %vm2434_vm5, %v4150_v53 }
 0xdd7   :  { %v4191_v21 = vld [vmem:[#allocation2 + $0x60] sm:$0xff] }
 0xdd8   :  { %v4154_v28 = vpop.permute.xlu0 %4153 }
 0xdd9   :  { %4174 = vst.msk [vmem:[#allocation2 + $0x58] sm:$0xff] %vm2434_vm5, %v4154_v28 }
 0xddb   :  { %v4193_v49 = vld [vmem:[#allocation2 + $0x70] sm:$0xff] }
 0xddc   :  { %v4158_v44 = vpop.permute.xlu0 %4157  ;;  %v4188_v48 = vld [vmem:[#allocation2 + $0x48] sm:$0xff] }
 0xddd   :  { %4176 = vst.msk [vmem:[#allocation2 + $0x68] sm:$0xff] %vm2434_vm5, %v4158_v44  ;;  %5640 = vmatmul.mubr.f32.gmra.mrb[80].mxu0 %v4188_v48 }
 0xdde   :  { %5642 = vmatprep.mubr.f32.mxu0 %v4189_v19 }
 0xde0   :  { %v4162_v23 = vpop.permute.xlu0 %4161  ;;  %v4190_v36 = vld [vmem:[#allocation2 + $0x58] sm:$0xff] }
 0xde1   :  { %4178 = vst.msk [vmem:[#allocation2 + $0x78] sm:$0xff] %vm2434_vm5, %v4162_v23  ;;  %5643 = vmatmul.mubr.f32.gmra.mrb[82].mxu0 %v4190_v36 }
 0xde2   :  { %5645 = vmatprep.mubr.f32.mxu0 %v4191_v21 }
 0xde4   :  { %v4192_v54 = vld [vmem:[#allocation2 + $0x68] sm:$0xff] }
 0xde5   :  { %5646 = vmatmul.mubr.f32.gmra.mrb[84].mxu0 %v4192_v54  ;;  %v5632_v51 = vpop.f32.mrb[74].mxu0 }
 0xde6   :  { %v4300_v25 = vadd.f32 %v5632_v51, %v8639_v2  ;;  %5648 = vmatprep.mubr.f32.mxu0 %v4193_v49  ;;  %v4294_v4 = vpop.f32.mrb[75].mxu0 }
 0xde7   :  { %v4295_v22 = vadd.f32 %v8639_v2, %v4294_v4 }
 0xde8   :  { %4366 = vst [vmem:[#allocation15 + $0x18] sm:$0xff] %v4300_v25  ;;  %v4194_v0 = vld [vmem:[#allocation2 + $0x78] sm:$0xff] }
 0xde9   :  { %4365 = vst [vmem:[#allocation15 + $0x10] sm:$0xff] %v4295_v22  ;;  %5649 = vmatmul.mubr.f32.gmra.mrb[86].mxu0 %v4194_v0 }
 0xdf6   :  { %v5635_v37 = vpop.f32.mrb[76].mxu0 }
 0xdf7   :  { %v4310_v62 = vadd.f32 %v5635_v37, %v8639_v2  ;;  %v4304_v17 = vpop.f32.mrb[77].mxu0 }
 0xdf8   :  { %v4305_v58 = vadd.f32 %v8639_v2, %v4304_v17 }
 0xdf9   :  { %4368 = vst [vmem:[#allocation15 + $0x28] sm:$0xff] %v4310_v62 }
 0xdfa   :  { %4367 = vst [vmem:[#allocation15 + $0x20] sm:$0xff] %v4305_v58 }
 0xe48   :  { %v5638_v31 = vpop.f32.mrb[78].mxu0 }
 0xe49   :  { %v4320_v57 = vadd.f32 %v5638_v31, %v8639_v2  ;;  %v4314_v20 = vpop.f32.mrb[79].mxu0 }
 0xe4a   :  { %v4315_v47 = vadd.f32 %v8639_v2, %v4314_v20 }
 0xe4b   :  { %4370 = vst [vmem:[#allocation15 + $0x38] sm:$0xff] %v4320_v57 }
 0xe4c   :  { %4369 = vst [vmem:[#allocation15 + $0x30] sm:$0xff] %v4315_v47 }
 0xeb0   :  { %v5641_v55 = vpop.f32.mrb[80].mxu0 }
 0xeb1   :  { %v4330_v7 = vadd.f32 %v5641_v55, %v8639_v2  ;;  %v4324_v13 = vpop.f32.mrb[81].mxu0 }
 0xeb2   :  { %v4325_v3 = vadd.f32 %v8639_v2, %v4324_v13 }
 0xeb3   :  { %4372 = vst [vmem:[#allocation15 + $0x48] sm:$0xff] %v4330_v7 }
 0xeb4   :  { %4371 = vst [vmem:[#allocation15 + $0x40] sm:$0xff] %v4325_v3  ;;  %v5644_v50 = vpop.f32.mrb[82].mxu0 }
 0xeb5   :  { %v4340_v63 = vadd.f32 %v5644_v50, %v8639_v2  ;;  %v4334_v16 = vpop.f32.mrb[83].mxu0 }
 0xeb6   :  { %v4335_v27 = vadd.f32 %v8639_v2, %v4334_v16 }
 0xeb7   :  { %4374 = vst [vmem:[#allocation15 + $0x58] sm:$0xff] %v4340_v63 }
 0xeb8   :  { %4373 = vst [vmem:[#allocation15 + $0x50] sm:$0xff] %v4335_v27  ;;  %v5647_v5 = vpop.f32.mrb[84].mxu0 }
 0xeb9   :  { %v4350_v39 = vadd.f32 %v5647_v5, %v8639_v2  ;;  %v4344_v45 = vpop.f32.mrb[85].mxu0 }
 0xeba   :  { %v4345_v30 = vadd.f32 %v8639_v2, %v4344_v45 }
 0xebb   :  { %4376 = vst [vmem:[#allocation15 + $0x68] sm:$0xff] %v4350_v39 }
 0xebc   :  { %4375 = vst [vmem:[#allocation15 + $0x60] sm:$0xff] %v4345_v30  ;;  %v5650_v35 = vpop.f32.mrb[86].mxu0 }
 0xebd   :  { %v4360_v40 = vadd.f32 %v5650_v35, %v8639_v2  ;;  %v4354_v61 = vpop.f32.mrb[87].mxu0 }
 0xebe   :  { %v4355_v18 = vadd.f32 %v8639_v2, %v4354_v61 }
 0xebf   :  { %4378 = vst [vmem:[#allocation15 + $0x78] sm:$0xff] %v4360_v40 }
 0xec0   :  { %4377 = vst [vmem:[#allocation15 + $0x70] sm:$0xff] %v4355_v18 }
 0xec1   :  { %6773 = shalt.err (!%p6770_p4)
}
 0xec2   :  { %s6774_s14 = scalar_lea.hbm %s8689_s11, 2048 }
 0xec3   :  { %p6775_p5 = scmp.ne.s32.totalorder %s8689_s11, %s6774_s14  ;;  %p6778_p6 = scmp.lt.u32.totalorder %s6774_s14, %s8689_s11 }
 0xec5   :  { %p6780_p7 = pnand %p6778_p6, %p6775_p5 }
 0xec7   :  { %6783 = shalt.err (!%p6780_p7)
}
 0xec8   :  { %4390 = dma.vmem_to_hbm [thread:$0]  %s4385_s25, 2048, %s8689_s11, [#allocation5], %s6796_s29, %s6796_s29, %s6797_s30  }
 0xec9   :  { %6792 = dma.done.wait [#allocation5], 2048  }
 0xeca   :  { %6793 = vsyncadd [#allocation5], 4294965248 }
 0xecb   :  { %4394 = vsyncpa [#allocation4], 1 }
 0xecc   :  { %4395 = vsyncpa [#allocation7], 1 }
 0xecd   :  { %4396 = vsyncpa [#allocation10], 1 }
 0xece   :  { %4397 = vsyncpa [#allocation13], 1 }
 0xecf   :  { %4398 = vsyncpa [#allocation5], 1 }

</bundles_post_ra>
